<compile_context>
chip_gen: v7x
topology: tpu7x:2x2x1
jax: 0.10.0
libtpu: 0.0.40
codegen_flags: <defaults>
</compile_context>

<pallas_src>
import math
import numpy as np
import jax
import jax.numpy as jnp
from jax.experimental import pallas as pl
from jax.experimental.pallas import tpu as pltpu

# ---- frozen "random" augmentation parameters (one deterministic draw) -------
SIGMA = 1.0            # GaussianBlur sigma, from U(0.01, 2.0)
ANGLE_DEG = 1.0        # RandomRotation(math.pi/2) => degrees in (-1.5708, 1.5708)
CROP_I, CROP_J = 2, 3  # RandomResizedCrop top-left offset
CROP_H, CROP_W = 11, 11
OUT_SIZE = 32          # TODO(synk): original RandomResizedCrop output is 448; use 32 for the small synthetic run.
BRIGHT = 1.25          # from U(0, 3)
CONTRAST = 0.9         # from U(0, 3)
SAT = 1.5              # from U(0, 3)
HUE = 0.1              # from U(-0.25, 0.25)


# ------------------- host-side construction of resampling matrices -----------
def gaussian_kernel1d(ksize, sigma):
    x = np.linspace(-(ksize - 1) * 0.5, (ksize - 1) * 0.5, ksize)
    pdf = np.exp(-0.5 * (x / sigma) ** 2)
    return (pdf / pdf.sum()).astype(np.float32)


def _reflect(p, n):
    if p < 0:
        return -p
    if p >= n:
        return 2 * n - 2 - p
    return p


def blur_matrix(n, k1d):
    k = len(k1d)
    r = k // 2
    m = np.zeros((n, n), np.float32)
    for o in range(n):
        for t in range(k):
            m[o, _reflect(o + t - r, n)] += k1d[t]
    return m


def rotation_matrix_nearest(h, w, angle_deg):
    # nearest-neighbour rotation about image centre, fill=0
    a = math.radians(angle_deg)
    cy, cx = (h - 1) * 0.5, (w - 1) * 0.5
    ca, sa = math.cos(a), math.sin(a)
    m = np.zeros((h * w, h * w), np.float32)
    for y in range(h):
        for x in range(w):
            dx, dy = x - cx, y - cy
            sx = ca * dx + sa * dy + cx
            sy = -sa * dx + ca * dy + cy
            isx, isy = int(round(sx)), int(round(sy))
            if 0 <= isx < w and 0 <= isy < h:
                m[y * w + x, isy * w + isx] = 1.0
    return m


def crop_resize_matrix(n_in, crop_off, crop_len, n_out):
    # bilinear resize (align_corners=False) of rows [crop_off, crop_off+crop_len)
    m = np.zeros((n_out, n_in), np.float32)
    for d in range(n_out):
        src = (d + 0.5) * crop_len / n_out - 0.5
        src = min(max(src, 0.0), crop_len - 1.0)
        s0 = int(math.floor(src))
        s1 = min(s0 + 1, crop_len - 1)
        wt = src - s0
        m[d, crop_off + s0] += 1.0 - wt
        m[d, crop_off + s1] += wt
    return m


def fused_resample_matrix(h, w, out_size):
    """(OH*OW, H*W) = crop/resize o rotation o gaussian blur (row-major flat)."""
    k1d = gaussian_kernel1d(7, SIGMA)
    by = blur_matrix(h, k1d)                              # (H, H)
    bx = blur_matrix(w, k1d)                              # (W, W)
    rot = rotation_matrix_nearest(h, w, ANGLE_DEG)        # (HW, HW) one-hot
    cy = crop_resize_matrix(h, CROP_I, CROP_H, out_size)  # (OH, H)
    cx = crop_resize_matrix(w, CROP_J, CROP_W, out_size)  # (OW, W)
    # vec(cy @ R(by X bx^T) @ cx^T) = (cy (x) cx) @ rot @ (by (x) bx) @ vec(X)
    return (np.kron(cy, cx) @ rot @ np.kron(by, bx)).astype(np.float32)


# --------------------------------- kernel ------------------------------------
def _blend(a, b, ratio):
    # torchvision _blend for float tensors: clamp(ratio*a + (1-ratio)*b, 0, 1)
    return jnp.clip(ratio * a + (1.0 - ratio) * b, 0.0, 1.0)


def aug_kernel(x_ref, mt_ref, o_ref):
    nb = x_ref.shape[1] // 3                 # images per grid step
    rows = x_ref[0]                          # (3*NB, HW)  bf16, channel-major rows
    mt = mt_ref[...]                         # (HW, OH*OW) bf16, fused resampler^T
    # (brightness ratio is pre-folded into mt on the host)

    # GaussianBlur + RandomRotation + RandomResizedCrop + brightness scale
    # fused into one MXU matmul with f32 accumulation.
    z = jnp.dot(rows, mt, preferred_element_type=jnp.float32)   # (3*NB, OHW) f32

    # ColorJitter, fixed op order: brightness, contrast, saturation, hue.
    # brightness blend against zeros => only the clamp remains.
    z = jnp.clip(z, 0.0, 1.0)

    # channel slices are 8-sublane aligned (nb chosen as a multiple of 8)
    r = z[0:nb]
    g = z[nb:2 * nb]
    b = z[2 * nb:3 * nb]

    # contrast: per-image mean of the grayscale over spatial pixels
    gray = 0.2989 * r + 0.587 * g + 0.114 * b              # (NB, OHW)
    mean = jnp.mean(gray, axis=-1, keepdims=True)          # (NB, 1) per image
    r = _blend(r, mean, CONTRAST)
    g = _blend(g, mean, CONTRAST)
    b = _blend(b, mean, CONTRAST)

    # saturation
    gray = 0.2989 * r + 0.587 * g + 0.114 * b
    r = _blend(r, gray, SAT)
    g = _blend(g, gray, SAT)
    b = _blend(b, gray, SAT)

    # hue shift via RGB -> HSV -> RGB (elementwise f32 on 1024-lane rows);
    # divisions routed to the EUP via approximate reciprocal (free slot).
    maxc = jnp.maximum(jnp.maximum(r, g), b)
    minc = jnp.minimum(jnp.minimum(r, g), b)
    v = maxc
    delta = maxc - minc
    inv_maxc = pl.reciprocal(jnp.where(maxc > 0, maxc, 1.0), approx=True)
    s = jnp.where(maxc > 0, delta * inv_maxc, 0.0)
    inv_dd = pl.reciprocal(jnp.where(delta > 0, delta, 1.0), approx=True)
    rc = (maxc - r) * inv_dd
    gc = (maxc - g) * inv_dd
    bc = (maxc - b) * inv_dd
    h = jnp.where(maxc == r, bc - gc,
                  jnp.where(maxc == g, 2.0 + rc - bc, 4.0 + gc - rc))
    h = jnp.where(delta > 0, h, 0.0)
    h = (h / 6.0) % 1.0
    h = (h + HUE) % 1.0
    k6 = jnp.floor(h * 6.0)
    f = h * 6.0 - k6
    p = v * (1.0 - s)
    q = v * (1.0 - f * s)
    t = v * (1.0 - (1.0 - f) * s)
    k = k6.astype(jnp.int32) % 6
    r2 = jnp.where(k == 0, v, jnp.where(k == 1, q, jnp.where(k == 2, p,
         jnp.where(k == 3, p, jnp.where(k == 4, t, v)))))
    g2 = jnp.where(k == 0, t, jnp.where(k == 1, v, jnp.where(k == 2, v,
         jnp.where(k == 3, q, p))))
    b2 = jnp.where(k == 0, p, jnp.where(k == 1, p, jnp.where(k == 2, t,
         jnp.where(k == 3, v, jnp.where(k == 4, v, q)))))

    # direct channel-slice stores (no concatenate copy); 1024-lane unmasked vst
    o_ref[0, 0:nb] = r2.astype(o_ref.dtype)
    o_ref[0, nb:2 * nb] = g2.astype(o_ref.dtype)
    o_ref[0, 2 * nb:3 * nb] = b2.astype(o_ref.dtype)


# --------------------------------- wrapper -----------------------------------
def _pick_nb(n, c, want=8):
    # largest nb <= want dividing n; prefer nb % 8 == 0 so per-channel slices
    # are sublane-tile aligned, then c*nb % 8 == 0, then anything that divides.
    cands = [nb for nb in range(1, n + 1) if n % nb == 0 and nb <= max(want, 1)]
    best = [nb for nb in cands if nb % 8 == 0]
    if not best:
        best = [nb for nb in cands if (c * nb) % 8 == 0]
    if not best:
        best = cands
    return max(best)


def train_transforms(x, nb=8):
    B, T, C, H, W = x.shape
    assert C == 3, "ColorJitter / hue shift requires RGB"
    N = B * T
    nb = _pick_nb(N, C, want=nb)
    G = N // nb                     # grid steps (>=2 keeps both v7x TCs busy)
    HW = H * W
    OH = OW = OUT_SIZE
    OHW = OH * OW

    # fused geometric resampler, brightness ratio folded in, shipped transposed
    # and in bf16 (MXU-native on v5e/v6e/v7x); f32 accumulation keeps the
    # blur/crop weights accurate enough.
    m = fused_resample_matrix(H, W, OUT_SIZE) * np.float32(BRIGHT)
    mt = jnp.asarray(m.T, dtype=jnp.bfloat16)

    # lane-dense layout: rows = channel-major (c*nb + n) per group, lanes = H*W
    xr = x.astype(jnp.bfloat16).reshape(N, C, HW)
    xr = xr.reshape(G, nb, C, HW).transpose(0, 2, 1, 3).reshape(G, C * nb, HW)

    out = pl.pallas_call(
        aug_kernel,
        out_shape=jax.ShapeDtypeStruct((G, C * nb, OHW), jnp.float32),
        grid_spec=pltpu.PrefetchScalarGridSpec(
            num_scalar_prefetch=0,
            grid=(G,),
            in_specs=[
                pl.BlockSpec((1, C * nb, HW), lambda n: (n, 0, 0)),
                # constant block index -> Pallas skips re-DMA across grid steps
                pl.BlockSpec((HW, OHW), lambda n: (0, 0)),
            ],
            out_specs=pl.BlockSpec((1, C * nb, OHW), lambda n: (n, 0, 0)),
        ),
        compiler_params=pltpu.CompilerParams(
            dimension_semantics=("parallel",)),
    )(xr, mt)

    out = out.reshape(G, C, nb, OH, OW).transpose(0, 2, 1, 3, 4)
    return out.reshape(B, T, C, OH, OW)


if __name__ == "__main__":
    key = jax.random.PRNGKey(0)
    B, T, C, H, W = 2, 8, 3, 16, 16
    x = jax.random.uniform(key, (B, T, C, H, W), dtype=jnp.float32)
    y = train_transforms(x)
    jax.block_until_ready(y)
    assert y.shape == (B, T, C, OUT_SIZE, OUT_SIZE)
    assert bool(jnp.all(jnp.isfinite(y)))
    assert bool(jnp.all((y >= 0.0) & (y <= 1.0)))
    print("KERNEL_OK")
</pallas_src>

<mosaic_0001>
module attributes {stable_mosaic.version = 11 : i64} {
  func.func @aug_kernel(%arg0: i32, %arg1: memref<1x24x256xbf16, #tpu.memory_space<vmem>>, %arg2: memref<256x1024xbf16, #tpu.memory_space<vmem>>, %arg3: memref<1x24x1024xf32, #tpu.memory_space<vmem>>) attributes {dimension_semantics = [#tpu.dimension_semantics<parallel>], iteration_bounds = array<i64: 2>, scalar_prefetch = 0 : i64, scratch_operands = 0 : i64, tpu.core_type = #tpu.core_type<tc>, window_params = [{transform_indices = @transform_0, window_bounds = array<i64: 1, 24, 256>}, {pipeline_mode = #tpu.pipeline_mode<synchronous>, transform_indices = @transform_1, window_bounds = array<i64: 256, 1024>}, {transform_indices = @transform_2, window_bounds = array<i64: 1, 24, 1024>}]} {
    %c0 = arith.constant 0 : index
    %c0_0 = arith.constant 0 : index
    %c0_1 = arith.constant 0 : index
    %0 = vector.load %arg1[%c0, %c0_0, %c0_1] : memref<1x24x256xbf16, #tpu.memory_space<vmem>>, vector<1x24x256xbf16>
    %1 = vector.shape_cast %0 : vector<1x24x256xbf16> to vector<24x256xbf16>
    %c0_2 = arith.constant 0 : index
    %c0_3 = arith.constant 0 : index
    %2 = vector.load %arg2[%c0_2, %c0_3] : memref<256x1024xbf16, #tpu.memory_space<vmem>>, vector<256x1024xbf16>
    %cst = arith.constant dense<0.000000e+00> : vector<24x1024xf32>
    %3 = tpu.matmul %1, %2, %cst {dimension_numbers = #tpu.dot_dimension_numbers<[1], [0], [0], [1], [0, 0, 1, 1], [], []>} : vector<24x256xbf16>, vector<256x1024xbf16>, vector<24x1024xf32> -> vector<24x1024xf32>
    %cst_4 = arith.constant 0.000000e+00 : f32
    %cst_5 = arith.constant 1.000000e+00 : f32
    %4 = vector.broadcast %cst_4 : f32 to vector<24x1024xf32>
    %5 = arith.maximumf %4, %3 : vector<24x1024xf32>
    %6 = vector.broadcast %cst_5 : f32 to vector<24x1024xf32>
    %7 = arith.minimumf %6, %5 : vector<24x1024xf32>
    %8 = vector.extract_strided_slice %7 {offsets = [0, 0], sizes = [8, 1024], strides = [1, 1]} : vector<24x1024xf32> to vector<8x1024xf32>
    %9 = vector.extract_strided_slice %7 {offsets = [8, 0], sizes = [8, 1024], strides = [1, 1]} : vector<24x1024xf32> to vector<8x1024xf32>
    %10 = vector.extract_strided_slice %7 {offsets = [16, 0], sizes = [8, 1024], strides = [1, 1]} : vector<24x1024xf32> to vector<8x1024xf32>
    %cst_6 = arith.constant 2.989000e-01 : f32
    %11 = vector.broadcast %cst_6 : f32 to vector<8x1024xf32>
    %12 = arith.mulf %11, %8 : vector<8x1024xf32>
    %cst_7 = arith.constant 5.870000e-01 : f32
    %13 = vector.broadcast %cst_7 : f32 to vector<8x1024xf32>
    %14 = arith.mulf %13, %9 : vector<8x1024xf32>
    %15 = arith.addf %12, %14 : vector<8x1024xf32>
    %cst_8 = arith.constant 1.140000e-01 : f32
    %16 = vector.broadcast %cst_8 : f32 to vector<8x1024xf32>
    %17 = arith.mulf %16, %10 : vector<8x1024xf32>
    %18 = arith.addf %15, %17 : vector<8x1024xf32>
    %cst_9 = arith.constant dense<0.000000e+00> : vector<8xf32>
    %19 = vector.multi_reduction <add>, %18, %cst_9 [1] : vector<8x1024xf32> to vector<8xf32>
    %20 = vector.shape_cast %19 : vector<8xf32> to vector<8x1xf32>
    %cst_10 = arith.constant 1.024000e+03 : f32
    %21 = vector.broadcast %cst_10 : f32 to vector<8x1xf32>
    %22 = arith.divf %20, %21 : vector<8x1xf32>
    %cst_11 = arith.constant 0.899999976 : f32
    %23 = vector.broadcast %cst_11 : f32 to vector<8x1024xf32>
    %24 = arith.mulf %23, %8 : vector<8x1024xf32>
    %cst_12 = arith.constant 1.000000e-01 : f32
    %25 = vector.broadcast %cst_12 : f32 to vector<8x1xf32>
    %26 = arith.mulf %25, %22 : vector<8x1xf32>
    %27 = vector.broadcast %26 : vector<8x1xf32> to vector<8x1024xf32>
    %28 = arith.addf %24, %27 : vector<8x1024xf32>
    %cst_13 = arith.constant 0.000000e+00 : f32
    %cst_14 = arith.constant 1.000000e+00 : f32
    %29 = vector.broadcast %cst_13 : f32 to vector<8x1024xf32>
    %30 = arith.maximumf %29, %28 : vector<8x1024xf32>
    %31 = vector.broadcast %cst_14 : f32 to vector<8x1024xf32>
    %32 = arith.minimumf %31, %30 : vector<8x1024xf32>
    %cst_15 = arith.constant 0.899999976 : f32
    %33 = vector.broadcast %cst_15 : f32 to vector<8x1024xf32>
    %34 = arith.mulf %33, %9 : vector<8x1024xf32>
    %cst_16 = arith.constant 1.000000e-01 : f32
    %35 = vector.broadcast %cst_16 : f32 to vector<8x1xf32>
    %36 = arith.mulf %35, %22 : vector<8x1xf32>
    %37 = vector.broadcast %36 : vector<8x1xf32> to vector<8x1024xf32>
    %38 = arith.addf %34, %37 : vector<8x1024xf32>
    %cst_17 = arith.constant 0.000000e+00 : f32
    %cst_18 = arith.constant 1.000000e+00 : f32
    %39 = vector.broadcast %cst_17 : f32 to vector<8x1024xf32>
    %40 = arith.maximumf %39, %38 : vector<8x1024xf32>
    %41 = vector.broadcast %cst_18 : f32 to vector<8x1024xf32>
    %42 = arith.minimumf %41, %40 : vector<8x1024xf32>
    %cst_19 = arith.constant 0.899999976 : f32
    %43 = vector.broadcast %cst_19 : f32 to vector<8x1024xf32>
    %44 = arith.mulf %43, %10 : vector<8x1024xf32>
    %cst_20 = arith.constant 1.000000e-01 : f32
    %45 = vector.broadcast %cst_20 : f32 to vector<8x1xf32>
    %46 = arith.mulf %45, %22 : vector<8x1xf32>
    %47 = vector.broadcast %46 : vector<8x1xf32> to vector<8x1024xf32>
    %48 = arith.addf %44, %47 : vector<8x1024xf32>
    %cst_21 = arith.constant 0.000000e+00 : f32
    %cst_22 = arith.constant 1.000000e+00 : f32
    %49 = vector.broadcast %cst_21 : f32 to vector<8x1024xf32>
    %50 = arith.maximumf %49, %48 : vector<8x1024xf32>
    %51 = vector.broadcast %cst_22 : f32 to vector<8x1024xf32>
    %52 = arith.minimumf %51, %50 : vector<8x1024xf32>
    %cst_23 = arith.constant 2.989000e-01 : f32
    %53 = vector.broadcast %cst_23 : f32 to vector<8x1024xf32>
    %54 = arith.mulf %53, %32 : vector<8x1024xf32>
    %cst_24 = arith.constant 5.870000e-01 : f32
    %55 = vector.broadcast %cst_24 : f32 to vector<8x1024xf32>
    %56 = arith.mulf %55, %42 : vector<8x1024xf32>
    %57 = arith.addf %54, %56 : vector<8x1024xf32>
    %cst_25 = arith.constant 1.140000e-01 : f32
    %58 = vector.broadcast %cst_25 : f32 to vector<8x1024xf32>
    %59 = arith.mulf %58, %52 : vector<8x1024xf32>
    %60 = arith.addf %57, %59 : vector<8x1024xf32>
    %cst_26 = arith.constant 1.500000e+00 : f32
    %61 = vector.broadcast %cst_26 : f32 to vector<8x1024xf32>
    %62 = arith.mulf %61, %32 : vector<8x1024xf32>
    %cst_27 = arith.constant -5.000000e-01 : f32
    %63 = vector.broadcast %cst_27 : f32 to vector<8x1024xf32>
    %64 = arith.mulf %63, %60 : vector<8x1024xf32>
    %65 = arith.addf %62, %64 : vector<8x1024xf32>
    %cst_28 = arith.constant 0.000000e+00 : f32
    %cst_29 = arith.constant 1.000000e+00 : f32
    %66 = vector.broadcast %cst_28 : f32 to vector<8x1024xf32>
    %67 = arith.maximumf %66, %65 : vector<8x1024xf32>
    %68 = vector.broadcast %cst_29 : f32 to vector<8x1024xf32>
    %69 = arith.minimumf %68, %67 : vector<8x1024xf32>
    %cst_30 = arith.constant 1.500000e+00 : f32
    %70 = vector.broadcast %cst_30 : f32 to vector<8x1024xf32>
    %71 = arith.mulf %70, %42 : vector<8x1024xf32>
    %cst_31 = arith.constant -5.000000e-01 : f32
    %72 = vector.broadcast %cst_31 : f32 to vector<8x1024xf32>
    %73 = arith.mulf %72, %60 : vector<8x1024xf32>
    %74 = arith.addf %71, %73 : vector<8x1024xf32>
    %cst_32 = arith.constant 0.000000e+00 : f32
    %cst_33 = arith.constant 1.000000e+00 : f32
    %75 = vector.broadcast %cst_32 : f32 to vector<8x1024xf32>
    %76 = arith.maximumf %75, %74 : vector<8x1024xf32>
    %77 = vector.broadcast %cst_33 : f32 to vector<8x1024xf32>
    %78 = arith.minimumf %77, %76 : vector<8x1024xf32>
    %cst_34 = arith.constant 1.500000e+00 : f32
    %79 = vector.broadcast %cst_34 : f32 to vector<8x1024xf32>
    %80 = arith.mulf %79, %52 : vector<8x1024xf32>
    %cst_35 = arith.constant -5.000000e-01 : f32
    %81 = vector.broadcast %cst_35 : f32 to vector<8x1024xf32>
    %82 = arith.mulf %81, %60 : vector<8x1024xf32>
    %83 = arith.addf %80, %82 : vector<8x1024xf32>
    %cst_36 = arith.constant 0.000000e+00 : f32
    %cst_37 = arith.constant 1.000000e+00 : f32
    %84 = vector.broadcast %cst_36 : f32 to vector<8x1024xf32>
    %85 = arith.maximumf %84, %83 : vector<8x1024xf32>
    %86 = vector.broadcast %cst_37 : f32 to vector<8x1024xf32>
    %87 = arith.minimumf %86, %85 : vector<8x1024xf32>
    %88 = arith.maximumf %69, %78 : vector<8x1024xf32>
    %89 = arith.maximumf %88, %87 : vector<8x1024xf32>
    %90 = arith.minimumf %69, %78 : vector<8x1024xf32>
    %91 = arith.minimumf %90, %87 : vector<8x1024xf32>
    %92 = arith.subf %89, %91 : vector<8x1024xf32>
    %cst_38 = arith.constant 0.000000e+00 : f32
    %93 = vector.broadcast %cst_38 : f32 to vector<8x1024xf32>
    %94 = arith.cmpf ogt, %89, %93 : vector<8x1024xf32>
    %cst_39 = arith.constant 1.000000e+00 : f32
    %95 = vector.broadcast %cst_39 : f32 to vector<8x1024xf32>
    %96 = arith.select %94, %89, %95 : vector<8x1024xi1>, vector<8x1024xf32>
    %97 = tpu.reciprocal %96 {approx = true} : vector<8x1024xf32> -> vector<8x1024xf32>
    %cst_40 = arith.constant 0.000000e+00 : f32
    %98 = vector.broadcast %cst_40 : f32 to vector<8x1024xf32>
    %99 = arith.cmpf ogt, %89, %98 : vector<8x1024xf32>
    %100 = arith.mulf %92, %97 : vector<8x1024xf32>
    %cst_41 = arith.constant 0.000000e+00 : f32
    %101 = vector.broadcast %cst_41 : f32 to vector<8x1024xf32>
    %102 = arith.select %99, %100, %101 : vector<8x1024xi1>, vector<8x1024xf32>
    %cst_42 = arith.constant 0.000000e+00 : f32
    %103 = vector.broadcast %cst_42 : f32 to vector<8x1024xf32>
    %104 = arith.cmpf ogt, %92, %103 : vector<8x1024xf32>
    %cst_43 = arith.constant 1.000000e+00 : f32
    %105 = vector.broadcast %cst_43 : f32 to vector<8x1024xf32>
    %106 = arith.select %104, %92, %105 : vector<8x1024xi1>, vector<8x1024xf32>
    %107 = tpu.reciprocal %106 {approx = true} : vector<8x1024xf32> -> vector<8x1024xf32>
    %108 = arith.subf %89, %69 : vector<8x1024xf32>
    %109 = arith.mulf %108, %107 : vector<8x1024xf32>
    %110 = arith.subf %89, %78 : vector<8x1024xf32>
    %111 = arith.mulf %110, %107 : vector<8x1024xf32>
    %112 = arith.subf %89, %87 : vector<8x1024xf32>
    %113 = arith.mulf %112, %107 : vector<8x1024xf32>
    %114 = arith.cmpf oeq, %89, %69 : vector<8x1024xf32>
    %115 = arith.subf %113, %111 : vector<8x1024xf32>
    %116 = arith.cmpf oeq, %89, %78 : vector<8x1024xf32>
    %cst_44 = arith.constant 2.000000e+00 : f32
    %117 = vector.broadcast %cst_44 : f32 to vector<8x1024xf32>
    %118 = arith.addf %117, %109 : vector<8x1024xf32>
    %119 = arith.subf %118, %113 : vector<8x1024xf32>
    %cst_45 = arith.constant 4.000000e+00 : f32
    %120 = vector.broadcast %cst_45 : f32 to vector<8x1024xf32>
    %121 = arith.addf %120, %111 : vector<8x1024xf32>
    %122 = arith.subf %121, %109 : vector<8x1024xf32>
    %123 = arith.select %116, %119, %122 : vector<8x1024xi1>, vector<8x1024xf32>
    %124 = arith.select %114, %115, %123 : vector<8x1024xi1>, vector<8x1024xf32>
    %cst_46 = arith.constant 0.000000e+00 : f32
    %125 = vector.broadcast %cst_46 : f32 to vector<8x1024xf32>
    %126 = arith.cmpf ogt, %92, %125 : vector<8x1024xf32>
    %cst_47 = arith.constant 0.000000e+00 : f32
    %127 = vector.broadcast %cst_47 : f32 to vector<8x1024xf32>
    %128 = arith.select %126, %124, %127 : vector<8x1024xi1>, vector<8x1024xf32>
    %cst_48 = arith.constant 6.000000e+00 : f32
    %129 = vector.broadcast %cst_48 : f32 to vector<8x1024xf32>
    %130 = arith.divf %128, %129 : vector<8x1024xf32>
    %cst_49 = arith.constant 1.000000e+00 : f32
    %131 = vector.broadcast %cst_49 : f32 to vector<8x1024xf32>
    %132 = arith.remf %130, %131 : vector<8x1024xf32>
    %cst_50 = arith.constant 0.000000e+00 : f32
    %133 = vector.broadcast %cst_50 : f32 to vector<8x1024xf32>
    %134 = arith.cmpf one, %132, %133 : vector<8x1024xf32>
    %cst_51 = arith.constant 0.000000e+00 : f32
    %135 = vector.broadcast %cst_51 : f32 to vector<8x1024xf32>
    %136 = arith.cmpf olt, %132, %135 : vector<8x1024xf32>
    %cst_52 = arith.constant 0.000000e+00 : f32
    %137 = arith.cmpf olt, %cst_49, %cst_52 : f32
    %138 = vector.broadcast %137 : i1 to vector<8x1024xi1>
    %139 = vector.broadcast %138 : vector<8x1024xi1> to vector<8x1024xi1>
    %140 = arith.xori %136, %139 : vector<8x1024xi1>
    %141 = arith.andi %140, %134 : vector<8x1024xi1>
    %142 = vector.broadcast %cst_49 : f32 to vector<8x1024xf32>
    %143 = arith.addf %132, %142 : vector<8x1024xf32>
    %144 = arith.select %141, %143, %132 : vector<8x1024xi1>, vector<8x1024xf32>
    %cst_53 = arith.constant 1.000000e-01 : f32
    %145 = vector.broadcast %cst_53 : f32 to vector<8x1024xf32>
    %146 = arith.addf %144, %145 : vector<8x1024xf32>
    %cst_54 = arith.constant 1.000000e+00 : f32
    %147 = vector.broadcast %cst_54 : f32 to vector<8x1024xf32>
    %148 = arith.remf %146, %147 : vector<8x1024xf32>
    %cst_55 = arith.constant 0.000000e+00 : f32
    %149 = vector.broadcast %cst_55 : f32 to vector<8x1024xf32>
    %150 = arith.cmpf one, %148, %149 : vector<8x1024xf32>
    %cst_56 = arith.constant 0.000000e+00 : f32
    %151 = vector.broadcast %cst_56 : f32 to vector<8x1024xf32>
    %152 = arith.cmpf olt, %148, %151 : vector<8x1024xf32>
    %cst_57 = arith.constant 0.000000e+00 : f32
    %153 = arith.cmpf olt, %cst_54, %cst_57 : f32
    %154 = vector.broadcast %153 : i1 to vector<8x1024xi1>
    %155 = vector.broadcast %154 : vector<8x1024xi1> to vector<8x1024xi1>
    %156 = arith.xori %152, %155 : vector<8x1024xi1>
    %157 = arith.andi %156, %150 : vector<8x1024xi1>
    %158 = vector.broadcast %cst_54 : f32 to vector<8x1024xf32>
    %159 = arith.addf %148, %158 : vector<8x1024xf32>
    %160 = arith.select %157, %159, %148 : vector<8x1024xi1>, vector<8x1024xf32>
    %cst_58 = arith.constant 6.000000e+00 : f32
    %161 = vector.broadcast %cst_58 : f32 to vector<8x1024xf32>
    %162 = arith.mulf %160, %161 : vector<8x1024xf32>
    %163 = math.floor %162 : vector<8x1024xf32>
    %cst_59 = arith.constant 6.000000e+00 : f32
    %164 = vector.broadcast %cst_59 : f32 to vector<8x1024xf32>
    %165 = arith.mulf %160, %164 : vector<8x1024xf32>
    %166 = arith.subf %165, %163 : vector<8x1024xf32>
    %cst_60 = arith.constant 1.000000e+00 : f32
    %167 = vector.broadcast %cst_60 : f32 to vector<8x1024xf32>
    %168 = arith.subf %167, %102 : vector<8x1024xf32>
    %169 = arith.mulf %89, %168 : vector<8x1024xf32>
    %170 = arith.mulf %166, %102 : vector<8x1024xf32>
    %cst_61 = arith.constant 1.000000e+00 : f32
    %171 = vector.broadcast %cst_61 : f32 to vector<8x1024xf32>
    %172 = arith.subf %171, %170 : vector<8x1024xf32>
    %173 = arith.mulf %89, %172 : vector<8x1024xf32>
    %cst_62 = arith.constant 1.000000e+00 : f32
    %174 = vector.broadcast %cst_62 : f32 to vector<8x1024xf32>
    %175 = arith.subf %174, %166 : vector<8x1024xf32>
    %176 = arith.mulf %175, %102 : vector<8x1024xf32>
    %cst_63 = arith.constant 1.000000e+00 : f32
    %177 = vector.broadcast %cst_63 : f32 to vector<8x1024xf32>
    %178 = arith.subf %177, %176 : vector<8x1024xf32>
    %179 = arith.mulf %89, %178 : vector<8x1024xf32>
    %180 = arith.fptosi %163 : vector<8x1024xf32> to vector<8x1024xi32>
    %c6_i32 = arith.constant 6 : i32
    %c0_i32 = arith.constant 0 : i32
    %181 = arith.cmpi eq, %c6_i32, %c0_i32 : i32
    %c1_i32 = arith.constant 1 : i32
    %182 = arith.select %181, %c1_i32, %c6_i32 : i32
    %183 = vector.broadcast %182 : i32 to vector<8x1024xi32>
    %184 = arith.remsi %180, %183 : vector<8x1024xi32>
    %c0_i32_64 = arith.constant 0 : i32
    %185 = vector.broadcast %c0_i32_64 : i32 to vector<8x1024xi32>
    %186 = arith.cmpi ne, %184, %185 : vector<8x1024xi32>
    %c0_i32_65 = arith.constant 0 : i32
    %187 = vector.broadcast %c0_i32_65 : i32 to vector<8x1024xi32>
    %188 = arith.cmpi slt, %184, %187 : vector<8x1024xi32>
    %c0_i32_66 = arith.constant 0 : i32
    %189 = arith.cmpi slt, %182, %c0_i32_66 : i32
    %190 = vector.broadcast %189 : i1 to vector<8x1024xi1>
    %191 = vector.broadcast %190 : vector<8x1024xi1> to vector<8x1024xi1>
    %192 = arith.xori %188, %191 : vector<8x1024xi1>
    %193 = arith.andi %192, %186 : vector<8x1024xi1>
    %194 = vector.broadcast %182 : i32 to vector<8x1024xi32>
    %195 = arith.addi %184, %194 : vector<8x1024xi32>
    %196 = arith.select %193, %195, %184 : vector<8x1024xi1>, vector<8x1024xi32>
    %c0_i32_67 = arith.constant 0 : i32
    %197 = vector.broadcast %c0_i32_67 : i32 to vector<8x1024xi32>
    %198 = arith.cmpi eq, %196, %197 : vector<8x1024xi32>
    %c1_i32_68 = arith.constant 1 : i32
    %199 = vector.broadcast %c1_i32_68 : i32 to vector<8x1024xi32>
    %200 = arith.cmpi eq, %196, %199 : vector<8x1024xi32>
    %c2_i32 = arith.constant 2 : i32
    %201 = vector.broadcast %c2_i32 : i32 to vector<8x1024xi32>
    %202 = arith.cmpi eq, %196, %201 : vector<8x1024xi32>
    %c3_i32 = arith.constant 3 : i32
    %203 = vector.broadcast %c3_i32 : i32 to vector<8x1024xi32>
    %204 = arith.cmpi eq, %196, %203 : vector<8x1024xi32>
    %c4_i32 = arith.constant 4 : i32
    %205 = vector.broadcast %c4_i32 : i32 to vector<8x1024xi32>
    %206 = arith.cmpi eq, %196, %205 : vector<8x1024xi32>
    %207 = arith.select %206, %179, %89 : vector<8x1024xi1>, vector<8x1024xf32>
    %208 = arith.select %204, %169, %207 : vector<8x1024xi1>, vector<8x1024xf32>
    %209 = arith.select %202, %169, %208 : vector<8x1024xi1>, vector<8x1024xf32>
    %210 = arith.select %200, %173, %209 : vector<8x1024xi1>, vector<8x1024xf32>
    %211 = arith.select %198, %89, %210 : vector<8x1024xi1>, vector<8x1024xf32>
    %c0_i32_69 = arith.constant 0 : i32
    %212 = vector.broadcast %c0_i32_69 : i32 to vector<8x1024xi32>
    %213 = arith.cmpi eq, %196, %212 : vector<8x1024xi32>
    %c1_i32_70 = arith.constant 1 : i32
    %214 = vector.broadcast %c1_i32_70 : i32 to vector<8x1024xi32>
    %215 = arith.cmpi eq, %196, %214 : vector<8x1024xi32>
    %c2_i32_71 = arith.constant 2 : i32
    %216 = vector.broadcast %c2_i32_71 : i32 to vector<8x1024xi32>
    %217 = arith.cmpi eq, %196, %216 : vector<8x1024xi32>
    %c3_i32_72 = arith.constant 3 : i32
    %218 = vector.broadcast %c3_i32_72 : i32 to vector<8x1024xi32>
    %219 = arith.cmpi eq, %196, %218 : vector<8x1024xi32>
    %220 = arith.select %219, %173, %169 : vector<8x1024xi1>, vector<8x1024xf32>
    %221 = arith.select %217, %89, %220 : vector<8x1024xi1>, vector<8x1024xf32>
    %222 = arith.select %215, %89, %221 : vector<8x1024xi1>, vector<8x1024xf32>
    %223 = arith.select %213, %179, %222 : vector<8x1024xi1>, vector<8x1024xf32>
    %c0_i32_73 = arith.constant 0 : i32
    %224 = vector.broadcast %c0_i32_73 : i32 to vector<8x1024xi32>
    %225 = arith.cmpi eq, %196, %224 : vector<8x1024xi32>
    %c1_i32_74 = arith.constant 1 : i32
    %226 = vector.broadcast %c1_i32_74 : i32 to vector<8x1024xi32>
    %227 = arith.cmpi eq, %196, %226 : vector<8x1024xi32>
    %c2_i32_75 = arith.constant 2 : i32
    %228 = vector.broadcast %c2_i32_75 : i32 to vector<8x1024xi32>
    %229 = arith.cmpi eq, %196, %228 : vector<8x1024xi32>
    %c3_i32_76 = arith.constant 3 : i32
    %230 = vector.broadcast %c3_i32_76 : i32 to vector<8x1024xi32>
    %231 = arith.cmpi eq, %196, %230 : vector<8x1024xi32>
    %c4_i32_77 = arith.constant 4 : i32
    %232 = vector.broadcast %c4_i32_77 : i32 to vector<8x1024xi32>
    %233 = arith.cmpi eq, %196, %232 : vector<8x1024xi32>
    %234 = arith.select %233, %89, %173 : vector<8x1024xi1>, vector<8x1024xf32>
    %235 = arith.select %231, %89, %234 : vector<8x1024xi1>, vector<8x1024xf32>
    %236 = arith.select %229, %179, %235 : vector<8x1024xi1>, vector<8x1024xf32>
    %237 = arith.select %227, %169, %236 : vector<8x1024xi1>, vector<8x1024xf32>
    %238 = arith.select %225, %169, %237 : vector<8x1024xi1>, vector<8x1024xf32>
    %c0_78 = arith.constant 0 : index
    %c0_79 = arith.constant 0 : index
    %c0_80 = arith.constant 0 : index
    %239 = vector.load %arg3[%c0_78, %c0_79, %c0_80] : memref<1x24x1024xf32, #tpu.memory_space<vmem>>, vector<1x8x1024xf32>
    %240 = vector.shape_cast %239 : vector<1x8x1024xf32> to vector<8x1024xf32>
    %241 = vector.shape_cast %211 : vector<8x1024xf32> to vector<1x8x1024xf32>
    tpu.vector_store %arg3[%c0_78, %c0_79, %c0_80], %241 {strides = array<i32>} : memref<1x24x1024xf32, #tpu.memory_space<vmem>>, vector<1x8x1024xf32>,
    %c0_81 = arith.constant 0 : index
    %c8 = arith.constant 8 : index
    %c0_82 = arith.constant 0 : index
    %242 = vector.load %arg3[%c0_81, %c8, %c0_82] : memref<1x24x1024xf32, #tpu.memory_space<vmem>>, vector<1x8x1024xf32>
    %243 = vector.shape_cast %242 : vector<1x8x1024xf32> to vector<8x1024xf32>
    %244 = vector.shape_cast %223 : vector<8x1024xf32> to vector<1x8x1024xf32>
    tpu.vector_store %arg3[%c0_81, %c8, %c0_82], %244 {strides = array<i32>} : memref<1x24x1024xf32, #tpu.memory_space<vmem>>, vector<1x8x1024xf32>,
    %c0_83 = arith.constant 0 : index
    %c16 = arith.constant 16 : index
    %c0_84 = arith.constant 0 : index
    %245 = vector.load %arg3[%c0_83, %c16, %c0_84] : memref<1x24x1024xf32, #tpu.memory_space<vmem>>, vector<1x8x1024xf32>
    %246 = vector.shape_cast %245 : vector<1x8x1024xf32> to vector<8x1024xf32>
    %247 = vector.shape_cast %238 : vector<8x1024xf32> to vector<1x8x1024xf32>
    tpu.vector_store %arg3[%c0_83, %c16, %c0_84], %247 {strides = array<i32>} : memref<1x24x1024xf32, #tpu.memory_space<vmem>>, vector<1x8x1024xf32>,
    return
  }
  func.func @transform_0(%arg0: i32) -> (i32, i32, i32) {
    %c0_i32 = arith.constant 0 : i32
    %c0_i32_0 = arith.constant 0 : i32
    %c0_i32_1 = arith.constant 0 : i32
    return %arg0, %c0_i32, %c0_i32_0 : i32, i32, i32
  }
  func.func @transform_1(%arg0: i32) -> (i32, i32) {
    %c0_i32 = arith.constant 0 : i32
    %c0_i32_0 = arith.constant 0 : i32
    %c0_i32_1 = arith.constant 0 : i32
    return %c0_i32, %c0_i32_0 : i32, i32
  }
  func.func @transform_2(%arg0: i32) -> (i32, i32, i32) {
    %c0_i32 = arith.constant 0 : i32
    %c0_i32_0 = arith.constant 0 : i32
    %c0_i32_1 = arith.constant 0 : i32
    return %arg0, %c0_i32, %c0_i32_0 : i32, i32, i32
  }
}

</mosaic_0001>

<bundles_post_ra>
// kernel: tpu_custom_call.1
= control target key start
LH: loop header
LB: loop body
LE: loop exit
PB: predicated region body
PF: predicated region fallthrough
CT: control target
= control target key end

     0   :  { %7 = vsyncpa [#allocation3], 0  ;;  %s4800_s0 = inlined_call_operand.hbm [shape: bf16[2,24,256], index: 0, kind: input, shape index: {}]   ;;  %s4801_s1 = inlined_call_operand.hbm [shape: bf16[256,1024], index: 1, kind: input, shape index: {}]   ;;  %s4802_s2 = inlined_call_operand.hbm [shape: f32[2,24,1024], index: 2, kind: output, shape index: {}]  }
   0x1   :  { %9 = vsyncpa [#allocation3 + $0x1], 0 }
   0x2   :  { %10 = vsyncpa [#allocation6], 0 }
   0x3   :  { %11 = vsyncpa [#allocation4], 0 }
   0x4   :  { %13 = vsyncpa [#allocation4 + $0x1], 0  ;;  %s2944_s9 = smov 0   ;;  %s2946_s10 = smov 0  }
   0x5   :  { %s2948_s11 = smov 0   ;;  %s2950_s12 = smov 0  }
   0x6 LB: > { %s2965_s13 = sadd.s32 4294967295, %s2918_s12   ;;  %s2503_s14 = sadd.s32 4294967294, %s2918_s12   ;;  %s2918_s12 = sphi %s2950_s12, %s5081_s12   ;;  %s2914_s11 = sphi %s2948_s11, %s5080_s11   ;;  %s2910_s10 = sphi %s2946_s10, %s5079_s10   ;;  %s2906_s9 = sphi %s2944_s9, %s5078_s9  }
   0x7   : > { %p39_p0 = scmp.ne.s32.totalorder %s2910_s10, %s2906_s9  ;;  %p4803_p1 = scmp.eq.s32.totalorder %s2965_s13, 0 }
   0x8   : > { %p90_p3 = scmp.eq.s32.totalorder %s2503_s14, 1  ;;  %p2504_p5 = scmp.ge.s32.totalorder %s2918_s12, 1 }
   0x9   : > { %p2974_p4 = por %p4803_p1, %p39_p0  ;;  %p97_p7 = scmp.lt.s32.totalorder %s2918_s12, 3 }
   0xa   : > { %p2979_p6 = por %p90_p3, %p39_p0  ;;  %s2920_s18 = smov [#allocation5]  }
   0xb   : > { %s4863_s15 = scalar_select %p2974_p4, 1, 0 }
   0xc   : > { %s4864_s16 = scalar_select %p2979_p6, 1, 0 }
   0xd   : > { %p2984_p8 = pnand %p2504_p5, %p97_p7  ;;  %s109_s19 = sshll.u32 %s2920_s18, 4  ;;  %s2988_s19 = int_to_ptr.vmem [resolvable:$true] %s109_s19 }
   0xe   : > { %s3000_s21 = sadd.s32 1, %s2918_s12   ;;  %s26_s22 = sadd.s32 1, %s2914_s11 }
   0xf   : > { %s4865_s17 = scalar_select %p2984_p8, 1, 0 }
  0x10   : > { %p2698_p9 = pneg %p2984_p8  ;;  %s23_s23 = ssub.s32 %s2918_s12, %s3000_s21 }
  0x11   : > { %s2790_s26 = scalar_lea.hbm %s4801_s1, 16384 }
  0x12   : > { %p2995_p11 = pnand %p2698_p9, %p4803_p1  ;;  %p2791_p12 = scmp.ne.s32.totalorder %s4801_s1, %s2790_s26 }
  0x13   : > { %p2797_p5 = scmp.lt.u32.totalorder %s2790_s26, %s4801_s1 }
  0x14   : > { %p2792_p13 = pneg %p2995_p11 }
  0x16   : > { %p2793_p0 = pnand %p2792_p13, %p2791_p12 }
  0x18   : > { %p2794_p3 = pneg %p2793_p0 }
  0x1a   : > { %p2799_p7 = pnand %p2797_p5, %p2794_p3 }
  0x1c   : > { %2802 = shalt.err (!%p2799_p7)
}
  0x1d   : > { %s2803_s3 = scalar_lea.vmem %s2988_s19, 16384  ;;  %p2811_p2 = scmp.lt.s32.totalorder %s2988_s19, %s2988_s19 }
  0x1e   : > { %p2804_p9 = scmp.ne.s32.totalorder %s2988_s19, %s2803_s3  ;;  %p2812_p6 = scmp.lt.s32.totalorder %s2803_s3, %s2803_s3 }
  0x20   : > { %p2806_p10 = pnand %p2804_p9, %p2792_p13  ;;  %p2813_p4 = por %p2812_p6, %p2811_p2 }
  0x22   : > { %p2807_p1 = pneg %p2806_p10 }
  0x24   : > { %p2814_p8 = pnand %p2813_p4, %p2807_p1 }
  0x26   : > { %2817 = shalt.err (!%p2814_p8)
}
  0x27   : > { %s2921_s4 = smov 512   ;;  %s2922_s5 = smov 32  }
  0x28   : > { %2701 = dma.hbm_to_vmem [thread:$0]  (!%p2995_p11), %s4801_s1, 16384, %s2988_s19, [#allocation6], %s2921_s4, %s2921_s4, %s2922_s5  }
  0x29   : > { %p24_p2 = scmp.eq.s32.totalorder %s23_s23, 0  ;;  %p33_p1 = scmp.ne.s32.totalorder %s2914_s11, %s2910_s10 }
  0x2a   : > { %p34_p4 = scmp.eq.s32.totalorder %s2918_s12, 0  ;;  %p2711_p6 = scmp.lt.s32.totalorder %s2918_s12, 2 }
  0x2b   : > { %s3031_s8 = scalar_select %p24_p2, %s2914_s11, %s26_s22  }
  0x2c   : > { %p35_p8 = por %p34_p4, %p33_p1  ;;  %p4867_p10 = scmp.eq.s32.totalorder %s2965_s13, 1 }
  0x2d   : > { %s123_s18 = sand.u32 1, %s2914_s11   ;;  %s2654_s24 = smul.u32 384, %s2918_s12 }
  0x2e   : > { %p3035_p12 = por %p4867_p10, %p33_p1  ;;  %s2653_s25 = smul.u32 24, %s123_s18 }
  0x2f   : > { %s3044_s27 = scalar_lea.hbm %s4800_s0, %s2654_s24  ;;  %p3046_p11 = pnand %p2711_p6, %p35_p8 }
  0x30   : > { %s127_s22 = scalar_lea.vmem [#allocation2], %s2653_s25  ;;  %s3052_s28 = scalar_lea.sflag [#allocation3], %s123_s18 }
  0x31   : > { %s134_s23 = sshll.u32 %s127_s22, 4  ;;  %s2818_s29 = scalar_lea.hbm %s3044_s27, 384  ;;  %s3050_s23 = int_to_ptr.vmem [resolvable:$true] %s134_s23 }
  0x32   : > { %p2819_p13 = scmp.ne.s32.totalorder %s3044_s27, %s2818_s29  ;;  %p2820_p0 = pneg %p3046_p11 }
  0x33   : > { %s2823_s4 = scalar_lea.hbm %s4800_s0, 768  ;;  %p2824_p7 = scmp.lt.u32.totalorder %s3044_s27, %s4800_s0 }
  0x34   : > { %p2821_p3 = pnand %p2820_p0, %p2819_p13  ;;  %p2825_p9 = scmp.lt.u32.totalorder %s2823_s4, %s2818_s29 }
  0x35   : > { %p2827_p1 = scmp.lt.u32.totalorder %s2818_s29, %s3044_s27 }
  0x36   : > { %p2822_p5 = pneg %p2821_p3  ;;  %p2826_p2 = por %p2825_p9, %p2824_p7 }
  0x38   : > { %p2828_p4 = por %p2827_p1, %p2826_p2 }
  0x3a   : > { %p2829_p6 = pnand %p2828_p4, %p2822_p5 }
  0x3c   : > { %2832 = shalt.err (!%p2829_p6)
}
  0x3d   : > { %s2833_s7 = scalar_lea.vmem %s3050_s23, 384  ;;  %s2923_s18 = smov [#allocation2]  }
  0x3e   : > { %p2834_p8 = scmp.ne.s32.totalorder %s3050_s23, %s2833_s7  ;;  %s2838_s24 = sshll.u32 %s2923_s18, 4  ;;  %s2839_s24 = int_to_ptr.vmem [resolvable:$false] %s2838_s24 }
  0x3f   : > { %s2840_s25 = scalar_lea.vmem %s2839_s24, 768  ;;  %p2841_p3 = scmp.lt.s32.totalorder %s3050_s23, %s2839_s24 }
  0x40   : > { %p2836_p10 = pnand %p2834_p8, %p2820_p0  ;;  %p2842_p7 = scmp.lt.s32.totalorder %s2840_s25, %s2833_s7 }
  0x42   : > { %p2837_p13 = pneg %p2836_p10  ;;  %p2843_p9 = por %p2842_p7, %p2841_p3 }
  0x44   : > { %p2844_p2 = pnand %p2843_p9, %p2837_p13 }
  0x46   : > { %2847 = shalt.err (!%p2844_p2)
}
  0x47   : > { %s2924_s20 = smov 128   ;;  %s2925_s26 = smov 8  }
  0x48   : > { %2705 = dma.hbm_to_vmem [thread:$0]  (!%p3046_p11), %s3044_s27, 384, %s3050_s23, %s3052_s28, %s2924_s20, %s2924_s20, %s2925_s26  }
  0x49   : > { %p4870_p0 = scmp.ne.s32.totalorder %s4865_s17, 0 }
  0x4b   : > { %146 = sbr.rel (%p4870_p0) target bundleno = 899 (0x383), region = 28 }
  0x52   : > { %s3083_s22 = sand.u32 1, %s2910_s10   ;;  %p4871_p5 = scmp.ne.s32.totalorder %s4863_s15, 0 }
  0x53   : > { %s2655_s29 = smul.u32 24, %s3083_s22  ;;  %s149_s30 = scalar_lea.sflag [#allocation3], %s3083_s22 }
  0x55   : > { %s3087_s3 = scalar_lea.vmem [#allocation2], %s2655_s29 }
  0x56   : > { %2893 = dma.done.wait (%p4871_p5), %s149_s30, 384  }
  0x57   : > { %2895 = vsyncadd (%p4871_p5), %s149_s30, 4294966912  ;;  %p4872_p11 = scmp.eq.s32.totalorder %s2965_s13, 0 }
  0x59   : > { %2897 = dma.done.wait (%p4872_p11), [#allocation6], 16384   ;;  %p4873_p1 = pmov %p4872_p11 }
  0x5a   : > { %v180_v0 = vld [vmem:[#allocation5] sm:$0xff]  ;;  %v181_v2 = vld [vmem:[#allocation5 + $0x8] sm:$0xff]  ;;  %s2656_s15 = smul.u32 192, %s3083_s22  ;;  %s2407_s4 = scalar_lea.sflag [#allocation4], %s3083_s22 }
  0x5b   : > { %2899 = vsyncadd (%p4873_p1), [#allocation6], 4294950912  ;;  %v184_v1 = vld [vmem:[#allocation5 + $0x20] sm:$0xff]  ;;  %v185_v4 = vld [vmem:[#allocation5 + $0x28] sm:$0xff]  ;;  %s2689_s27 = smul.u32 3072, %s2965_s13  ;;  %s2926_s6 = smov [#allocation7]  }
  0x5c   : > { %v2515_v3 = vcombine.high %v180_v0, %v184_v1  ;;  %v2514_v5 = vcombine.low %v180_v0, %v184_v1  ;;  %v188_v6 = vld [vmem:[#allocation5 + $0x40] sm:$0xff]  ;;  %v2517_v8 = vcombine.high %v181_v2, %v185_v4  ;;  %v2516_v9 = vcombine.low %v181_v2, %v185_v4  ;;  %v189_v11 = vld [vmem:[#allocation5 + $0x48] sm:$0xff]  ;;  %s4488_s17 = scalar_lea.vmem [#allocation7], %s2656_s15  ;;  %s2852_s7 = sshll.u32 %s2926_s6, 4  ;;  %s2853_s7 = int_to_ptr.vmem [resolvable:$false] %s2852_s7 }
  0x5d   : > { %v192_v7 = vld [vmem:[#allocation5 + $0x60] sm:$0xff]  ;;  %v193_v12 = vld [vmem:[#allocation5 + $0x68] sm:$0xff]  ;;  %s2420_s19 = sshll.u32 %s4488_s17, 4  ;;  %s4731_s28 = scalar_lea.hbm %s4802_s2, %s2689_s27  ;;  %s4733_s19 = int_to_ptr.vmem [resolvable:$true] %s2420_s19 }
  0x5e   : > { %v2523_v10 = vcombine.high %v188_v6, %v192_v7  ;;  %v196_v13 = vld [vmem:[#allocation5 + $0x80] sm:$0xff]  ;;  %965 = vmatprep.subr.bf16.mxu0 %v2515_v3  ;;  %v2525_v14 = vcombine.high %v189_v11, %v193_v12  ;;  %v197_v16 = vld [vmem:[#allocation5 + $0x88] sm:$0xff]  ;;  %1016 = vmatprep.subr.bf16.mxu1 %v2517_v8  ;;  %v2522_v18 = vcombine.low %v188_v6, %v192_v7  ;;  %s2848_s5 = scalar_lea.vmem %s4733_s19, 3072  ;;  %s2854_s18 = scalar_lea.vmem %s2853_s7, 6144 }
  0x5f   : > { %v200_v15 = vld [vmem:[#allocation5 + $0xa0] sm:$0xff]  ;;  %v201_v17 = vld [vmem:[#allocation5 + $0xa8] sm:$0xff]  ;;  %966 = vmatpush1.bf16.msra.mxu0 %v2514_v5  ;;  %1017 = vmatpush1.bf16.msra.mxu1 %v2516_v9  ;;  %v2524_v19 = vcombine.low %v189_v11, %v193_v12  ;;  %p2849_p4 = scmp.ne.s32.totalorder %s4733_s19, %s2848_s5  ;;  %p2855_p10 = scmp.lt.s32.totalorder %s4733_s19, %s2853_s7 }
  0x60   : > { %967 = vmatprep.subr.bf16.mxu0 %v2523_v10  ;;  %v2531_v20 = vcombine.high %v196_v13, %v200_v15  ;;  %1018 = vmatprep.subr.bf16.mxu1 %v2525_v14  ;;  %v2533_v21 = vcombine.high %v197_v16, %v201_v17  ;;  %v204_v22 = vld [vmem:[#allocation5 + $0xc0] sm:$0xff]  ;;  %v205_v24 = vld [vmem:[#allocation5 + $0xc8] sm:$0xff]  ;;  %v2530_v26 = vcombine.low %v196_v13, %v200_v15  ;;  %p2856_p13 = scmp.lt.s32.totalorder %s2854_s18, %s2848_s5 }
  0x61   : > { %v208_v23 = vld [vmem:[#allocation5 + $0xe0] sm:$0xff]  ;;  %v209_v25 = vld [vmem:[#allocation5 + $0xe8] sm:$0xff]  ;;  %v2532_v27 = vcombine.low %v197_v16, %v201_v17  ;;  %p2850_p6 = pnand %p2849_p4, %p3035_p12 }
  0x62   : > { %v2539_v28 = vcombine.high %v204_v22, %v208_v23  ;;  %v2541_v29 = vcombine.high %v205_v24, %v209_v25  ;;  %v212_v30 = vld [vmem:[#allocation5 + $0x100] sm:$0xff]  ;;  %v213_v32 = vld [vmem:[#allocation5 + $0x108] sm:$0xff]  ;;  %v2538_v34 = vcombine.low %v204_v22, %v208_v23  ;;  %v2540_v35 = vcombine.low %v205_v24, %v209_v25  ;;  %p2857_p3 = por %p2856_p13, %p2855_p10 }
  0x63   : > { %968 = vmatpush1.bf16.msra.mxu0 %v2522_v18  ;;  %1019 = vmatpush1.bf16.msra.mxu1 %v2524_v19  ;;  %v216_v31 = vld [vmem:[#allocation5 + $0x120] sm:$0xff]  ;;  %v217_v33 = vld [vmem:[#allocation5 + $0x128] sm:$0xff]  ;;  %p2851_p8 = pneg %p2850_p6 }
  0x64   : > { %969 = vmatprep.subr.bf16.mxu0 %v2531_v20  ;;  %1020 = vmatprep.subr.bf16.mxu1 %v2533_v21  ;;  %v2547_v36 = vcombine.high %v212_v30, %v216_v31  ;;  %v2549_v37 = vcombine.high %v213_v32, %v217_v33  ;;  %v220_v38 = vld [vmem:[#allocation5 + $0x140] sm:$0xff]  ;;  %v221_v40 = vld [vmem:[#allocation5 + $0x148] sm:$0xff]  ;;  %v2546_v42 = vcombine.low %v212_v30, %v216_v31 }
  0x65   : > { %v224_v39 = vld [vmem:[#allocation5 + $0x160] sm:$0xff]  ;;  %v225_v41 = vld [vmem:[#allocation5 + $0x168] sm:$0xff]  ;;  %v2548_v43 = vcombine.low %v213_v32, %v217_v33  ;;  %p2858_p7 = pnand %p2857_p3, %p2851_p8 }
  0x66   : > { %v2555_v44 = vcombine.high %v220_v38, %v224_v39  ;;  %v2557_v45 = vcombine.high %v221_v40, %v225_v41  ;;  %v228_v46 = vld [vmem:[#allocation5 + $0x180] sm:$0xff]  ;;  %v229_v48 = vld [vmem:[#allocation5 + $0x188] sm:$0xff]  ;;  %v2554_v50 = vcombine.low %v220_v38, %v224_v39  ;;  %v2556_v51 = vcombine.low %v221_v40, %v225_v41 }
  0x67   : > { %970 = vmatpush1.bf16.msra.mxu0 %v2530_v26  ;;  %1021 = vmatpush1.bf16.msra.mxu1 %v2532_v27  ;;  %v232_v47 = vld [vmem:[#allocation5 + $0x1a0] sm:$0xff]  ;;  %v233_v49 = vld [vmem:[#allocation5 + $0x1a8] sm:$0xff] }
  0x68   : > { %971 = vmatprep.subr.bf16.mxu0 %v2539_v28  ;;  %1022 = vmatprep.subr.bf16.mxu1 %v2541_v29  ;;  %v2563_v52 = vcombine.high %v228_v46, %v232_v47  ;;  %v2565_v53 = vcombine.high %v229_v48, %v233_v49  ;;  %v236_v54 = vld [vmem:[#allocation5 + $0x1c0] sm:$0xff]  ;;  %v3098_v56 = vld [vmem:[%s3087_s3 + $0x4] ss:$8 sps:$4 sm:$0xff]   ;;  %v2562_v59 = vcombine.low %v228_v46, %v232_v47 }
  0x69   : > { %v240_v55 = vld [vmem:[#allocation5 + $0x1e0] sm:$0xff]  ;;  %v237_v57 = vld [vmem:[#allocation5 + $0x1c8] sm:$0xff]  ;;  %997 = vmatprep.mubr.bf16.mxu0 %v3098_v56  ;;  %v2564_v60 = vcombine.low %v229_v48, %v233_v49  ;;  %1048 = vmatprep.mubr.bf16.mxu1 %v3098_v56 }
  0x6a   : > { %v241_v58 = vld [vmem:[#allocation5 + $0x1e8] sm:$0xff]  ;;  %v2571_v61 = vcombine.high %v236_v54, %v240_v55  ;;  %v244_v63 = vld [vmem:[#allocation5 + $0x200] sm:$0xff]  ;;  %v2570_v3 = vcombine.low %v236_v54, %v240_v55 }
  0x6b   : > { %972 = vmatpush1.bf16.msra.mxu0 %v2538_v34  ;;  %1023 = vmatpush1.bf16.msra.mxu1 %v2540_v35  ;;  %v2573_v62 = vcombine.high %v237_v57, %v241_v58  ;;  %v248_v0 = vld [vmem:[#allocation5 + $0x220] sm:$0xff]  ;;  %v245_v1 = vld [vmem:[#allocation5 + $0x208] sm:$0xff]  ;;  %v2572_v4 = vcombine.low %v237_v57, %v241_v58 }
  0x6c   : > { %973 = vmatprep.subr.bf16.mxu0 %v2547_v36  ;;  %1024 = vmatprep.subr.bf16.mxu1 %v2549_v37  ;;  %v249_v2 = vld [vmem:[#allocation5 + $0x228] sm:$0xff]  ;;  %v2579_v5 = vcombine.high %v244_v63, %v248_v0  ;;  %v252_v7 = vld [vmem:[#allocation5 + $0x240] sm:$0xff]  ;;  %v2578_v11 = vcombine.low %v244_v63, %v248_v0  ;;  %v182_v0 = vld [vmem:[#allocation5 + $0x10] sm:$0xff] }
  0x6d   : > { %v2581_v6 = vcombine.high %v245_v1, %v249_v2  ;;  %v256_v8 = vld [vmem:[#allocation5 + $0x260] sm:$0xff]  ;;  %v253_v9 = vld [vmem:[#allocation5 + $0x248] sm:$0xff]  ;;  %v2580_v12 = vcombine.low %v245_v1, %v249_v2  ;;  %v186_v1 = vld [vmem:[#allocation5 + $0x30] sm:$0xff] }
  0x6e   : > { %v257_v10 = vld [vmem:[#allocation5 + $0x268] sm:$0xff]  ;;  %v2587_v13 = vcombine.high %v252_v7, %v256_v8  ;;  %v260_v15 = vld [vmem:[#allocation5 + $0x280] sm:$0xff]  ;;  %v2586_v19 = vcombine.low %v252_v7, %v256_v8  ;;  %v183_v2 = vld [vmem:[#allocation5 + $0x18] sm:$0xff] }
  0x6f   : > { %974 = vmatpush1.bf16.msra.mxu0 %v2546_v42  ;;  %1025 = vmatpush1.bf16.msra.mxu1 %v2548_v43  ;;  %v2589_v14 = vcombine.high %v253_v9, %v257_v10  ;;  %v264_v16 = vld [vmem:[#allocation5 + $0x2a0] sm:$0xff]  ;;  %v261_v17 = vld [vmem:[#allocation5 + $0x288] sm:$0xff]  ;;  %v2588_v20 = vcombine.low %v253_v9, %v257_v10  ;;  %v190_v9 = vld [vmem:[#allocation5 + $0x50] sm:$0xff] }
  0x70   : > { %975 = vmatprep.subr.bf16.mxu0 %v2555_v44  ;;  %1026 = vmatprep.subr.bf16.mxu1 %v2557_v45  ;;  %v265_v18 = vld [vmem:[#allocation5 + $0x2a8] sm:$0xff]  ;;  %v2595_v21 = vcombine.high %v260_v15, %v264_v16  ;;  %v268_v23 = vld [vmem:[#allocation5 + $0x2c0] sm:$0xff]  ;;  %v2594_v27 = vcombine.low %v260_v15, %v264_v16  ;;  %v194_v10 = vld [vmem:[#allocation5 + $0x70] sm:$0xff] }
  0x71   : > { %v2597_v22 = vcombine.high %v261_v17, %v265_v18  ;;  %v272_v24 = vld [vmem:[#allocation5 + $0x2e0] sm:$0xff]  ;;  %v269_v25 = vld [vmem:[#allocation5 + $0x2c8] sm:$0xff]  ;;  %v2596_v28 = vcombine.low %v261_v17, %v265_v18  ;;  %v2527_v16 = vcombine.high %v190_v9, %v194_v10 }
  0x72   : > { %v273_v26 = vld [vmem:[#allocation5 + $0x2e8] sm:$0xff]  ;;  %v2603_v29 = vcombine.high %v268_v23, %v272_v24  ;;  %v276_v31 = vld [vmem:[#allocation5 + $0x300] sm:$0xff]  ;;  %v2602_v35 = vcombine.low %v268_v23, %v272_v24  ;;  %v2526_v23 = vcombine.low %v190_v9, %v194_v10 }
  0x73   : > { %976 = vmatpush1.bf16.msra.mxu0 %v2554_v50  ;;  %1027 = vmatpush1.bf16.msra.mxu1 %v2556_v51  ;;  %v2605_v30 = vcombine.high %v269_v25, %v273_v26  ;;  %v280_v32 = vld [vmem:[#allocation5 + $0x320] sm:$0xff]  ;;  %v277_v33 = vld [vmem:[#allocation5 + $0x308] sm:$0xff]  ;;  %v2604_v36 = vcombine.low %v269_v25, %v273_v26 }
  0x74   : > { %977 = vmatprep.subr.bf16.mxu0 %v2563_v52  ;;  %1028 = vmatprep.subr.bf16.mxu1 %v2565_v53  ;;  %v281_v34 = vld [vmem:[#allocation5 + $0x328] sm:$0xff]  ;;  %v2611_v37 = vcombine.high %v276_v31, %v280_v32  ;;  %v284_v39 = vld [vmem:[#allocation5 + $0x340] sm:$0xff]  ;;  %v2610_v43 = vcombine.low %v276_v31, %v280_v32  ;;  %v211_v31 = vld [vmem:[#allocation5 + $0xf8] sm:$0xff] }
  0x75   : > { %v2613_v38 = vcombine.high %v277_v33, %v281_v34  ;;  %v288_v40 = vld [vmem:[#allocation5 + $0x360] sm:$0xff]  ;;  %v285_v41 = vld [vmem:[#allocation5 + $0x348] sm:$0xff]  ;;  %v2612_v44 = vcombine.low %v277_v33, %v281_v34 }
  0x76   : > { %v289_v42 = vld [vmem:[#allocation5 + $0x368] sm:$0xff]  ;;  %v2619_v45 = vcombine.high %v284_v39, %v288_v40  ;;  %v292_v47 = vld [vmem:[#allocation5 + $0x380] sm:$0xff]  ;;  %v2618_v51 = vcombine.low %v284_v39, %v288_v40  ;;  %v219_v39 = vld [vmem:[#allocation5 + $0x138] sm:$0xff] }
  0x77   : > { %978 = vmatpush1.bf16.msra.mxu0 %v2562_v59  ;;  %1029 = vmatpush1.bf16.msra.mxu1 %v2564_v60  ;;  %v2621_v46 = vcombine.high %v285_v41, %v289_v42  ;;  %v296_v48 = vld [vmem:[#allocation5 + $0x3a0] sm:$0xff]  ;;  %v293_v49 = vld [vmem:[#allocation5 + $0x388] sm:$0xff]  ;;  %v2620_v52 = vcombine.low %v285_v41, %v289_v42 }
  0x78   : > { %979 = vmatprep.subr.bf16.mxu0 %v2571_v61  ;;  %1030 = vmatprep.subr.bf16.mxu1 %v2573_v62  ;;  %v297_v50 = vld [vmem:[#allocation5 + $0x3a8] sm:$0xff]  ;;  %v2627_v53 = vcombine.high %v292_v47, %v296_v48  ;;  %v300_v55 = vld [vmem:[#allocation5 + $0x3c0] sm:$0xff]  ;;  %v2626_v60 = vcombine.low %v292_v47, %v296_v48  ;;  %v227_v47 = vld [vmem:[#allocation5 + $0x178] sm:$0xff] }
  0x79   : > { %v2629_v54 = vcombine.high %v293_v49, %v297_v50  ;;  %v304_v57 = vld [vmem:[#allocation5 + $0x3e0] sm:$0xff]  ;;  %v301_v58 = vld [vmem:[#allocation5 + $0x3c8] sm:$0xff]  ;;  %v2628_v61 = vcombine.low %v293_v49, %v297_v50 }
  0x7a   : > { %v305_v59 = vld [vmem:[#allocation5 + $0x3e8] sm:$0xff]  ;;  %v2635_v62 = vcombine.high %v300_v55, %v304_v57 }
  0x7b   : > { %980 = vmatpush1.bf16.msra.mxu0 %v2570_v3  ;;  %1031 = vmatpush1.bf16.msra.mxu1 %v2572_v4  ;;  %v2637_v63 = vcombine.high %v301_v58, %v305_v59  ;;  %v187_v3 = vld [vmem:[#allocation5 + $0x38] sm:$0xff]  ;;  %v2634_v4 = vcombine.low %v300_v55, %v304_v57 }
  0x7c   : > { %981 = vmatprep.subr.bf16.mxu0 %v2579_v5  ;;  %1032 = vmatprep.subr.bf16.mxu1 %v2581_v6  ;;  %v2636_v5 = vcombine.low %v301_v58, %v305_v59  ;;  %v2519_v6 = vcombine.high %v182_v0, %v186_v1  ;;  %v3103_v7 = vld [vmem:[%s3087_s3] ss:$8 sps:$4 sm:$0xff]   ;;  %v2521_v8 = vcombine.high %v183_v2, %v187_v3 }
  0x7d   : > { %v2520_v15 = vcombine.low %v183_v2, %v187_v3  ;;  %v235_v55 = vld [vmem:[#allocation5 + $0x1b8] sm:$0xff] }
  0x7f   : > { %982 = vmatpush1.bf16.msra.mxu0 %v2578_v11  ;;  %1033 = vmatpush1.bf16.msra.mxu1 %v2580_v12  ;;  %v191_v11 = vld [vmem:[#allocation5 + $0x58] sm:$0xff] }
  0x80   : > { %983 = vmatprep.subr.bf16.mxu0 %v2587_v13  ;;  %1034 = vmatprep.subr.bf16.mxu1 %v2589_v14  ;;  %v195_v12 = vld [vmem:[#allocation5 + $0x78] sm:$0xff]  ;;  %v2518_v14 = vcombine.low %v182_v0, %v186_v1 }
  0x81   : > { %v179_v13 = vld [vmem:[%s3087_s3 + $0x10] sm:$0xff]  ;;  %v2529_v17 = vcombine.high %v191_v11, %v195_v12  ;;  %v2528_v24 = vcombine.low %v191_v11, %v195_v12 }
  0x82   : > { %v3106_v18 = vcombine.high %v179_v13, %v179_v13 }
  0x83   : > { %984 = vmatpush1.bf16.msra.mxu0 %v2586_v19  ;;  %1035 = vmatpush1.bf16.msra.mxu1 %v2588_v20  ;;  %v198_v19 = vld [vmem:[#allocation5 + $0x90] sm:$0xff] }
  0x84   : > { %985 = vmatprep.subr.bf16.mxu0 %v2595_v21  ;;  %1036 = vmatprep.subr.bf16.mxu1 %v2597_v22  ;;  %v202_v20 = vld [vmem:[#allocation5 + $0xb0] sm:$0xff]  ;;  %v199_v21 = vld [vmem:[#allocation5 + $0x98] sm:$0xff] }
  0x85   : > { %v203_v22 = vld [vmem:[#allocation5 + $0xb8] sm:$0xff]  ;;  %v2535_v25 = vcombine.high %v198_v19, %v202_v20  ;;  %v2534_v32 = vcombine.low %v198_v19, %v202_v20 }
  0x86   : > { %v2537_v26 = vcombine.high %v199_v21, %v203_v22  ;;  %v2536_v33 = vcombine.low %v199_v21, %v203_v22  ;;  %v262_v22 = vld [vmem:[#allocation5 + $0x290] sm:$0xff] }
  0x87   : > { %986 = vmatpush1.bf16.msra.mxu0 %v2594_v27  ;;  %1037 = vmatpush1.bf16.msra.mxu1 %v2596_v28  ;;  %v206_v27 = vld [vmem:[#allocation5 + $0xd0] sm:$0xff] }
  0x88   : > { %987 = vmatprep.subr.bf16.mxu0 %v2603_v29  ;;  %1038 = vmatprep.subr.bf16.mxu1 %v2605_v30  ;;  %v210_v28 = vld [vmem:[#allocation5 + $0xf0] sm:$0xff]  ;;  %v3112_v29 = vcombine.low %v179_v13, %v179_v13  ;;  %v207_v30 = vld [vmem:[#allocation5 + $0xd8] sm:$0xff] }
  0x89   : > { %v2543_v34 = vcombine.high %v206_v27, %v210_v28  ;;  %v2542_v40 = vcombine.low %v206_v27, %v210_v28  ;;  %v2544_v41 = vcombine.low %v207_v30, %v211_v31  ;;  %v254_v13 = vld [vmem:[#allocation5 + $0x250] sm:$0xff] }
  0x8b   : > { %988 = vmatpush1.bf16.msra.mxu0 %v2602_v35  ;;  %1039 = vmatpush1.bf16.msra.mxu1 %v2604_v36  ;;  %v2545_v35 = vcombine.high %v207_v30, %v211_v31  ;;  %v214_v36 = vld [vmem:[#allocation5 + $0x110] sm:$0xff] }
  0x8c   : > { %989 = vmatprep.subr.bf16.mxu0 %v2611_v37  ;;  %1040 = vmatprep.subr.bf16.mxu1 %v2613_v38  ;;  %v218_v37 = vld [vmem:[#allocation5 + $0x130] sm:$0xff]  ;;  %v215_v38 = vld [vmem:[#allocation5 + $0x118] sm:$0xff] }
  0x8d   : > { %v2551_v42 = vcombine.high %v214_v36, %v218_v37  ;;  %v2550_v48 = vcombine.low %v214_v36, %v218_v37  ;;  %v2552_v49 = vcombine.low %v215_v38, %v219_v39  ;;  %v270_v31 = vld [vmem:[#allocation5 + $0x2d0] sm:$0xff] }
  0x8f   : > { %990 = vmatpush1.bf16.msra.mxu0 %v2610_v43  ;;  %1041 = vmatpush1.bf16.msra.mxu1 %v2612_v44  ;;  %v2553_v43 = vcombine.high %v215_v38, %v219_v39  ;;  %v222_v44 = vld [vmem:[#allocation5 + $0x150] sm:$0xff] }
  0x90   : > { %991 = vmatprep.subr.bf16.mxu0 %v2619_v45  ;;  %1042 = vmatprep.subr.bf16.mxu1 %v2621_v46  ;;  %v226_v45 = vld [vmem:[#allocation5 + $0x170] sm:$0xff]  ;;  %v223_v46 = vld [vmem:[#allocation5 + $0x158] sm:$0xff] }
  0x91   : > { %v2559_v50 = vcombine.high %v222_v44, %v226_v45  ;;  %v2558_v57 = vcombine.low %v222_v44, %v226_v45  ;;  %v2560_v58 = vcombine.low %v223_v46, %v227_v47  ;;  %v278_v39 = vld [vmem:[#allocation5 + $0x310] sm:$0xff] }
  0x93   : > { %992 = vmatpush1.bf16.msra.mxu0 %v2618_v51  ;;  %1043 = vmatpush1.bf16.msra.mxu1 %v2620_v52  ;;  %v2561_v51 = vcombine.high %v223_v46, %v227_v47  ;;  %v230_v52 = vld [vmem:[#allocation5 + $0x190] sm:$0xff] }
  0x94   : > { %993 = vmatprep.subr.bf16.mxu0 %v2627_v53  ;;  %1044 = vmatprep.subr.bf16.mxu1 %v2629_v54  ;;  %v234_v53 = vld [vmem:[#allocation5 + $0x1b0] sm:$0xff]  ;;  %v231_v54 = vld [vmem:[#allocation5 + $0x198] sm:$0xff] }
  0x95   : > { %v2567_v59 = vcombine.high %v230_v52, %v234_v53  ;;  %v2566_v0 = vcombine.low %v230_v52, %v234_v53  ;;  %v2568_v1 = vcombine.low %v231_v54, %v235_v55  ;;  %v286_v47 = vld [vmem:[#allocation5 + $0x350] sm:$0xff] }
  0x97   : > { %994 = vmatpush1.bf16.msra.mxu0 %v2626_v60  ;;  %1045 = vmatpush1.bf16.msra.mxu1 %v2628_v61  ;;  %v238_v60 = vld [vmem:[#allocation5 + $0x1d0] sm:$0xff] }
  0x98   : > { %995 = vmatprep.subr.bf16.mxu0 %v2635_v62  ;;  %1046 = vmatprep.subr.bf16.mxu1 %v2637_v63  ;;  %v242_v61 = vld [vmem:[#allocation5 + $0x1f0] sm:$0xff]  ;;  %v239_v62 = vld [vmem:[#allocation5 + $0x1d8] sm:$0xff] }
  0x99   : > { %v243_v63 = vld [vmem:[#allocation5 + $0x1f8] sm:$0xff]  ;;  %v2575_v2 = vcombine.high %v238_v60, %v242_v61  ;;  %v2574_v9 = vcombine.low %v238_v60, %v242_v61 }
  0x9a   : > { %v2577_v3 = vcombine.high %v239_v62, %v243_v63  ;;  %v2576_v10 = vcombine.low %v239_v62, %v243_v63  ;;  %v302_v63 = vld [vmem:[#allocation5 + $0x3d0] sm:$0xff] }
  0x9b   : > { %996 = vmatpush1.bf16.msra.mxu0 %v2634_v4  ;;  %1047 = vmatpush1.bf16.msra.mxu1 %v2636_v5  ;;  %v246_v4 = vld [vmem:[#allocation5 + $0x210] sm:$0xff] }
  0x9c   : > { %1067 = vmatprep.subr.bf16.mxu0 %v2519_v6  ;;  %1118 = vmatprep.subr.bf16.mxu1 %v2521_v8  ;;  %v250_v5 = vld [vmem:[#allocation5 + $0x230] sm:$0xff]  ;;  %v247_v6 = vld [vmem:[#allocation5 + $0x218] sm:$0xff] }
  0x9d   : > { %v251_v8 = vld [vmem:[#allocation5 + $0x238] sm:$0xff]  ;;  %v2583_v11 = vcombine.high %v246_v4, %v250_v5 }
  0x9e   : > { %998 = vmatmul.mubr.bf16.vlgmr.msra.gmra.mrb[0].mxu0 %v3103_v7  ;;  %1049 = vmatmul.mubr.bf16.vlgmr.msra.gmra.mrb[0].mxu1 %v3103_v7  ;;  %v2585_v12 = vcombine.high %v247_v6, %v251_v8  ;;  %v2584_v19 = vcombine.low %v247_v6, %v251_v8 }
  0x9f   : > { %1068 = vmatpush1.bf16.msra.mxu0 %v2518_v14  ;;  %1119 = vmatpush1.bf16.msra.mxu1 %v2520_v15  ;;  %v258_v14 = vld [vmem:[#allocation5 + $0x270] sm:$0xff]  ;;  %v255_v15 = vld [vmem:[#allocation5 + $0x258] sm:$0xff] }
  0xa0   : > { %1069 = vmatprep.subr.bf16.mxu0 %v2527_v16  ;;  %1120 = vmatprep.subr.bf16.mxu1 %v2529_v17  ;;  %v259_v16 = vld [vmem:[#allocation5 + $0x278] sm:$0xff]  ;;  %v2582_v17 = vcombine.low %v246_v4, %v250_v5  ;;  %v2591_v20 = vcombine.high %v254_v13, %v258_v14 }
  0xa1   : > { %1007 = vmatprep.mubr.bf16.mxu0 %v3106_v18  ;;  %1058 = vmatprep.mubr.bf16.mxu1 %v3106_v18  ;;  %v2593_v21 = vcombine.high %v255_v15, %v259_v16  ;;  %v2592_v27 = vcombine.low %v255_v15, %v259_v16 }
  0xa3   : > { %1070 = vmatpush1.bf16.msra.mxu0 %v2526_v23  ;;  %1121 = vmatpush1.bf16.msra.mxu1 %v2528_v24  ;;  %v266_v23 = vld [vmem:[#allocation5 + $0x2b0] sm:$0xff]  ;;  %v263_v24 = vld [vmem:[#allocation5 + $0x298] sm:$0xff] }
  0xa4   : > { %1071 = vmatprep.subr.bf16.mxu0 %v2535_v25  ;;  %1122 = vmatprep.subr.bf16.mxu1 %v2537_v26  ;;  %v267_v25 = vld [vmem:[#allocation5 + $0x2b8] sm:$0xff]  ;;  %v2590_v26 = vcombine.low %v254_v13, %v258_v14  ;;  %v2599_v28 = vcombine.high %v262_v22, %v266_v23 }
  0xa5   : > { %v2601_v30 = vcombine.high %v263_v24, %v267_v25  ;;  %v2600_v36 = vcombine.low %v263_v24, %v267_v25 }
  0xa6   : > { %1008 = vmatmul.mubr.bf16.gmra.mrb[4].mxu0 %v3112_v29  ;;  %1059 = vmatmul.mubr.bf16.gmra.mrb[4].mxu1 %v3112_v29 }
  0xa7   : > { %1072 = vmatpush1.bf16.msra.mxu0 %v2534_v32  ;;  %1123 = vmatpush1.bf16.msra.mxu1 %v2536_v33  ;;  %v274_v32 = vld [vmem:[#allocation5 + $0x2f0] sm:$0xff]  ;;  %v271_v33 = vld [vmem:[#allocation5 + $0x2d8] sm:$0xff] }
  0xa8   : > { %1073 = vmatprep.subr.bf16.mxu0 %v2543_v34  ;;  %1124 = vmatprep.subr.bf16.mxu1 %v2545_v35  ;;  %v275_v34 = vld [vmem:[#allocation5 + $0x2f8] sm:$0xff]  ;;  %v2598_v35 = vcombine.low %v262_v22, %v266_v23  ;;  %v2607_v37 = vcombine.high %v270_v31, %v274_v32 }
  0xa9   : > { %1099 = vmatprep.mubr.bf16.mxu0 %v3098_v56  ;;  %1150 = vmatprep.mubr.bf16.mxu1 %v3098_v56  ;;  %v2569_v56 = vcombine.high %v231_v54, %v235_v55  ;;  %v2609_v38 = vcombine.high %v271_v33, %v275_v34  ;;  %v2608_v44 = vcombine.low %v271_v33, %v275_v34  ;;  %v294_v55 = vld [vmem:[#allocation5 + $0x390] sm:$0xff] }
  0xab   : > { %1074 = vmatpush1.bf16.msra.mxu0 %v2542_v40  ;;  %1125 = vmatpush1.bf16.msra.mxu1 %v2544_v41  ;;  %v282_v40 = vld [vmem:[#allocation5 + $0x330] sm:$0xff]  ;;  %v279_v41 = vld [vmem:[#allocation5 + $0x318] sm:$0xff] }
  0xac   : > { %1075 = vmatprep.subr.bf16.mxu0 %v2551_v42  ;;  %1126 = vmatprep.subr.bf16.mxu1 %v2553_v43  ;;  %v283_v42 = vld [vmem:[#allocation5 + $0x338] sm:$0xff]  ;;  %v2606_v43 = vcombine.low %v270_v31, %v274_v32  ;;  %v2615_v45 = vcombine.high %v278_v39, %v282_v40 }
  0xad   : > { %v2617_v46 = vcombine.high %v279_v41, %v283_v42  ;;  %v2616_v52 = vcombine.low %v279_v41, %v283_v42 }
  0xaf   : > { %1076 = vmatpush1.bf16.msra.mxu0 %v2550_v48  ;;  %1127 = vmatpush1.bf16.msra.mxu1 %v2552_v49  ;;  %v290_v48 = vld [vmem:[#allocation5 + $0x370] sm:$0xff]  ;;  %v287_v49 = vld [vmem:[#allocation5 + $0x358] sm:$0xff] }
  0xb0   : > { %1077 = vmatprep.subr.bf16.mxu0 %v2559_v50  ;;  %1128 = vmatprep.subr.bf16.mxu1 %v2561_v51  ;;  %v291_v50 = vld [vmem:[#allocation5 + $0x378] sm:$0xff]  ;;  %v2614_v51 = vcombine.low %v278_v39, %v282_v40  ;;  %v2623_v53 = vcombine.high %v286_v47, %v290_v48 }
  0xb1   : > { %v2625_v54 = vcombine.high %v287_v49, %v291_v50  ;;  %v2624_v60 = vcombine.low %v287_v49, %v291_v50 }
  0xb3   : > { %1078 = vmatpush1.bf16.msra.mxu0 %v2558_v57  ;;  %1129 = vmatpush1.bf16.msra.mxu1 %v2560_v58  ;;  %v298_v57 = vld [vmem:[#allocation5 + $0x3b0] sm:$0xff]  ;;  %v295_v58 = vld [vmem:[#allocation5 + $0x398] sm:$0xff] }
  0xb4   : > { %1079 = vmatprep.subr.bf16.mxu0 %v2567_v59  ;;  %1130 = vmatprep.subr.bf16.mxu1 %v2569_v56  ;;  %v299_v59 = vld [vmem:[#allocation5 + $0x3b8] sm:$0xff]  ;;  %v2622_v56 = vcombine.low %v286_v47, %v290_v48  ;;  %v2631_v61 = vcombine.high %v294_v55, %v298_v57 }
  0xb5   : > { %v2633_v62 = vcombine.high %v295_v58, %v299_v59  ;;  %v2632_v4 = vcombine.low %v295_v58, %v299_v59 }
  0xb7   : > { %1080 = vmatpush1.bf16.msra.mxu0 %v2566_v0  ;;  %1131 = vmatpush1.bf16.msra.mxu1 %v2568_v1  ;;  %v306_v0 = vld [vmem:[#allocation5 + $0x3f0] sm:$0xff]  ;;  %v303_v1 = vld [vmem:[#allocation5 + $0x3d8] sm:$0xff] }
  0xb8   : > { %1081 = vmatprep.subr.bf16.mxu0 %v2575_v2  ;;  %1132 = vmatprep.subr.bf16.mxu1 %v2577_v3  ;;  %v307_v2 = vld [vmem:[#allocation5 + $0x3f8] sm:$0xff]  ;;  %v2630_v3 = vcombine.low %v294_v55, %v298_v57  ;;  %v2639_v5 = vcombine.high %v302_v63, %v306_v0  ;;  %v2638_v8 = vcombine.low %v302_v63, %v306_v0 }
  0xb9   : > { %v2641_v6 = vcombine.high %v303_v1, %v307_v2 }
  0xbb   : > { %1082 = vmatpush1.bf16.msra.mxu0 %v2574_v9  ;;  %1133 = vmatpush1.bf16.msra.mxu1 %v2576_v10  ;;  %v2640_v9 = vcombine.low %v303_v1, %v307_v2 }
  0xbc   : > { %1083 = vmatprep.subr.bf16.mxu0 %v2583_v11  ;;  %1134 = vmatprep.subr.bf16.mxu1 %v2585_v12 }
  0xbf   : > { %1084 = vmatpush1.bf16.msra.mxu0 %v2582_v17  ;;  %1135 = vmatpush1.bf16.msra.mxu1 %v2584_v19 }
  0xc0   : > { %1085 = vmatprep.subr.bf16.mxu0 %v2591_v20  ;;  %1136 = vmatprep.subr.bf16.mxu1 %v2593_v21 }
  0xc3   : > { %1086 = vmatpush1.bf16.msra.mxu0 %v2590_v26  ;;  %1137 = vmatpush1.bf16.msra.mxu1 %v2592_v27 }
  0xc4   : > { %1087 = vmatprep.subr.bf16.mxu0 %v2599_v28  ;;  %1138 = vmatprep.subr.bf16.mxu1 %v2601_v30 }
  0xc7   : > { %1088 = vmatpush1.bf16.msra.mxu0 %v2598_v35  ;;  %1139 = vmatpush1.bf16.msra.mxu1 %v2600_v36 }
  0xc8   : > { %1089 = vmatprep.subr.bf16.mxu0 %v2607_v37  ;;  %1140 = vmatprep.subr.bf16.mxu1 %v2609_v38 }
  0xcb   : > { %1090 = vmatpush1.bf16.msra.mxu0 %v2606_v43  ;;  %1141 = vmatpush1.bf16.msra.mxu1 %v2608_v44 }
  0xcc   : > { %1091 = vmatprep.subr.bf16.mxu0 %v2615_v45  ;;  %1142 = vmatprep.subr.bf16.mxu1 %v2617_v46 }
  0xcf   : > { %1092 = vmatpush1.bf16.msra.mxu0 %v2614_v51  ;;  %1143 = vmatpush1.bf16.msra.mxu1 %v2616_v52 }
  0xd0   : > { %1093 = vmatprep.subr.bf16.mxu0 %v2623_v53  ;;  %1144 = vmatprep.subr.bf16.mxu1 %v2625_v54 }
  0xd3   : > { %1094 = vmatpush1.bf16.msra.mxu0 %v2622_v56  ;;  %1145 = vmatpush1.bf16.msra.mxu1 %v2624_v60 }
  0xd4   : > { %1095 = vmatprep.subr.bf16.mxu0 %v2631_v61  ;;  %1146 = vmatprep.subr.bf16.mxu1 %v2633_v62 }
  0xd7   : > { %1096 = vmatpush1.bf16.msra.mxu0 %v2630_v3  ;;  %1147 = vmatpush1.bf16.msra.mxu1 %v2632_v4 }
  0xd8   : > { %1097 = vmatprep.subr.bf16.mxu0 %v2639_v5  ;;  %1148 = vmatprep.subr.bf16.mxu1 %v2641_v6 }
  0xdb   : > { %1098 = vmatpush1.bf16.msra.mxu0 %v2638_v8  ;;  %1149 = vmatpush1.bf16.msra.mxu1 %v2640_v9 }
  0xde   : > { %1100 = vmatmul.mubr.bf16.vlgmr.msra.gmra.mrb[8].mxu0 %v3103_v7  ;;  %1151 = vmatmul.mubr.bf16.vlgmr.msra.gmra.mrb[8].mxu1 %v3103_v7 }
  0xdf   : > { %1109 = vmatprep.mubr.bf16.mxu0 %v3106_v18  ;;  %1160 = vmatprep.mubr.bf16.mxu1 %v3106_v18 }
  0xe6   : > { %1110 = vmatmul.mubr.bf16.gmra.mrb[12].mxu0 %v3112_v29  ;;  %1161 = vmatmul.mubr.bf16.gmra.mrb[12].mxu1 %v3112_v29 }
 0x171   : > { %v999_v10 = vpop.f32.mrb[0].mxu0  ;;  %v1050_v13 = vpop.f32.mrb[0].mxu1 }
 0x172   : > { %v1169_v11 = vmax.f32 %v999_v10, 0.0  ;;  %v1001_v12 = vpop.f32.mrb[1].mxu0  ;;  %v1171_v16 = vmax.f32 %v1050_v13, 0.0  ;;  %v1052_v17 = vpop.f32.mrb[1].mxu1 }
 0x173   : > { %v1170_v14 = vmax.f32 %v1001_v12, 0.0  ;;  %v1003_v15 = vpop.f32.mrb[2].mxu0  ;;  %v1172_v21 = vmax.f32 %v1052_v17, 0.0  ;;  %v1054_v22 = vpop.f32.mrb[2].mxu1 }
 0x174   : > { %v3124_v19 = vmin.f32 %v1169_v11, 1.0  ;;  %v1177_v20 = vmax.f32 %v1003_v15, 0.0  ;;  %v1005_v7 = vpop.f32.mrb[3].mxu0  ;;  %v3126_v23 = vmin.f32 %v1171_v16, 1.0  ;;  %v1179_v24 = vmax.f32 %v1054_v22, 0.0  ;;  %v1056_v25 = vpop.f32.mrb[3].mxu1 }
 0x175   : > { %v1178_v18 = vmax.f32 %v1005_v7, 0.0  ;;  %v3131_v27 = vmin.f32 %v1170_v14, 1.0  ;;  %v3134_v30 = vmin.f32 %v1172_v21, 1.0  ;;  %v1180_v35 = vmax.f32 %v1056_v25, 0.0 }
 0x176   : > { %v1217_v29 = vmul.f32 0.2989, %v3124_v19  ;;  %v3129_v26 = vmin.f32 %v1177_v20, 1.0  ;;  %v1219_v31 = vmul.f32 0.2989, %v3126_v23  ;;  %v3139_v33 = vmin.f32 %v1179_v24, 1.0 }
 0x177   : > { %v3137_v32 = vmin.f32 %v1178_v18, 1.0  ;;  %v1218_v38 = vmul.f32 0.2989, %v3131_v27  ;;  %v1220_v41 = vmul.f32 0.2989, %v3134_v30  ;;  %v3145_v42 = vmin.f32 %v1180_v35, 1.0 }
 0x178   : > { %v1225_v28 = vmul.f32 0.587, %v3129_v26  ;;  %v1227_v40 = vmul.f32 0.587, %v3139_v33 }
 0x179   : > { %v1009_v36 = vpop.f32.mrb[4].mxu0  ;;  %v1060_v37 = vpop.f32.mrb[4].mxu1  ;;  %v1226_v39 = vmul.f32 0.587, %v3137_v32  ;;  %v1228_v51 = vmul.f32 0.587, %v3145_v42 }
 0x17a   : > { %v1233_v34 = vadd.f32 %v1225_v28, %v1217_v29  ;;  %v1185_v43 = vmax.f32 %v1009_v36, 0.0  ;;  %v1187_v44 = vmax.f32 %v1060_v37, 0.0  ;;  %v1011_v45 = vpop.f32.mrb[5].mxu0  ;;  %v1235_v47 = vadd.f32 %v1227_v40, %v1219_v31  ;;  %v1062_v49 = vpop.f32.mrb[5].mxu1 }
 0x17b   : > { %v1234_v46 = vadd.f32 %v1226_v39, %v1218_v38  ;;  %v1186_v48 = vmax.f32 %v1011_v45, 0.0  ;;  %v1013_v50 = vpop.f32.mrb[6].mxu0  ;;  %v1188_v55 = vmax.f32 %v1062_v49, 0.0  ;;  %v1064_v58 = vpop.f32.mrb[6].mxu1  ;;  %v1236_v59 = vadd.f32 %v1228_v51, %v1220_v41 }
 0x17c   : > { %v3148_v52 = vmin.f32 %v1185_v43, 1.0  ;;  %v3150_v53 = vmin.f32 %v1187_v44, 1.0  ;;  %v1014_v57 = vpop.f32.mrb[7].mxu0  ;;  %v1065_v1 = vpop.f32.mrb[7].mxu1 }
 0x17d   : > { %v3152_v54 = vmin.f32 %v1186_v48, 1.0  ;;  %v3157_v0 = vmin.f32 %v1188_v55, 1.0 }
 0x17e   : > { %v1241_v56 = vmul.f32 0.114, %v3148_v52  ;;  %v1243_v60 = vmul.f32 0.114, %v3150_v53 }
 0x17f   : > { %v1242_v61 = vmul.f32 0.114, %v3152_v54  ;;  %v1244_v3 = vmul.f32 0.114, %v3157_v0 }
 0x180   : > { %v1249_v62 = vadd.f32 %v1241_v56, %v1233_v34  ;;  %v1251_v63 = vadd.f32 %v1243_v60, %v1235_v47 }
 0x181   : > { %v1250_v2 = vadd.f32 %v1242_v61, %v1234_v46  ;;  %v1252_v5 = vadd.f32 %v1244_v3, %v1236_v59 }
 0x183   : > { %v1257_v4 = vadd.f32 %v1250_v2, %v1249_v62 }
 0x185   : > { %v1258_v6 = vadd.f32 %v1257_v4, %v1251_v63 }
 0x187   : > { %v1259_v8 = vadd.f32 %v1258_v6, %v1252_v5 }
 0x1b1   : > { %v1101_v9 = vpop.f32.mrb[8].mxu0  ;;  %v1152_v12 = vpop.f32.mrb[8].mxu1 }
 0x1b2   : > { %v1173_v10 = vmax.f32 %v1101_v9, 0.0  ;;  %v1103_v11 = vpop.f32.mrb[9].mxu0  ;;  %v1175_v14 = vmax.f32 %v1152_v12, 0.0  ;;  %v1154_v16 = vpop.f32.mrb[9].mxu1 }
 0x1b3   : > { %v1174_v13 = vmax.f32 %v1103_v11, 0.0  ;;  %v1105_v15 = vpop.f32.mrb[10].mxu0  ;;  %v1176_v7 = vmax.f32 %v1154_v16, 0.0  ;;  %v1156_v22 = vpop.f32.mrb[10].mxu1 }
 0x1b4   : > { %v3160_v17 = vmin.f32 %v1173_v10, 1.0  ;;  %v1181_v20 = vmax.f32 %v1105_v15, 0.0  ;;  %v1107_v21 = vpop.f32.mrb[11].mxu0  ;;  %v3162_v18 = vmin.f32 %v1175_v14, 1.0  ;;  %v1183_v25 = vmax.f32 %v1156_v22, 0.0  ;;  %v1158_v29 = vpop.f32.mrb[11].mxu1 }
 0x1b5   : > { %v1182_v24 = vmax.f32 %v1107_v21, 0.0  ;;  %v1198_v31 = vmin.f32 %v1174_v13, 1.0  ;;  %v1200_v36 = vmin.f32 %v1176_v7, 1.0  ;;  %v1184_v41 = vmax.f32 %v1158_v29, 0.0 }
 0x1b6   : > { %v3164_v28 = vmin.f32 %v1181_v20, 1.0  ;;  %v1221_v34 = vmul.f32 0.2989, %v3160_v17  ;;  %v1223_v37 = vmul.f32 0.2989, %v3162_v18  ;;  %v1207_v39 = vmin.f32 %v1183_v25, 1.0 }
 0x1b7   : > { %v1206_v38 = vmin.f32 %v1182_v24, 1.0  ;;  %v1222_v45 = vmul.f32 0.2989, %v1198_v31  ;;  %v1224_v48 = vmul.f32 0.2989, %v1200_v36  ;;  %v1208_v49 = vmin.f32 %v1184_v41, 1.0 }
 0x1b8   : > { %v1229_v35 = vmul.f32 0.587, %v3164_v28  ;;  %v1231_v47 = vmul.f32 0.587, %v1207_v39  ;;  %v1268_v25 = vmul.f32 0.9, %v3124_v19 }
 0x1b9   : > { %v1111_v43 = vpop.f32.mrb[12].mxu0  ;;  %v1162_v44 = vpop.f32.mrb[12].mxu1  ;;  %v1230_v46 = vmul.f32 0.587, %v1206_v38  ;;  %v1232_v61 = vmul.f32 0.587, %v1208_v49 }
 0x1ba   : > { %v1237_v40 = vadd.f32 %v1229_v35, %v1221_v34  ;;  %v1189_v50 = vmax.f32 %v1111_v43, 0.0  ;;  %v1191_v51 = vmax.f32 %v1162_v44, 0.0  ;;  %v1113_v55 = vpop.f32.mrb[13].mxu0  ;;  %v1239_v58 = vadd.f32 %v1231_v47, %v1223_v37  ;;  %v1164_v56 = vpop.f32.mrb[13].mxu1 }
 0x1bb   : > { %v1238_v57 = vadd.f32 %v1230_v46, %v1222_v45  ;;  %v1190_v59 = vmax.f32 %v1113_v55, 0.0  ;;  %v1115_v60 = vpop.f32.mrb[14].mxu0  ;;  %v1192_v2 = vmax.f32 %v1164_v56, 0.0  ;;  %v1166_v4 = vpop.f32.mrb[14].mxu1  ;;  %v1240_v9 = vadd.f32 %v1232_v61, %v1224_v48 }
 0x1bc   : > { %v1213_v62 = vmin.f32 %v1189_v50, 1.0  ;;  %v1215_v63 = vmin.f32 %v1191_v51, 1.0  ;;  %v1116_v3 = vpop.f32.mrb[15].mxu0  ;;  %v1167_v13 = vpop.f32.mrb[15].mxu1  ;;  %v1269_v29 = vmul.f32 0.9, %v3131_v27 }
 0x1bd   : > { %v1214_v1 = vmin.f32 %v1190_v59, 1.0  ;;  %v1216_v12 = vmin.f32 %v1192_v2, 1.0  ;;  %v1301_v34 = vmul.f32 0.9, %v3129_v26  ;;  %v1270_v35 = vmul.f32 0.9, %v3126_v23 }
 0x1be   : > { %v1245_v5 = vmul.f32 0.114, %v1213_v62  ;;  %v1247_v6 = vmul.f32 0.114, %v1215_v63  ;;  %v1271_v37 = vmul.f32 0.9, %v3134_v30 }
 0x1bf   : > { %v1246_v10 = vmul.f32 0.114, %v1214_v1  ;;  %v1248_v16 = vmul.f32 0.114, %v1216_v12  ;;  %v1303_v41 = vmul.f32 0.9, %v3139_v33 }
 0x1c0   : > { %v1253_v11 = vadd.f32 %v1245_v5, %v1237_v40  ;;  %v1255_v14 = vadd.f32 %v1247_v6, %v1239_v58  ;;  %v1302_v40 = vmul.f32 0.9, %v3137_v32  ;;  %v3178_v43 = vmul.f32 0.9, %v3148_v52 }
 0x1c1   : > { %v1254_v15 = vadd.f32 %v1246_v10, %v1238_v57  ;;  %v1256_v7 = vadd.f32 %v1248_v16, %v1240_v9  ;;  %v3181_v44 = vmul.f32 0.9, %v3150_v53  ;;  %v3184_v19 = vmul.f32 0.9, %v3152_v54 }
 0x1c2   : > { %v1260_v20 = vadd.f32 %v1259_v8, %v1253_v11  ;;  %v1304_v8 = vmul.f32 0.9, %v3145_v42  ;;  %v3187_v26 = vmul.f32 0.9, %v3157_v0  ;;  %v1272_v23 = vmul.f32 0.9, %v3160_v17 }
 0x1c3   : > { %v1273_v27 = vmul.f32 0.9, %v1198_v31  ;;  %v1274_v32 = vmul.f32 0.9, %v3162_v18  ;;  %v1305_v33 = vmul.f32 0.9, %v3164_v28 }
 0x1c4   : > { %v1261_v21 = vadd.f32 %v1260_v20, %v1254_v15  ;;  %v1275_v52 = vmul.f32 0.9, %v1200_v36  ;;  %v1306_v45 = vmul.f32 0.9, %v1206_v38  ;;  %v1307_v46 = vmul.f32 0.9, %v1207_v39 }
 0x1c5   : > { %v1308_v53 = vmul.f32 0.9, %v1208_v49  ;;  %v1337_v47 = vmul.f32 0.9, %v1213_v62  ;;  %v1339_v54 = vmul.f32 0.9, %v1215_v63 }
 0x1c6   : > { %v1262_v22 = vadd.f32 %v1261_v21, %v1255_v14  ;;  %v1338_v50 = vmul.f32 0.9, %v1214_v1  ;;  %v1340_v51 = vmul.f32 0.9, %v1216_v12 }
 0x1c8   : > { %v1263_v24 = vadd.f32 %v1262_v22, %v1256_v7 }
 0x1ca   : > { %1264 = vadd.xlane.f32.xlu0 %v1263_v24 }
 0x257   : > { %v1265_v30 = vpop.xlane.xlu0 %1264 }
 0x258   : > { %v1267_v42 = vmul.f32 0.0009765625, %v1265_v30 }
 0x25a   : > { %v1276_v48 = vmul.f32 0.1, %v1267_v42 }
 0x25c   : > { %v1277_v0 = vadd.f32 %v1276_v48, %v1268_v25  ;;  %v1278_v55 = vadd.f32 %v1276_v48, %v1269_v29  ;;  %v1279_v57 = vadd.f32 %v1276_v48, %v1270_v35  ;;  %v1280_v17 = vadd.f32 %v1276_v48, %v1271_v37 }
 0x25d   : > { %v1281_v31 = vadd.f32 %v1276_v48, %v1272_v23  ;;  %v1282_v58 = vadd.f32 %v1276_v48, %v1273_v27  ;;  %v1283_v59 = vadd.f32 %v1276_v48, %v1274_v32  ;;  %v1284_v18 = vadd.f32 %v1276_v48, %v1275_v52 }
 0x25e   : > { %v1285_v56 = vmax.f32 %v1277_v0, 0.0  ;;  %v1286_v28 = vmax.f32 %v1278_v55, 0.0  ;;  %v1287_v60 = vmax.f32 %v1279_v57, 0.0  ;;  %v1288_v36 = vmax.f32 %v1280_v17, 0.0 }
 0x25f   : > { %v1289_v38 = vmax.f32 %v1281_v31, 0.0  ;;  %v1290_v39 = vmax.f32 %v1282_v58, 0.0  ;;  %v1291_v49 = vmax.f32 %v1283_v59, 0.0  ;;  %v1292_v61 = vmax.f32 %v1284_v18, 0.0 }
 0x260   : > { %v3192_v62 = vmin.f32 %v1285_v56, 1.0  ;;  %v3194_v63 = vmin.f32 %v1286_v28, 1.0  ;;  %v3196_v1 = vmin.f32 %v1287_v60, 1.0  ;;  %v3198_v2 = vmin.f32 %v1288_v36, 1.0 }
 0x261   : > { %v3200_v3 = vmin.f32 %v1289_v38, 1.0  ;;  %v3202_v4 = vmin.f32 %v1290_v39, 1.0  ;;  %v3204_v5 = vmin.f32 %v1291_v49, 1.0  ;;  %v3206_v6 = vmin.f32 %v1292_v61, 1.0 }
 0x262   : > { %v1309_v9 = vadd.f32 %v1301_v34, %v1276_v48  ;;  %v1310_v10 = vadd.f32 %v1302_v40, %v1276_v48  ;;  %v1311_v11 = vadd.f32 %v1303_v41, %v1276_v48  ;;  %v1312_v12 = vadd.f32 %v1304_v8, %v1276_v48 }
 0x263   : > { %v1313_v13 = vadd.f32 %v1305_v33, %v1276_v48  ;;  %v1314_v14 = vadd.f32 %v1306_v45, %v1276_v48  ;;  %v1315_v15 = vadd.f32 %v1307_v46, %v1276_v48  ;;  %v1316_v16 = vadd.f32 %v1308_v53, %v1276_v48 }
 0x264   : > { %v1317_v20 = vmax.f32 %v1309_v9, 0.0  ;;  %v1318_v7 = vmax.f32 %v1310_v10, 0.0  ;;  %v1319_v21 = vmax.f32 %v1311_v11, 0.0  ;;  %v1320_v22 = vmax.f32 %v1312_v12, 0.0 }
 0x265   : > { %v1321_v24 = vmax.f32 %v1313_v13, 0.0  ;;  %v1322_v25 = vmax.f32 %v1314_v14, 0.0  ;;  %v1323_v29 = vmax.f32 %v1315_v15, 0.0  ;;  %v1324_v35 = vmax.f32 %v1316_v16, 0.0 }
 0x266   : > { %v3208_v37 = vmin.f32 %v1317_v20, 1.0  ;;  %v3210_v23 = vmin.f32 %v1318_v7, 1.0  ;;  %v3212_v34 = vmin.f32 %v1319_v21, 1.0  ;;  %v3214_v40 = vmin.f32 %v1320_v22, 1.0 }
 0x267   : > { %v3216_v41 = vmin.f32 %v1321_v24, 1.0  ;;  %v3218_v8 = vmin.f32 %v1322_v25, 1.0  ;;  %v3220_v27 = vmin.f32 %v1323_v29, 1.0  ;;  %v3222_v30 = vmin.f32 %v1324_v35, 1.0 }
 0x268   : > { %v1341_v32 = vadd.f32 %v3178_v43, %v1276_v48  ;;  %v1342_v33 = vadd.f32 %v3184_v19, %v1276_v48  ;;  %v1343_v42 = vadd.f32 %v3181_v44, %v1276_v48  ;;  %v1344_v52 = vadd.f32 %v3187_v26, %v1276_v48 }
 0x269   : > { %v1345_v45 = vadd.f32 %v1337_v47, %v1276_v48  ;;  %v1346_v46 = vadd.f32 %v1338_v50, %v1276_v48  ;;  %v1347_v53 = vadd.f32 %v1339_v54, %v1276_v48  ;;  %v1348_v0 = vadd.f32 %v1340_v51, %v1276_v48 }
 0x26a   : > { %v1349_v55 = vmax.f32 %v1341_v32, 0.0  ;;  %v1350_v57 = vmax.f32 %v1342_v33, 0.0  ;;  %v1351_v17 = vmax.f32 %v1343_v42, 0.0  ;;  %v1352_v31 = vmax.f32 %v1344_v52, 0.0 }
 0x26b   : > { %v1353_v58 = vmax.f32 %v1345_v45, 0.0  ;;  %v1354_v59 = vmax.f32 %v1346_v46, 0.0  ;;  %v1355_v18 = vmax.f32 %v1347_v53, 0.0  ;;  %v1356_v56 = vmax.f32 %v1348_v0, 0.0 }
 0x26c   : > { %v3228_v28 = vmin.f32 %v1349_v55, 1.0  ;;  %v3230_v43 = vmin.f32 %v1350_v57, 1.0  ;;  %v3232_v19 = vmin.f32 %v1351_v17, 1.0  ;;  %v3234_v44 = vmin.f32 %v1352_v31, 1.0 }
 0x26d   : > { %v3236_v26 = vmin.f32 %v1353_v58, 1.0  ;;  %v3238_v47 = vmin.f32 %v1354_v59, 1.0  ;;  %v3240_v48 = vmin.f32 %v1355_v18, 1.0  ;;  %v3242_v54 = vmin.f32 %v1356_v56, 1.0 }
 0x26e   : > { %v1365_v50 = vmul.f32 0.2989, %v3192_v62  ;;  %v1366_v51 = vmul.f32 0.2989, %v3194_v63  ;;  %v1367_v60 = vmul.f32 0.2989, %v3196_v1 }
 0x26f   : > { %v1368_v36 = vmul.f32 0.2989, %v3198_v2  ;;  %v1369_v38 = vmul.f32 0.2989, %v3200_v3  ;;  %v1370_v39 = vmul.f32 0.2989, %v3202_v4 }
 0x270   : > { %v1371_v49 = vmul.f32 0.2989, %v3204_v5  ;;  %v1372_v61 = vmul.f32 0.2989, %v3206_v6  ;;  %v1373_v9 = vmul.f32 0.587, %v3208_v37 }
 0x271   : > { %v1374_v10 = vmul.f32 0.587, %v3210_v23  ;;  %v1375_v11 = vmul.f32 0.587, %v3212_v34  ;;  %v1376_v12 = vmul.f32 0.587, %v3214_v40 }
 0x272   : > { %v1377_v13 = vmul.f32 0.587, %v3216_v41  ;;  %v1378_v14 = vmul.f32 0.587, %v3218_v8  ;;  %v1379_v15 = vmul.f32 0.587, %v3220_v27  ;;  %v1381_v16 = vadd.f32 %v1373_v9, %v1365_v50 }
 0x273   : > { %v1380_v20 = vmul.f32 0.587, %v3222_v30  ;;  %v1382_v7 = vadd.f32 %v1374_v10, %v1366_v51  ;;  %v1383_v21 = vadd.f32 %v1375_v11, %v1367_v60  ;;  %v1384_v22 = vadd.f32 %v1376_v12, %v1368_v36 }
 0x274   : > { %v1385_v24 = vadd.f32 %v1377_v13, %v1369_v38  ;;  %v1386_v25 = vadd.f32 %v1378_v14, %v1370_v39  ;;  %v1387_v29 = vadd.f32 %v1379_v15, %v1371_v49  ;;  %v1389_v35 = vmul.f32 0.114, %v3228_v28 }
 0x275   : > { %v1388_v32 = vadd.f32 %v1380_v20, %v1372_v61  ;;  %v1390_v33 = vmul.f32 0.114, %v3230_v43  ;;  %v1391_v42 = vmul.f32 0.114, %v3232_v19  ;;  %v1392_v52 = vmul.f32 0.114, %v3234_v44 }
 0x276   : > { %v1393_v45 = vmul.f32 0.114, %v3236_v26  ;;  %v1394_v46 = vmul.f32 0.114, %v3238_v47  ;;  %v1395_v53 = vmul.f32 0.114, %v3240_v48  ;;  %v1397_v0 = vadd.f32 %v1389_v35, %v1381_v16 }
 0x277   : > { %v1396_v55 = vmul.f32 0.114, %v3242_v54  ;;  %v1398_v57 = vadd.f32 %v1390_v33, %v1382_v7  ;;  %v1399_v17 = vadd.f32 %v1391_v42, %v1383_v21  ;;  %v1400_v31 = vadd.f32 %v1392_v52, %v1384_v22 }
 0x278   : > { %v1401_v58 = vadd.f32 %v1393_v45, %v1385_v24  ;;  %v1402_v59 = vadd.f32 %v1394_v46, %v1386_v25  ;;  %v1403_v18 = vadd.f32 %v1395_v53, %v1387_v29  ;;  %v1405_v56 = vmul.f32 1.5, %v3192_v62 }
 0x279   : > { %v1404_v50 = vadd.f32 %v1396_v55, %v1388_v32  ;;  %v1406_v51 = vmul.f32 1.5, %v3194_v63  ;;  %v1407_v60 = vmul.f32 1.5, %v3196_v1  ;;  %v1408_v36 = vmul.f32 1.5, %v3198_v2 }
 0x27a   : > { %v1409_v38 = vmul.f32 1.5, %v3200_v3  ;;  %v1410_v39 = vmul.f32 1.5, %v3202_v4  ;;  %v1411_v49 = vmul.f32 1.5, %v3204_v5  ;;  %v1412_v61 = vmul.f32 1.5, %v3206_v6 }
 0x27b   : > { %v3276_v9 = vmul.f32 -0.5, %v1397_v0  ;;  %v3278_v10 = vmul.f32 -0.5, %v1398_v57  ;;  %v3280_v62 = vmul.f32 -0.5, %v1399_v17  ;;  %v3282_v11 = vmul.f32 -0.5, %v1400_v31 }
 0x27c   : > { %v3284_v63 = vmul.f32 -0.5, %v1401_v58  ;;  %v3286_v1 = vmul.f32 -0.5, %v1402_v59  ;;  %v3288_v2 = vmul.f32 -0.5, %v1403_v18  ;;  %v3290_v3 = vmul.f32 -0.5, %v1404_v50 }
 0x27d   : > { %v1421_v4 = vadd.f32 %v3276_v9, %v1405_v56  ;;  %v1422_v5 = vadd.f32 %v3278_v10, %v1406_v51  ;;  %v1423_v6 = vadd.f32 %v3280_v62, %v1407_v60  ;;  %v1424_v12 = vadd.f32 %v3282_v11, %v1408_v36 }
 0x27e   : > { %v1425_v13 = vadd.f32 %v3284_v63, %v1409_v38  ;;  %v1426_v14 = vadd.f32 %v3286_v1, %v1410_v39  ;;  %v1427_v15 = vadd.f32 %v3288_v2, %v1411_v49  ;;  %v1428_v16 = vadd.f32 %v3290_v3, %v1412_v61 }
 0x27f   : > { %v1429_v20 = vmax.f32 %v1421_v4, 0.0  ;;  %v1430_v7 = vmax.f32 %v1422_v5, 0.0  ;;  %v1431_v21 = vmax.f32 %v1423_v6, 0.0  ;;  %v1432_v22 = vmax.f32 %v1424_v12, 0.0 }
 0x280   : > { %v1433_v24 = vmax.f32 %v1425_v13, 0.0  ;;  %v1434_v25 = vmax.f32 %v1426_v14, 0.0  ;;  %v1435_v29 = vmax.f32 %v1427_v15, 0.0  ;;  %v1436_v35 = vmax.f32 %v1428_v16, 0.0 }
 0x281   : > { %v3300_v32 = vmin.f32 %v1429_v20, 1.0  ;;  %v3302_v33 = vmin.f32 %v1430_v7, 1.0  ;;  %v3304_v42 = vmin.f32 %v1431_v21, 1.0  ;;  %v3306_v52 = vmin.f32 %v1432_v22, 1.0 }
 0x282   : > { %v3308_v45 = vmin.f32 %v1433_v24, 1.0  ;;  %v3310_v46 = vmin.f32 %v1434_v25, 1.0  ;;  %v3312_v53 = vmin.f32 %v1435_v29, 1.0  ;;  %v3314_v0 = vmin.f32 %v1436_v35, 1.0 }
 0x283   : > { %v1445_v55 = vmul.f32 1.5, %v3208_v37  ;;  %v1446_v57 = vmul.f32 1.5, %v3210_v23  ;;  %v1447_v17 = vmul.f32 1.5, %v3212_v34  ;;  %v1448_v31 = vmul.f32 1.5, %v3214_v40 }
 0x284   : > { %4874 = vst [vmem:[#allocation11_spill] sm:$0xff] %v3308_v45  ;;  %4875 = vst [vmem:[#allocation12_spill] sm:$0xff] %v3310_v46  ;;  %v1449_v58 = vmul.f32 1.5, %v3216_v41  ;;  %v1450_v59 = vmul.f32 1.5, %v3218_v8  ;;  %v1451_v18 = vmul.f32 1.5, %v3220_v27  ;;  %v1452_v56 = vmul.f32 1.5, %v3222_v30 }
 0x285   : > { %4876 = vst [vmem:[#allocation13_spill] sm:$0xff] %v3312_v53  ;;  %4877 = vst [vmem:[#allocation14_spill] sm:$0xff] %v3314_v0  ;;  %v1453_v50 = vadd.f32 %v1445_v55, %v3276_v9  ;;  %v1454_v51 = vadd.f32 %v1446_v57, %v3278_v10  ;;  %v1455_v37 = vadd.f32 %v1447_v17, %v3280_v62  ;;  %v1477_v20 = vmul.f32 1.5, %v3228_v28 }
 0x286   : > { %v1456_v23 = vadd.f32 %v1448_v31, %v3282_v11  ;;  %v1457_v34 = vadd.f32 %v1449_v58, %v3284_v63  ;;  %v1458_v40 = vadd.f32 %v1450_v59, %v3286_v1  ;;  %v1459_v41 = vadd.f32 %v1451_v18, %v3288_v2 }
 0x287   : > { %v1460_v8 = vadd.f32 %v1452_v56, %v3290_v3  ;;  %v1461_v60 = vmax.f32 %v1453_v50, 0.0  ;;  %v1462_v27 = vmax.f32 %v1454_v51, 0.0  ;;  %v1463_v36 = vmax.f32 %v1455_v37, 0.0 }
 0x288   : > { %v1464_v30 = vmax.f32 %v1456_v23, 0.0  ;;  %v1465_v38 = vmax.f32 %v1457_v34, 0.0  ;;  %v1466_v39 = vmax.f32 %v1458_v40, 0.0  ;;  %v1467_v49 = vmax.f32 %v1459_v41, 0.0 }
 0x289   : > { %v1468_v61 = vmax.f32 %v1460_v8, 0.0  ;;  %v3332_v4 = vmin.f32 %v1461_v60, 1.0  ;;  %v3334_v5 = vmin.f32 %v1462_v27, 1.0  ;;  %v3336_v6 = vmin.f32 %v1463_v36, 1.0 }
 0x28a   : > { %v3338_v12 = vmin.f32 %v1464_v30, 1.0  ;;  %v3340_v13 = vmin.f32 %v1465_v38, 1.0  ;;  %v3342_v14 = vmin.f32 %v1466_v39, 1.0  ;;  %v3344_v15 = vmin.f32 %v1467_v49, 1.0 }
 0x28b   : > { %v3346_v16 = vmin.f32 %v1468_v61, 1.0  ;;  %v1478_v7 = vmul.f32 1.5, %v3230_v43  ;;  %v1479_v21 = vmul.f32 1.5, %v3232_v19  ;;  %v1480_v22 = vmul.f32 1.5, %v3234_v44 }
 0x28c   : > { %v1481_v24 = vmul.f32 1.5, %v3236_v26  ;;  %v1482_v25 = vmul.f32 1.5, %v3238_v47  ;;  %v1483_v29 = vmul.f32 1.5, %v3240_v48  ;;  %v1484_v35 = vmul.f32 1.5, %v3242_v54 }
 0x28d   : > { %v1485_v55 = vadd.f32 %v1477_v20, %v3276_v9  ;;  %v1486_v57 = vadd.f32 %v1478_v7, %v3278_v10  ;;  %v1487_v28 = vadd.f32 %v1479_v21, %v3280_v62  ;;  %v1488_v43 = vadd.f32 %v1480_v22, %v3282_v11 }
 0x28e   : > { %v1489_v19 = vadd.f32 %v1481_v24, %v3284_v63  ;;  %v1490_v44 = vadd.f32 %v1482_v25, %v3286_v1  ;;  %v1491_v26 = vadd.f32 %v1483_v29, %v3288_v2  ;;  %v1492_v47 = vadd.f32 %v1484_v35, %v3290_v3 }
 0x28f   : > { %v1493_v17 = vmax.f32 %v1485_v55, 0.0  ;;  %v1494_v48 = vmax.f32 %v1486_v57, 0.0  ;;  %v1495_v31 = vmax.f32 %v1487_v28, 0.0  ;;  %v1496_v54 = vmax.f32 %v1488_v43, 0.0 }
 0x290   : > { %v1497_v58 = vmax.f32 %v1489_v19, 0.0  ;;  %v1498_v9 = vmax.f32 %v1490_v44, 0.0  ;;  %v1499_v59 = vmax.f32 %v1491_v26, 0.0  ;;  %v1500_v10 = vmax.f32 %v1492_v47, 0.0 }
 0x291   : > { %v3364_v18 = vmin.f32 %v1493_v17, 1.0  ;;  %v3366_v62 = vmin.f32 %v1494_v48, 1.0  ;;  %v3368_v11 = vmin.f32 %v1495_v31, 1.0  ;;  %v3370_v63 = vmin.f32 %v1496_v54, 1.0 }
 0x292   : > { %v3372_v1 = vmin.f32 %v1497_v58, 1.0  ;;  %v3374_v2 = vmin.f32 %v1498_v9, 1.0  ;;  %v3376_v3 = vmin.f32 %v1499_v59, 1.0  ;;  %v3378_v56 = vmin.f32 %v1500_v10, 1.0 }
 0x293   : > { %v1509_v50 = vmax.f32 %v3300_v32, %v3332_v4  ;;  %v1510_v51 = vmax.f32 %v3302_v33, %v3334_v5  ;;  %v1511_v37 = vmax.f32 %v3304_v42, %v3336_v6  ;;  %v1512_v23 = vmax.f32 %v3306_v52, %v3338_v12 }
 0x294   : > { %v1513_v34 = vmax.f32 %v3308_v45, %v3340_v13  ;;  %v1514_v40 = vmax.f32 %v3310_v46, %v3342_v14  ;;  %v1515_v41 = vmax.f32 %v3312_v53, %v3344_v15  ;;  %v1516_v8 = vmax.f32 %v3314_v0, %v3346_v16 }
 0x295   : > { %v3397_v60 = vmax.f32 %v1509_v50, %v3364_v18  ;;  %v3400_v27 = vmax.f32 %v1510_v51, %v3366_v62  ;;  %v3403_v36 = vmax.f32 %v1511_v37, %v3368_v11  ;;  %v3406_v30 = vmax.f32 %v1512_v23, %v3370_v63 }
 0x296   : > { %v3409_v38 = vmax.f32 %v1513_v34, %v3372_v1  ;;  %v3412_v39 = vmax.f32 %v1514_v40, %v3374_v2  ;;  %v3415_v49 = vmax.f32 %v1515_v41, %v3376_v3  ;;  %v3418_v61 = vmax.f32 %v1516_v8, %v3378_v56 }
 0x297   : > { %v1525_v20 = vmin.f32 %v3300_v32, %v3332_v4  ;;  %v1526_v7 = vmin.f32 %v3302_v33, %v3334_v5  ;;  %v1527_v21 = vmin.f32 %v3304_v42, %v3336_v6  ;;  %v1528_v22 = vmin.f32 %v3306_v52, %v3338_v12 }
 0x298   : > { %v1529_v24 = vmin.f32 %v3308_v45, %v3340_v13  ;;  %v1530_v25 = vmin.f32 %v3310_v46, %v3342_v14  ;;  %v1531_v29 = vmin.f32 %v3312_v53, %v3344_v15  ;;  %v1532_v35 = vmin.f32 %v3314_v0, %v3346_v16 }
 0x299   : > { %v1533_v55 = vmin.f32 %v1525_v20, %v3364_v18  ;;  %v1534_v57 = vmin.f32 %v1526_v7, %v3366_v62  ;;  %v1535_v28 = vmin.f32 %v1527_v21, %v3368_v11  ;;  %v1536_v43 = vmin.f32 %v1528_v22, %v3370_v63 }
 0x29a   : > { %v1537_v19 = vmin.f32 %v1529_v24, %v3372_v1  ;;  %v1538_v44 = vmin.f32 %v1530_v25, %v3374_v2  ;;  %v1539_v26 = vmin.f32 %v1531_v29, %v3376_v3  ;;  %v1540_v47 = vmin.f32 %v1532_v35, %v3378_v56 }
 0x29b   : > { %v3445_v17 = vsub.f32 %v3397_v60, %v1533_v55  ;;  %v3448_v48 = vsub.f32 %v3400_v27, %v1534_v57  ;;  %v3451_v31 = vsub.f32 %v3403_v36, %v1535_v28  ;;  %vm4827_vm0 = vcmp.gt.f32.partialorder %v3397_v60, 0.0 }
 0x29c   : > { %v3455_v54 = vsub.f32 %v3406_v30, %v1536_v43  ;;  %vm4826_vm1 = vcmp.gt.f32.partialorder %v3400_v27, 0.0  ;;  %v3459_v58 = vsub.f32 %v3409_v38, %v1537_v19  ;;  %v3463_v9 = vsub.f32 %v3412_v39, %v1538_v44 }
 0x29d   : > { %4878 = vst [vmem:[#allocation15_spill] sm:$0xff] %v3445_v17  ;;  %4879 = vst [vmem:[#allocation16_spill] sm:$0xff] %v3448_v48  ;;  %vm4835_vm2 = vcmp.gt.f32.partialorder %v3445_v17, 0.0  ;;  %v1557_v59 = vsel %vm4827_vm0, %v3397_v60, 1.0  ;;  %vm4834_vm3 = vcmp.gt.f32.partialorder %v3448_v48, 0.0  ;;  %v3470_v10 = vsub.f32 %v3415_v49, %v1539_v26 }
 0x29e   : > { %4880 = vst [vmem:[#allocation17_spill] sm:$0xff] %v3451_v31  ;;  %4881 = vst [vmem:[#allocation18_spill] sm:$0xff] %v3455_v54  ;;  %v1558_v50 = vsel %vm4826_vm1, %v3400_v27, 1.0  ;;  %vm4833_vm4 = vcmp.gt.f32.partialorder %v3451_v31, 0.0  ;;  %v3477_v51 = vsub.f32 %v3418_v61, %v1540_v47  ;;  %vm4832_vm5 = vcmp.gt.f32.partialorder %v3455_v54, 0.0 }
 0x29f   : > { %4882 = vst [vmem:[#allocation19_spill] sm:$0xff] %v3459_v58  ;;  %4883 = vst [vmem:[#allocation20_spill] sm:$0xff] %v3463_v9  ;;  %v1597_v37 = vsel %vm4835_vm2, %v3445_v17, 1.0  ;;  %2758 = vrcp.f32 %v1557_v59  ;;  %vm4831_vm6 = vcmp.gt.f32.partialorder %v3459_v58, 0.0  ;;  %v1598_v23 = vsel %vm4834_vm3, %v3448_v48, 1.0 }
 0x2a0   : > { %4884 = vst [vmem:[#allocation21_spill] sm:$0xff] %v3470_v10  ;;  %4885 = vst [vmem:[#allocation22_spill] sm:$0xff] %v3477_v51  ;;  %vm4825_vm7 = vcmp.gt.f32.partialorder %v3403_v36, 0.0  ;;  %2760 = vrcp.f32 %v1558_v50  ;;  %vm4830_vm8 = vcmp.gt.f32.partialorder %v3463_v9, 0.0  ;;  %v1599_v34 = vsel %vm4833_vm4, %v3451_v31, 1.0 }
 0x2a1   : > { %vm4823_vm9 = vcmp.gt.f32.partialorder %v3406_v30, 0.0  ;;  %vm4829_vm10 = vcmp.gt.f32.partialorder %v3470_v10, 0.0  ;;  %v1600_v40 = vsel %vm4832_vm5, %v3455_v54, 1.0  ;;  %2762 = vrcp.f32 %v1597_v37 }
 0x2a2   : > { %vm4821_vm11 = vcmp.gt.f32.partialorder %v3409_v38, 0.0  ;;  %vm4828_vm12 = vcmp.gt.f32.partialorder %v3477_v51, 0.0  ;;  %v1601_v41 = vsel %vm4831_vm6, %v3459_v58, 1.0  ;;  %2764 = vrcp.f32 %v1598_v23 }
 0x2a3   : > { %vm4820_vm13 = vcmp.gt.f32.partialorder %v3412_v39, 0.0  ;;  %v1602_v8 = vsel %vm4830_vm8, %v3463_v9, 1.0  ;;  %2766 = vrcp.f32 %v1599_v34  ;;  %v3509_v20 = vsel %vm4825_vm7, %v3403_v36, 1.0 }
 0x2a4   : > { %v1603_v7 = vsel %vm4829_vm10, %v3470_v10, 1.0  ;;  %2768 = vrcp.f32 %v1600_v40  ;;  %v3517_v21 = vsel %vm4823_vm9, %v3406_v30, 1.0  ;;  %v3522_v22 = vsel %vm4821_vm11, %v3409_v38, 1.0 }
 0x2a5   : > { %4886 = vst [vmem:[#allocation23_spill] sm:$0xff] %v3522_v22  ;;  %v1604_v24 = vsel %vm4828_vm12, %v3477_v51, 1.0  ;;  %2770 = vrcp.f32 %v1601_v41  ;;  %v3530_v25 = vsel %vm4820_vm13, %v3412_v39, 1.0  ;;  %v1613_v29 = vsub.f32 %v3397_v60, %v3300_v32 }
 0x2a6   : > { %4887 = vst [vmem:[#allocation24_spill] sm:$0xff] %v3530_v25  ;;  %2772 = vrcp.f32 %v1602_v8  ;;  %v1614_v35 = vsub.f32 %v3400_v27, %v3302_v33  ;;  %v1615_v55 = vsub.f32 %v3403_v36, %v3304_v42  ;;  %v1616_v57 = vsub.f32 %v3406_v30, %v3306_v52 }
 0x2a7   : > { %2774 = vrcp.f32 %v1603_v7  ;;  %v1617_v28 = vsub.f32 %v3409_v38, %v3308_v45  ;;  %v1618_v43 = vsub.f32 %v3412_v39, %v3310_v46  ;;  %v1619_v19 = vsub.f32 %v3415_v49, %v3312_v53 }
 0x2a8   : > { %2776 = vrcp.f32 %v1604_v24  ;;  %v1620_v44 = vsub.f32 %v3418_v61, %v3314_v0  ;;  %v1629_v47 = vsub.f32 %v3397_v60, %v3332_v4  ;;  %v1630_v59 = vsub.f32 %v3400_v27, %v3334_v5 }
 0x2a9   : > { %v3548_v26 = vpop.eup %2758  ;;  %v1631_v50 = vsub.f32 %v3403_v36, %v3336_v6  ;;  %v1632_v37 = vsub.f32 %v3406_v30, %v3338_v12  ;;  %vm4822_vm14 = vcmp.gt.f32.partialorder %v3415_v49, 0.0  ;;  %vm4824_vm15 = vcmp.gt.f32.partialorder %v3418_v61, 0.0 }
 0x2aa   : > { %4888 = vst [vmem:[#allocation25_spill] sm:$0xff] %v3548_v26  ;;  %v3558_v23 = vpop.eup %2760  ;;  %v1633_v34 = vsub.f32 %v3409_v38, %v3340_v13  ;;  %v1634_v40 = vsub.f32 %v3412_v39, %v3342_v14  ;;  %v1635_v41 = vsub.f32 %v3415_v49, %v3344_v15  ;;  %v1645_v8 = vsub.f32 %v3397_v60, %v3364_v18 }
 0x2ab   : > { %4889 = vst [vmem:[#allocation26_spill] sm:$0xff] %v3558_v23  ;;  %v2763_v7 = vpop.eup %2762  ;;  %v1636_v24 = vsub.f32 %v3418_v61, %v3346_v16  ;;  %v1646_v23 = vsub.f32 %v3400_v27, %v3366_v62  ;;  %v1647_v26 = vsub.f32 %v3403_v36, %v3368_v11  ;;  %v1648_v25 = vsub.f32 %v3406_v30, %v3370_v63 }
 0x2ac   : > { %v2765_v22 = vpop.eup %2764  ;;  %v3578_v51 = vmul.f32 %v2763_v7, %v1613_v29  ;;  %v3580_v10 = vmul.f32 %v2763_v7, %v1629_v47  ;;  %v1649_v18 = vsub.f32 %v3409_v38, %v3372_v1  ;;  %v3584_v9 = vmul.f32 %v2763_v7, %v1645_v8 }
 0x2ad   : > { %v2767_v58 = vpop.eup %2766  ;;  %v3586_v54 = vmul.f32 %v2765_v22, %v1614_v35  ;;  %v3588_v62 = vmul.f32 %v2765_v22, %v1630_v59  ;;  %v1650_v11 = vsub.f32 %v3412_v39, %v3374_v2  ;;  %v3592_v31 = vmul.f32 %v2765_v22, %v1646_v23 }
 0x2ae   : > { %v2769_v63 = vpop.eup %2768  ;;  %v3594_v29 = vmul.f32 %v2767_v58, %v1615_v55  ;;  %v3596_v47 = vmul.f32 %v2767_v58, %v1631_v50  ;;  %v1651_v1 = vsub.f32 %v3415_v49, %v3376_v3  ;;  %v3600_v8 = vmul.f32 %v2767_v58, %v1647_v26 }
 0x2af   : > { %v2771_v7 = vpop.eup %2770  ;;  %v3602_v35 = vmul.f32 %v2769_v63, %v1616_v57  ;;  %v3604_v59 = vmul.f32 %v2769_v63, %v1632_v37  ;;  %v1652_v2 = vsub.f32 %v3418_v61, %v3378_v56  ;;  %v3608_v22 = vmul.f32 %v2769_v63, %v1648_v25 }
 0x2b0   : > { %v2773_v23 = vpop.eup %2772  ;;  %v3610_v55 = vmul.f32 %v2771_v7, %v1617_v28  ;;  %v3612_v50 = vmul.f32 %v2771_v7, %v1633_v34  ;;  %v3614_v48 = vmul.f32 %v2771_v7, %v1649_v18  ;;  %2778 = vrcp.f32 %v3509_v20 }
 0x2b1   : > { %v2775_v58 = vpop.eup %2774  ;;  %v3618_v57 = vmul.f32 %v2773_v23, %v1618_v43  ;;  %v3620_v26 = vmul.f32 %v2773_v23, %v1634_v40  ;;  %v3622_v37 = vmul.f32 %v2773_v23, %v1650_v11  ;;  %2780 = vrcp.f32 %v3517_v21 }
 0x2b2   : > { %4890 = vst [vmem:[#allocation27_spill] sm:$0xff] %v3612_v50  ;;  %v2777_v25 = vpop.eup %2776  ;;  %v3626_v28 = vmul.f32 %v2775_v58, %v1619_v19  ;;  %v3628_v34 = vmul.f32 %v2775_v58, %v1635_v41  ;;  %v3630_v18 = vmul.f32 %v2775_v58, %v1651_v1  ;;  %vm1677_vm13 = vcmp.eq.f32.partialorder %v3397_v60, %v3332_v4 }
 0x2b3   : > { %4891 = vst [vmem:[#allocation28_spill] sm:$0xff] %v3620_v26  ;;  %4892 = vst [vmem:[#allocation29_spill] sm:$0xff] %v3622_v37  ;;  %v3634_v7 = vmul.f32 %v2777_v25, %v1620_v44  ;;  %v3636_v43 = vmul.f32 %v2777_v25, %v1636_v24  ;;  %v3638_v40 = vmul.f32 %v2777_v25, %v1652_v2  ;;  %v3652_v44 = vsel %vm4822_vm14, %v3415_v49, 1.0 }
 0x2b4   : > { %4893 = vst [vmem:[#allocation30_spill] sm:$0xff] %v3628_v34  ;;  %4894 = vst [vmem:[#allocation31_spill] sm:$0xff] %v3630_v18  ;;  %v3657_v24 = vsel %vm4824_vm15, %v3418_v61, 1.0  ;;  %vm1678_vm11 = vcmp.eq.f32.partialorder %v3400_v27, %v3334_v5  ;;  %vm1679_vm14 = vcmp.eq.f32.partialorder %v3403_v36, %v3336_v6  ;;  %vm1680_vm9 = vcmp.eq.f32.partialorder %v3406_v30, %v3338_v12 }
 0x2b5   : > { %4895 = vst [vmem:[#allocation32_spill] sm:$0xff] %v3638_v40  ;;  %4896 = vst [vmem:[#allocation33_spill] sm:$0xff] %v3652_v44  ;;  %vm1681_vm15 = vcmp.eq.f32.partialorder %v3409_v38, %v3340_v13  ;;  %vm1682_vm7 = vcmp.eq.f32.partialorder %v3412_v39, %v3342_v14  ;;  %vm1683_vm1 = vcmp.eq.f32.partialorder %v3415_v49, %v3344_v15  ;;  %v1685_v21 = vadd.f32 2.0, %v3578_v51 }
 0x2b6   : > { %4897 = vst [vmem:[#allocation34_spill] sm:$0xff] %v3657_v24  ;;  %vm1684_vm0 = vcmp.eq.f32.partialorder %v3418_v61, %v3346_v16  ;;  %v1686_v2 = vadd.f32 2.0, %v3586_v54  ;;  %v1687_v23 = vadd.f32 2.0, %v3594_v29  ;;  %v1688_v58 = vadd.f32 2.0, %v3602_v35 }
 0x2b7   : > { %vm1661_vm12 = vcmp.eq.f32.partialorder %v3397_v60, %v3300_v32  ;;  %vm1662_vm10 = vcmp.eq.f32.partialorder %v3400_v27, %v3302_v33  ;;  %vm1663_vm8 = vcmp.eq.f32.partialorder %v3403_v36, %v3304_v42  ;;  %vm1664_vm6 = vcmp.eq.f32.partialorder %v3406_v30, %v3306_v52 }
 0x2b8   : > { %v1689_v25 = vadd.f32 2.0, %v3610_v55  ;;  %v1690_v20 = vadd.f32 2.0, %v3618_v57  ;;  %v1691_v1 = vadd.f32 2.0, %v3626_v28  ;;  %v1692_v41 = vadd.f32 2.0, %v3634_v7 }
 0x2b9   : > { %vm1665_vm5 = vcmp.eq.f32.partialorder %v3409_v38, %v3308_v45  ;;  %vm1666_vm4 = vcmp.eq.f32.partialorder %v3412_v39, %v3310_v46  ;;  %vm1667_vm3 = vcmp.eq.f32.partialorder %v3415_v49, %v3312_v53  ;;  %vm1668_vm2 = vcmp.eq.f32.partialorder %v3418_v61, %v3314_v0 }
 0x2ba   : > { %v1693_v19 = vsub.f32 %v1685_v21, %v3584_v9  ;;  %v1694_v11 = vsub.f32 %v1686_v2, %v3592_v31  ;;  %v1695_v63 = vsub.f32 %v1687_v23, %v3600_v8  ;;  %v1696_v56 = vsub.f32 %v1688_v58, %v3608_v22  ;;  %v3722_v46 = vpop.eup %2778 }
 0x2bb   : > { %v1697_v3 = vsub.f32 %v1689_v25, %v3614_v48  ;;  %v1698_v24 = vsub.f32 %v1690_v20, %v3622_v37  ;;  %v1699_v44 = vsub.f32 %v1691_v1, %v3630_v18  ;;  %v1700_v17 = vsub.f32 %v1692_v41, %v3638_v40 }
 0x2bc   : > { %v1701_v53 = vadd.f32 4.0, %v3580_v10  ;;  %v1702_v0 = vadd.f32 4.0, %v3588_v62  ;;  %v1703_v21 = vadd.f32 4.0, %v3596_v47  ;;  %v1704_v2 = vadd.f32 4.0, %v3604_v59 }
 0x2bd   : > { %v1705_v23 = vadd.f32 4.0, %v3612_v50  ;;  %v1706_v58 = vadd.f32 4.0, %v3620_v26  ;;  %v1707_v25 = vadd.f32 4.0, %v3628_v34  ;;  %v1708_v20 = vadd.f32 4.0, %v3636_v43  ;;  %v3728_v50 = vpop.eup %2780 }
 0x2be   : > { %v1709_v1 = vsub.f32 %v1701_v53, %v3578_v51  ;;  %v1710_v41 = vsub.f32 %v1702_v0, %v3586_v54  ;;  %v1711_v40 = vsub.f32 %v1703_v21, %v3594_v29  ;;  %v1712_v18 = vsub.f32 %v1704_v2, %v3602_v35  ;;  %v4928_v21 = vld [vmem:[#allocation21_spill] sm:$0xff] }
 0x2bf   : > { %v1713_v37 = vsub.f32 %v1705_v23, %v3610_v55  ;;  %v1714_v45 = vsub.f32 %v1706_v58, %v3618_v57  ;;  %v1715_v26 = vsub.f32 %v1707_v25, %v3626_v28  ;;  %v1716_v34 = vsub.f32 %v1708_v20, %v3634_v7  ;;  %v4909_v55 = vld [vmem:[#allocation31_spill] sm:$0xff]  ;;  %v4913_v57 = vld [vmem:[#allocation32_spill] sm:$0xff]  ;;  %v4930_v23 = vld [vmem:[#allocation22_spill] sm:$0xff] }
 0x2c0   : > { %v1717_v53 = vsel %vm1677_vm13, %v1693_v19, %v1709_v1  ;;  %v1718_v0 = vsel %vm1678_vm11, %v1694_v11, %v1710_v41  ;;  %v1719_v54 = vsel %vm1679_vm14, %v1695_v63, %v1711_v40  ;;  %v1720_v51 = vsel %vm1680_vm9, %v1696_v56, %v1712_v18  ;;  %v4916_v56 = vld [vmem:[#allocation15_spill] sm:$0xff]  ;;  %v4920_v63 = vld [vmem:[#allocation17_spill] sm:$0xff]  ;;  %v4922_v40 = vld [vmem:[#allocation18_spill] sm:$0xff] }
 0x2c1   : > { %v1721_v29 = vsel %vm1681_vm15, %v1697_v3, %v1713_v37  ;;  %v1722_v4 = vsel %vm1682_vm7, %v1698_v24, %v1714_v45  ;;  %v1723_v5 = vsel %vm1683_vm1, %v1699_v44, %v1715_v26  ;;  %v1724_v6 = vsel %vm1684_vm0, %v1700_v17, %v1716_v34  ;;  %v4902_v17 = vld [vmem:[#allocation27_spill] sm:$0xff]  ;;  %v4918_v34 = vld [vmem:[#allocation16_spill] sm:$0xff] }
 0x2c2   : > { %v4898_v12 = vsub.f32 %v3584_v9, %v3580_v10  ;;  %v4899_v35 = vsub.f32 %v3592_v31, %v3588_v62  ;;  %v4900_v14 = vsub.f32 %v3600_v8, %v3596_v47  ;;  %v4901_v16 = vsub.f32 %v3608_v22, %v3604_v59  ;;  %v4905_v10 = vld [vmem:[#allocation29_spill] sm:$0xff]  ;;  %v4906_v62 = vld [vmem:[#allocation28_spill] sm:$0xff]  ;;  %v4910_v59 = vld [vmem:[#allocation30_spill] sm:$0xff] }
 0x2c3   : > { %v4903_v31 = vsub.f32 %v3614_v48, %v4902_v17  ;;  %v4907_v47 = vsub.f32 %v4905_v10, %v4906_v62  ;;  %v4911_v22 = vsub.f32 %v4909_v55, %v4910_v59  ;;  %v4914_v48 = vsub.f32 %v4913_v57, %v3636_v43  ;;  %v4924_v19 = vld [vmem:[#allocation19_spill] sm:$0xff]  ;;  %v4926_v43 = vld [vmem:[#allocation20_spill] sm:$0xff] }
 0x2c4   : > { %v1725_v13 = vsel %vm1661_vm12, %v4898_v12, %v1717_v53  ;;  %v1726_v45 = vsel %vm1662_vm10, %v4899_v35, %v1718_v0  ;;  %v1727_v15 = vsel %vm1663_vm8, %v4900_v14, %v1719_v54  ;;  %v1728_v32 = vsel %vm1664_vm6, %v4901_v16, %v1720_v51  ;;  %v4932_v25 = vld [vmem:[#allocation23_spill] sm:$0xff]  ;;  %v4933_v53 = vld [vmem:[#allocation24_spill] sm:$0xff] }
 0x2c5   : > { %v1729_v9 = vsel %vm1665_vm5, %v4903_v31, %v1721_v29  ;;  %v1730_v8 = vsel %vm1666_vm4, %v4907_v47, %v1722_v4  ;;  %v1731_v3 = vsel %vm1667_vm3, %v4911_v22, %v1723_v5  ;;  %v1732_v37 = vsel %vm1668_vm2, %v4914_v48, %v1724_v6  ;;  %v4934_v29 = vld [vmem:[#allocation33_spill] sm:$0xff] }
 0x2c6   : > { %vm4917_vm0 = vcmp.gt.f32.partialorder %v4916_v56, 0.0  ;;  %vm4919_vm1 = vcmp.gt.f32.partialorder %v4918_v34, 0.0  ;;  %vm4921_vm4 = vcmp.gt.f32.partialorder %v4920_v63, 0.0  ;;  %vm4923_vm5 = vcmp.gt.f32.partialorder %v4922_v40, 0.0 }
 0x2c7   : > { %v1733_v28 = vsel %vm4917_vm0, %v1725_v13, 0.0  ;;  %v1734_v18 = vsel %vm4919_vm1, %v1726_v45, 0.0  ;;  %v1735_v7 = vsel %vm4921_vm4, %v1727_v15, 0.0  ;;  %v1736_v11 = vsel %vm4923_vm5, %v1728_v32, 0.0 }
 0x2c8   : > { %vm4925_vm3 = vcmp.gt.f32.partialorder %v4924_v19, 0.0  ;;  %vm4927_vm6 = vcmp.gt.f32.partialorder %v4926_v43, 0.0  ;;  %vm4929_vm2 = vcmp.gt.f32.partialorder %v4928_v21, 0.0  ;;  %vm4931_vm7 = vcmp.gt.f32.partialorder %v4930_v23, 0.0 }
 0x2c9   : > { %v1737_v44 = vsel %vm4925_vm3, %v1729_v9, 0.0  ;;  %v1738_v24 = vsel %vm4927_vm6, %v1730_v8, 0.0  ;;  %v1739_v2 = vsel %vm4929_vm2, %v1731_v3, 0.0  ;;  %v1740_v58 = vsel %vm4931_vm7, %v1732_v37, 0.0 }
 0x2ca   : > { %2782 = vrcp.f32 %v4932_v25  ;;  %v1742_v20 = vmul.f32 0.16666667, %v1733_v28  ;;  %v1743_v1 = vmul.f32 0.16666667, %v1734_v18  ;;  %v1744_v41 = vmul.f32 0.16666667, %v1735_v7 }
 0x2cb   : > { %2784 = vrcp.f32 %v4933_v53  ;;  %v1745_v0 = vmul.f32 0.16666667, %v1736_v11  ;;  %v1746_v54 = vmul.f32 0.16666667, %v1737_v44  ;;  %v3820_v51 = vmul.f32 0.16666667, %v1738_v24 }
 0x2cc   : > { %2786 = vrcp.f32 %v4934_v29  ;;  %v3823_v4 = vmul.f32 0.16666667, %v1739_v2  ;;  %v3825_v5 = vmul.f32 0.16666667, %v1740_v58  ;;  %v1750_v6 = vand.u32 2147483647, %v1742_v20 }
 0x2cd   : > { %v1758_v12 = vand.u32 2147483648, %v1742_v20  ;;  %v1760_v13 = vand.u32 2147483647, %v1743_v1  ;;  %v1768_v35 = vand.u32 2147483648, %v1743_v1  ;;  %v1770_v45 = vand.u32 2147483647, %v1744_v41 }
 0x2ce   : > { %v1753_v14 = vfloor.f32 %v1750_v6  ;;  %v1778_v15 = vand.u32 2147483648, %v1744_v41  ;;  %v1780_v16 = vand.u32 2147483647, %v1745_v0  ;;  %v1788_v32 = vand.u32 2147483648, %v1745_v0 }
 0x2cf   : > { %v1763_v17 = vfloor.f32 %v1760_v13  ;;  %v1773_v31 = vfloor.f32 %v1770_v45  ;;  %v1790_v33 = vand.u32 2147483647, %v1746_v54  ;;  %v1798_v9 = vand.u32 2147483648, %v1746_v54 }
 0x2d0   : > { %v1754_v10 = vsub.f32 %v1750_v6, %v1753_v14  ;;  %v1783_v62 = vfloor.f32 %v1780_v16  ;;  %v1800_v47 = vand.u32 2147483647, %v3820_v51  ;;  %v1808_v42 = vand.u32 2147483648, %v3820_v51 }
 0x2d1   : > { %v1764_v8 = vsub.f32 %v1760_v13, %v1763_v17  ;;  %v1774_v55 = vsub.f32 %v1770_v45, %v1773_v31  ;;  %v1793_v59 = vfloor.f32 %v1790_v33  ;;  %v1810_v22 = vand.u32 2147483647, %v3823_v4 }
 0x2d2   : > { %vm1755_vm8 = vcmp.eq.f32.partialorder %v1754_v10, 1.0  ;;  %v1784_v52 = vsub.f32 %v1780_v16, %v1783_v62  ;;  %v1803_v3 = vfloor.f32 %v1800_v47  ;;  %v1818_v57 = vand.u32 2147483648, %v3823_v4 }
 0x2d3   : > { %v1756_v48 = vsel %vm1755_vm8, 0.0, %v1754_v10  ;;  %vm1765_vm9 = vcmp.eq.f32.partialorder %v1764_v8, 1.0  ;;  %vm1775_vm10 = vcmp.eq.f32.partialorder %v1774_v55, 1.0  ;;  %v1794_v26 = vsub.f32 %v1790_v33, %v1793_v59 }
 0x2d4   : > { %v3831_v37 = vpop.eup %2782  ;;  %v1757_v28 = vand.u32 2147483647, %v1756_v48  ;;  %v1766_v18 = vsel %vm1765_vm9, 0.0, %v1764_v8  ;;  %v1776_v7 = vsel %vm1775_vm10, 0.0, %v1774_v55  ;;  %vm1785_vm11 = vcmp.eq.f32.partialorder %v1784_v52, 1.0 }
 0x2d5   : > { %v3833_v11 = vpop.eup %2784  ;;  %v1767_v44 = vand.u32 2147483647, %v1766_v18  ;;  %v1777_v24 = vand.u32 2147483647, %v1776_v7  ;;  %v1786_v2 = vsel %vm1785_vm11, 0.0, %v1784_v52  ;;  %vm1795_vm12 = vcmp.eq.f32.partialorder %v1794_v26, 1.0 }
 0x2d6   : > { %v3835_v58 = vpop.eup %2786  ;;  %v3837_v25 = vor.u32 %v1758_v12, %v1757_v28  ;;  %v1787_v20 = vand.u32 2147483647, %v1786_v2  ;;  %v1796_v1 = vsel %vm1795_vm12, 0.0, %v1794_v26  ;;  %v1804_v41 = vsub.f32 %v1800_v47, %v1803_v3 }
 0x2d7   : > { %v1769_v53 = vor.u32 %v1768_v35, %v1767_v44  ;;  %v3839_v0 = vor.u32 %v1778_v15, %v1777_v24  ;;  %v1797_v54 = vand.u32 2147483647, %v1796_v1  ;;  %v1813_v51 = vfloor.f32 %v1810_v22 }
 0x2d8   : > { %v1789_v29 = vor.u32 %v1788_v32, %v1787_v20  ;;  %vm1805_vm13 = vcmp.eq.f32.partialorder %v1804_v41, 1.0  ;;  %v1820_v4 = vand.u32 2147483647, %v3825_v5  ;;  %v1828_v6 = vand.u32 2147483648, %v3825_v5 }
 0x2d9   : > { %v1799_v13 = vor.u32 %v1798_v9, %v1797_v54  ;;  %v1806_v45 = vsel %vm1805_vm13, 0.0, %v1804_v41  ;;  %v1814_v14 = vsub.f32 %v1810_v22, %v1813_v51  ;;  %vm1830_vm14 = vcmp.ne.f32.partialorder %v3837_v25, 0.0  ;;  %v4949_v54 = vld [vmem:[#allocation34_spill] sm:$0xff] }
 0x2da   : > { %v1807_v12 = vand.u32 2147483647, %v1806_v45  ;;  %v1823_v16 = vfloor.f32 %v1820_v4  ;;  %vm1831_vm15 = vcmp.ne.f32.partialorder %v1769_v53, 0.0  ;;  %vm1832_vm0 = vcmp.ne.f32.partialorder %v3839_v0, 0.0 }
 0x2db   : > { %vm1815_vm1 = vcmp.eq.f32.partialorder %v1814_v14, 1.0  ;;  %vm1833_vm4 = vcmp.ne.f32.partialorder %v1789_v29, 0.0  ;;  %vm1834_vm5 = vcmp.ne.f32.partialorder %v1799_v13, 0.0  ;;  %vm1838_vm3 = vcmp.lt.f32.partialorder %v3837_v25, 0.0 }
 0x2dc   : > { %v1809_v35 = vor.u32 %v1808_v42, %v1807_v12  ;;  %v1816_v15 = vsel %vm1815_vm1, 0.0, %v1814_v14  ;;  %v1824_v32 = vsub.f32 %v1820_v4, %v1823_v16  ;;  %vm1839_vm6 = vcmp.lt.f32.partialorder %v1769_v53, 0.0  ;;  %vm3846_vm2 = vmand %vm1838_vm3, %vm1830_vm14 }
 0x2dd   : > { %v1817_v17 = vand.u32 2147483647, %v1816_v15  ;;  %vm1840_vm7 = vcmp.lt.f32.partialorder %v3839_v0, 0.0  ;;  %vm1841_vm8 = vcmp.lt.f32.partialorder %v1789_v29, 0.0  ;;  %vm1842_vm9 = vcmp.lt.f32.partialorder %v1799_v13, 0.0  ;;  %vm3852_vm10 = vmand %vm1839_vm6, %vm1831_vm15 }
 0x2de   : > { %vm1825_vm11 = vcmp.eq.f32.partialorder %v1824_v32, 1.0  ;;  %vm1835_vm12 = vcmp.ne.f32.partialorder %v1809_v35, 0.0  ;;  %vm1843_vm13 = vcmp.lt.f32.partialorder %v1809_v35, 0.0  ;;  %vm3858_vm1 = vmand %vm1840_vm7, %vm1832_vm0  ;;  %v1854_v9 = vadd.f32 1.0, %v3837_v25 }
 0x2df   : > { %v1819_v10 = vor.u32 %v1818_v57, %v1817_v17  ;;  %v1826_v62 = vsel %vm1825_vm11, 0.0, %v1824_v32  ;;  %vm3864_vm14 = vmand %vm1841_vm8, %vm1833_vm4  ;;  %v1855_v42 = vadd.f32 1.0, %v1769_v53  ;;  %v1856_v8 = vadd.f32 1.0, %v3839_v0 }
 0x2e0   : > { %v1827_v55 = vand.u32 2147483647, %v1826_v62  ;;  %vm3870_vm15 = vmand %vm1842_vm9, %vm1834_vm5  ;;  %v1857_v22 = vadd.f32 1.0, %v1789_v29  ;;  %v1858_v52 = vadd.f32 1.0, %v1799_v13  ;;  %v1859_v3 = vadd.f32 1.0, %v1809_v35 }
 0x2e1   : > { %vm1836_vm0 = vcmp.ne.f32.partialorder %v1819_v10, 0.0  ;;  %vm1844_vm3 = vcmp.lt.f32.partialorder %v1819_v10, 0.0  ;;  %vm3876_vm4 = vmand %vm1843_vm13, %vm1835_vm12  ;;  %v1860_v48 = vadd.f32 1.0, %v1819_v10  ;;  %v1862_v26 = vsel %vm3846_vm2, %v1854_v9, %v3837_v25 }
 0x2e2   : > { %v1829_v28 = vor.u32 %v1828_v6, %v1827_v55  ;;  %vm3883_vm5 = vmand %vm1844_vm3, %vm1836_vm0  ;;  %v1863_v7 = vsel %vm3852_vm10, %v1855_v42, %v1769_v53  ;;  %v1864_v44 = vsel %vm3858_vm1, %v1856_v8, %v3839_v0  ;;  %v1865_v24 = vsel %vm3864_vm14, %v1857_v22, %v1789_v29 }
 0x2e3   : > { %v1866_v2 = vsel %vm3870_vm15, %v1858_v52, %v1799_v13  ;;  %v1867_v25 = vsel %vm3876_vm4, %v1859_v3, %v1809_v35  ;;  %v1868_v20 = vsel %vm3883_vm5, %v1860_v48, %v1819_v10  ;;  %v1870_v1 = vadd.f32 0.1, %v1862_v26 }
 0x2e4   : > { %vm1837_vm6 = vcmp.ne.f32.partialorder %v1829_v28, 0.0  ;;  %vm1845_vm2 = vcmp.lt.f32.partialorder %v1829_v28, 0.0  ;;  %v1861_v41 = vadd.f32 1.0, %v1829_v28  ;;  %v1871_v53 = vadd.f32 0.1, %v1863_v7 }
 0x2e5   : > { %2788 = vrcp.f32 %v4949_v54  ;;  %vm1853_vm7 = vmand %vm1845_vm2, %vm1837_vm6  ;;  %v1872_v0 = vadd.f32 0.1, %v1864_v44  ;;  %v1873_v51 = vadd.f32 0.1, %v1865_v24  ;;  %v1874_v29 = vadd.f32 0.1, %v1866_v2 }
 0x2e6   : > { %v1869_v4 = vsel %vm1853_vm7, %v1861_v41, %v1829_v28  ;;  %v3901_v6 = vadd.f32 0.1, %v1867_v25  ;;  %v3903_v13 = vadd.f32 0.1, %v1868_v20  ;;  %v1878_v45 = vand.u32 2147483647, %v1870_v1 }
 0x2e7   : > { %v3905_v14 = vadd.f32 0.1, %v1869_v4  ;;  %v1886_v12 = vand.u32 2147483648, %v1870_v1  ;;  %v1888_v16 = vand.u32 2147483647, %v1871_v53  ;;  %v1896_v35 = vand.u32 2147483648, %v1871_v53 }
 0x2e8   : > { %v1881_v15 = vfloor.f32 %v1878_v45  ;;  %v1898_v32 = vand.u32 2147483647, %v1872_v0  ;;  %v1906_v5 = vand.u32 2147483648, %v1872_v0  ;;  %v1908_v17 = vand.u32 2147483647, %v1873_v51 }
 0x2e9   : > { %v1891_v31 = vfloor.f32 %v1888_v16  ;;  %v1916_v33 = vand.u32 2147483648, %v1873_v51  ;;  %v1918_v9 = vand.u32 2147483647, %v1874_v29  ;;  %v1926_v10 = vand.u32 2147483648, %v1874_v29 }
 0x2ea   : > { %v1882_v62 = vsub.f32 %v1878_v45, %v1881_v15  ;;  %v1901_v47 = vfloor.f32 %v1898_v32  ;;  %v1911_v42 = vfloor.f32 %v1908_v17  ;;  %v1928_v8 = vand.u32 2147483647, %v3901_v6 }
 0x2eb   : > { %v1892_v55 = vsub.f32 %v1888_v16, %v1891_v31  ;;  %v1921_v59 = vfloor.f32 %v1918_v9  ;;  %v1936_v22 = vand.u32 2147483648, %v3901_v6  ;;  %v1938_v52 = vand.u32 2147483647, %v3903_v13 }
 0x2ec   : > { %vm1883_vm8 = vcmp.eq.f32.partialorder %v1882_v62, 1.0  ;;  %v1902_v3 = vsub.f32 %v1898_v32, %v1901_v47  ;;  %v1912_v57 = vsub.f32 %v1908_v17, %v1911_v42  ;;  %v1931_v48 = vfloor.f32 %v1928_v8 }
 0x2ed   : > { %v1884_v26 = vsel %vm1883_vm8, 0.0, %v1882_v62  ;;  %vm1893_vm9 = vcmp.eq.f32.partialorder %v1892_v55, 1.0  ;;  %v1922_v28 = vsub.f32 %v1918_v9, %v1921_v59  ;;  %v1941_v18 = vfloor.f32 %v1938_v52 }
 0x2ee   : > { %v1885_v7 = vand.u32 2147483647, %v1884_v26  ;;  %v1894_v44 = vsel %vm1893_vm9, 0.0, %v1892_v55  ;;  %vm1903_vm10 = vcmp.eq.f32.partialorder %v1902_v3, 1.0  ;;  %vm1913_vm11 = vcmp.eq.f32.partialorder %v1912_v57, 1.0 }
 0x2ef   : > { %v3910_v24 = vpop.eup %2788  ;;  %v1895_v2 = vand.u32 2147483647, %v1894_v44  ;;  %v1904_v25 = vsel %vm1903_vm10, 0.0, %v1902_v3  ;;  %v1914_v20 = vsel %vm1913_vm11, 0.0, %v1912_v57  ;;  %vm1923_vm12 = vcmp.eq.f32.partialorder %v1922_v28, 1.0 }
 0x2f0   : > { %v3912_v1 = vor.u32 %v1886_v12, %v1885_v7  ;;  %v1905_v41 = vand.u32 2147483647, %v1904_v25  ;;  %v1915_v53 = vand.u32 2147483647, %v1914_v20  ;;  %v1924_v54 = vsel %vm1923_vm12, 0.0, %v1922_v28 }
 0x2f1   : > { %v3914_v0 = vor.u32 %v1896_v35, %v1895_v2  ;;  %v1925_v51 = vand.u32 2147483647, %v1924_v54  ;;  %v1932_v29 = vsub.f32 %v1928_v8, %v1931_v48  ;;  %v1942_v4 = vsub.f32 %v1938_v52, %v1941_v18 }
 0x2f2   : > { %v1907_v6 = vor.u32 %v1906_v5, %v1905_v41  ;;  %v1917_v45 = vor.u32 %v1916_v33, %v1915_v53  ;;  %v1946_v16 = vand.u32 2147483648, %v3903_v13  ;;  %v1948_v15 = vand.u32 2147483647, %v3905_v14 }
 0x2f3   : > { %v1927_v32 = vor.u32 %v1926_v10, %v1925_v51  ;;  %vm1933_vm13 = vcmp.eq.f32.partialorder %v1932_v29, 1.0  ;;  %vm1943_vm1 = vcmp.eq.f32.partialorder %v1942_v4, 1.0  ;;  %v1956_v12 = vand.u32 2147483648, %v3905_v14  ;;  %v4966_v10 = vld [vmem:[#allocation26_spill] sm:$0xff] }
 0x2f4   : > { %v1934_v17 = vsel %vm1933_vm13, 0.0, %v1932_v29  ;;  %v1944_v31 = vsel %vm1943_vm1, 0.0, %v1942_v4  ;;  %v1951_v9 = vfloor.f32 %v1948_v15  ;;  %vm1958_vm14 = vcmp.ne.f32.partialorder %v3912_v1, 0.0 }
 0x2f5   : > { %v1935_v35 = vand.u32 2147483647, %v1934_v17  ;;  %v1945_v62 = vand.u32 2147483647, %v1944_v31  ;;  %vm1959_vm15 = vcmp.ne.f32.partialorder %v3914_v0, 0.0  ;;  %vm1960_vm0 = vcmp.ne.f32.partialorder %v1907_v6, 0.0 }
 0x2f6   : > { %v1952_v5 = vsub.f32 %v1948_v15, %v1951_v9  ;;  %vm1961_vm3 = vcmp.ne.f32.partialorder %v1917_v45, 0.0  ;;  %vm1966_vm5 = vcmp.lt.f32.partialorder %v3912_v1, 0.0  ;;  %vm1967_vm6 = vcmp.lt.f32.partialorder %v3914_v0, 0.0 }
 0x2f7   : > { %v1937_v13 = vor.u32 %v1936_v22, %v1935_v35  ;;  %v1947_v33 = vor.u32 %v1946_v16, %v1945_v62  ;;  %vm1968_vm2 = vcmp.lt.f32.partialorder %v1907_v6, 0.0  ;;  %vm3923_vm7 = vmand %vm1966_vm5, %vm1958_vm14  ;;  %vm1969_vm9 = vcmp.lt.f32.partialorder %v1917_v45, 0.0  ;;  %v4965_v62 = vld [vmem:[#allocation25_spill] sm:$0xff] }
 0x2f8   : > { %vm1953_vm8 = vcmp.eq.f32.partialorder %v1952_v5, 1.0  ;;  %vm1970_vm10 = vcmp.lt.f32.partialorder %v1927_v32, 0.0  ;;  %vm3927_vm11 = vmand %vm1967_vm6, %vm1959_vm15  ;;  %v1982_v47 = vadd.f32 1.0, %v3912_v1  ;;  %v1983_v22 = vadd.f32 1.0, %v3914_v0 }
 0x2f9   : > { %v1954_v42 = vsel %vm1953_vm8, 0.0, %v1952_v5  ;;  %vm1963_vm12 = vcmp.ne.f32.partialorder %v1937_v13, 0.0  ;;  %vm1964_vm13 = vcmp.ne.f32.partialorder %v1947_v33, 0.0  ;;  %vm1971_vm1 = vcmp.lt.f32.partialorder %v1937_v13, 0.0  ;;  %vm3933_vm4 = vmand %vm1968_vm2, %vm1960_vm0 }
 0x2fa   : > { %v1955_v55 = vand.u32 2147483647, %v1954_v42  ;;  %vm1972_vm14 = vcmp.lt.f32.partialorder %v1947_v33, 0.0  ;;  %vm3938_vm5 = vmand %vm1969_vm9, %vm1961_vm3  ;;  %v1984_v52 = vadd.f32 1.0, %v1907_v6  ;;  %vm4958_vm15 = vcmp.ne.f32.partialorder %v1927_v32, 0.0 }
 0x2fb   : > { %vm3944_vm6 = vmand %vm1970_vm10, %vm4958_vm15  ;;  %v1985_v57 = vadd.f32 1.0, %v1917_v45  ;;  %v1986_v48 = vadd.f32 1.0, %v1927_v32  ;;  %v1987_v26 = vadd.f32 1.0, %v1937_v13  ;;  %v1988_v28 = vadd.f32 1.0, %v1947_v33 }
 0x2fc   : > { %v1957_v18 = vor.u32 %v1956_v12, %v1955_v55  ;;  %vm3949_vm0 = vmand %vm1971_vm1, %vm1963_vm12  ;;  %v1990_v44 = vsel %vm3923_vm7, %v1982_v47, %v3912_v1  ;;  %v1991_v2 = vsel %vm3927_vm11, %v1983_v22, %v3914_v0  ;;  %v1992_v25 = vsel %vm3933_vm4, %v1984_v52, %v1907_v6 }
 0x2fd   : > { %vm3962_vm3 = vmand %vm1972_vm14, %vm1964_vm13  ;;  %v1993_v41 = vsel %vm3938_vm5, %v1985_v57, %v1917_v45  ;;  %v1994_v53 = vsel %vm3944_vm6, %v1986_v48, %v1927_v32  ;;  %v1995_v1 = vsel %vm3949_vm0, %v1987_v26, %v1937_v13  ;;  %v3972_v54 = vmul.f32 6.0, %v1990_v44 }
 0x2fe   : > { %vm1965_vm2 = vcmp.ne.f32.partialorder %v1957_v18, 0.0  ;;  %vm1973_vm7 = vcmp.lt.f32.partialorder %v1957_v18, 0.0  ;;  %v1989_v0 = vadd.f32 1.0, %v1957_v18  ;;  %v1996_v51 = vsel %vm3962_vm3, %v1988_v28, %v1947_v33 }
 0x2ff   : > { %vm1981_vm4 = vmand %vm1973_vm7, %vm1965_vm2  ;;  %v3976_v29 = vmul.f32 6.0, %v1991_v2  ;;  %v3978_v4 = vmul.f32 6.0, %v1992_v25  ;;  %v3980_v6 = vmul.f32 6.0, %v1993_v41  ;;  %v3982_v45 = vmul.f32 6.0, %v1994_v53 }
 0x300   : > { %v1997_v16 = vsel %vm1981_vm4, %v1989_v0, %v1957_v18  ;;  %v3984_v15 = vmul.f32 6.0, %v1995_v1  ;;  %v3986_v32 = vmul.f32 6.0, %v1996_v51  ;;  %v2006_v12 = vfloor.f32 %v3972_v54 }
 0x301   : > { %v3989_v17 = vmul.f32 6.0, %v1997_v16  ;;  %v2007_v31 = vfloor.f32 %v3976_v29  ;;  %v4853_v9 = vfloor.f32 %v3978_v4  ;;  %v4852_v35 = vfloor.f32 %v3980_v6 }
 0x302   : > { %v1573_v5 = vmul.f32 %v4965_v62, %v4916_v56  ;;  %v4851_v13 = vfloor.f32 %v3982_v45  ;;  %v4850_v33 = vfloor.f32 %v3984_v15  ;;  %v4849_v14 = vfloor.f32 %v3986_v32 }
 0x303   : > { %v1574_v47 = vmul.f32 %v4966_v10, %v4918_v34  ;;  %v1575_v42 = vmul.f32 %v3722_v46, %v4920_v63  ;;  %v1576_v8 = vmul.f32 %v3728_v50, %v4922_v40  ;;  %v4848_v55 = vfloor.f32 %v3989_v17 }
 0x304   : > { %v1577_v56 = vmul.f32 %v3831_v37, %v4924_v19  ;;  %v1578_v59 = vmul.f32 %v3833_v11, %v4926_v43  ;;  %v1579_v22 = vmul.f32 %v3835_v58, %v4928_v21  ;;  %v1580_v34 = vmul.f32 %v3910_v24, %v4930_v23 }
 0x305   : > { %v2014_v46 = vsub.f32 %v3972_v54, %v2006_v12  ;;  %v2015_v50 = vsub.f32 %v3976_v29, %v2007_v31  ;;  %v2016_v63 = vsub.f32 %v3978_v4, %v4853_v9  ;;  %v2017_v40 = vsub.f32 %v3980_v6, %v4852_v35 }
 0x306   : > { %v2018_v19 = vsub.f32 %v3982_v45, %v4851_v13  ;;  %v2019_v43 = vsub.f32 %v3984_v15, %v4850_v33  ;;  %v2020_v21 = vsub.f32 %v3986_v32, %v4849_v14  ;;  %v2021_v23 = vsub.f32 %v3989_v17, %v4848_v55 }
 0x307   : > { %vm4967_vm8 = vcmp.gt.f32.partialorder %v3397_v60, 0.0  ;;  %vm4968_vm9 = vcmp.gt.f32.partialorder %v3400_v27, 0.0  ;;  %vm4969_vm10 = vcmp.gt.f32.partialorder %v3403_v36, 0.0  ;;  %vm4970_vm11 = vcmp.gt.f32.partialorder %v3406_v30, 0.0 }
 0x308   : > { %v1581_v37 = vsel %vm4967_vm8, %v1573_v5, 0.0  ;;  %v1582_v11 = vsel %vm4968_vm9, %v1574_v47, 0.0  ;;  %v1583_v58 = vsel %vm4969_vm10, %v1575_v42, 0.0  ;;  %v1584_v24 = vsel %vm4970_vm11, %v1576_v8, 0.0 }
 0x309   : > { %vm4971_vm12 = vcmp.gt.f32.partialorder %v3409_v38, 0.0  ;;  %vm4972_vm13 = vcmp.gt.f32.partialorder %v3412_v39, 0.0  ;;  %vm4973_vm1 = vcmp.gt.f32.partialorder %v3415_v49, 0.0  ;;  %vm4974_vm14 = vcmp.gt.f32.partialorder %v3418_v61, 0.0 }
 0x30a   : > { %v1585_v52 = vsel %vm4971_vm12, %v1577_v56, 0.0  ;;  %v1586_v3 = vsel %vm4972_vm13, %v1578_v59, 0.0  ;;  %v1587_v57 = vsel %vm4973_vm1, %v1579_v22, 0.0  ;;  %v1588_v48 = vsel %vm4974_vm14, %v1580_v34, 0.0 }
 0x30b   : > { %v2038_v26 = vmul.f32 %v2014_v46, %v1581_v37  ;;  %v4054_v28 = vmul.f32 %v2015_v50, %v1582_v11  ;;  %v4056_v18 = vmul.f32 %v2016_v63, %v1583_v58  ;;  %v4058_v7 = vmul.f32 %v2017_v40, %v1584_v24 }
 0x30c   : > { %v4060_v44 = vmul.f32 %v2018_v19, %v1585_v52  ;;  %v4062_v2 = vmul.f32 %v2019_v43, %v1586_v3  ;;  %v4064_v25 = vmul.f32 %v2020_v21, %v1587_v57  ;;  %v4066_v20 = vmul.f32 %v2021_v23, %v1588_v48 }
 0x30d   : > { %v2022_v41 = vsub.f32 1.0, %v1581_v37  ;;  %v2023_v53 = vsub.f32 1.0, %v1582_v11  ;;  %v2024_v1 = vsub.f32 1.0, %v1583_v58  ;;  %v2025_v0 = vsub.f32 1.0, %v1584_v24 }
 0x30e   : > { %v2026_v51 = vsub.f32 1.0, %v1585_v52  ;;  %v2027_v16 = vsub.f32 1.0, %v1586_v3  ;;  %v2028_v62 = vsub.f32 1.0, %v1587_v57  ;;  %v2029_v5 = vsub.f32 1.0, %v1588_v48 }
 0x30f   : > { %v2062_v10 = vsub.f32 1.0, %v2014_v46  ;;  %v2063_v47 = vsub.f32 1.0, %v2015_v50  ;;  %v2064_v42 = vsub.f32 1.0, %v2016_v63  ;;  %v2065_v8 = vsub.f32 1.0, %v2017_v40 }
 0x310   : > { %v2066_v56 = vsub.f32 1.0, %v2018_v19  ;;  %v2067_v59 = vsub.f32 1.0, %v2019_v43  ;;  %v2068_v22 = vsub.f32 1.0, %v2020_v21  ;;  %v2069_v34 = vsub.f32 1.0, %v2021_v23 }
 0x311   : > { %v4068_v55 = vmul.f32 %v2062_v10, %v1581_v37  ;;  %v4070_v14 = vmul.f32 %v2063_v47, %v1582_v11  ;;  %v4072_v33 = vmul.f32 %v2064_v42, %v1583_v58  ;;  %v4074_v13 = vmul.f32 %v2065_v8, %v1584_v24 }
 0x312   : > { %v4076_v35 = vmul.f32 %v2066_v56, %v1585_v52  ;;  %v4078_v9 = vmul.f32 %v2067_v59, %v1586_v3  ;;  %v4080_v46 = vmul.f32 %v2068_v22, %v1587_v57  ;;  %v4082_v50 = vmul.f32 %v2069_v34, %v1588_v48 }
 0x313   : > { %v4085_v63 = vmul.f32 %v2022_v41, %v3397_v60  ;;  %v4088_v40 = vmul.f32 %v2023_v53, %v3400_v27  ;;  %v4091_v19 = vmul.f32 %v2024_v1, %v3403_v36  ;;  %v4094_v43 = vmul.f32 %v2025_v0, %v3406_v30 }
 0x314   : > { %v4097_v21 = vmul.f32 %v2026_v51, %v3409_v38  ;;  %v4100_v23 = vmul.f32 %v2027_v16, %v3412_v39  ;;  %v4103_v37 = vmul.f32 %v2028_v62, %v3415_v49  ;;  %v4106_v11 = vmul.f32 %v2029_v5, %v3418_v61 }
 0x315   : > { %v2046_v58 = vsub.f32 1.0, %v2038_v26  ;;  %v2047_v24 = vsub.f32 1.0, %v4054_v28  ;;  %v2048_v52 = vsub.f32 1.0, %v4056_v18  ;;  %v2657_v3 = vtrunc.f32 %v2006_v12 }
 0x316   : > { %v2659_v57 = vtrunc.f32 %v2007_v31  ;;  %v4975_v48 = vfloor.f32 %v3978_v4  ;;  %v4976_v53 = vfloor.f32 %v3980_v6  ;;  %v2049_v0 = vsub.f32 1.0, %v4058_v7 }
 0x317   : > { %v2050_v26 = vsub.f32 1.0, %v4060_v44  ;;  %v4977_v28 = vfloor.f32 %v3982_v45  ;;  %v4978_v18 = vfloor.f32 %v3984_v15  ;;  %v4124_v12 = vcvt.f32.s32 %v2657_v3 }
 0x318   : > { %v2661_v41 = vtrunc.f32 %v4975_v48  ;;  %v2663_v1 = vtrunc.f32 %v4976_v53  ;;  %v4126_v29 = vcvt.f32.s32 %v2659_v57  ;;  %v2051_v6 = vsub.f32 1.0, %v4062_v2 }
 0x319   : > { %v2665_v51 = vtrunc.f32 %v4977_v28  ;;  %v2667_v54 = vtrunc.f32 %v4978_v18  ;;  %v2052_v7 = vsub.f32 1.0, %v4064_v25  ;;  %v2053_v45 = vsub.f32 1.0, %v4066_v20 }
 0x31a   : > { %v4128_v31 = vcvt.f32.s32 %v2661_v41  ;;  %v4130_v4 = vcvt.f32.s32 %v2663_v1  ;;  %v4140_v15 = vmul.f32 %v2046_v58, %v3397_v60  ;;  %v2103_v62 = vsub.s32 0, %v4124_v12 }
 0x31b   : > { %v4134_v16 = vcvt.f32.s32 %v2665_v51  ;;  %v4136_v44 = vcvt.f32.s32 %v2667_v54  ;;  %v2114_v5 = vsub.s32 0, %v4126_v29  ;;  %v4145_v10 = vmul.f32 %v2047_v24, %v3400_v27 }
 0x31c   : > { %v4148_v2 = vmul.f32 %v2048_v52, %v3403_v36  ;;  %v2125_v25 = vsub.s32 0, %v4128_v31  ;;  %v2136_v47 = vsub.s32 0, %v4130_v4  ;;  %v4979_v42 = vfloor.f32 %v3986_v32 }
 0x31d   : > { %v2642_v8 = vmin.u32 %v4124_v12, %v2103_v62  ;;  %v2643_v56 = vmin.u32 %v4126_v29, %v2114_v5  ;;  %v2147_v59 = vsub.s32 0, %v4134_v16  ;;  %v4980_v22 = vfloor.f32 %v3989_v17 }
 0x31e   : > { %v2669_v20 = vtrunc.f32 %v4979_v42  ;;  %v2644_v58 = vmin.u32 %v4128_v31, %v2125_v25  ;;  %v2645_v24 = vmin.u32 %v4130_v4, %v2136_v47  ;;  %v2158_v52 = vsub.s32 0, %v4136_v44 }
 0x31f   : > { %v2671_v34 = vtrunc.f32 %v4980_v22  ;;  %v4162_v3 = vmul.u32.u64.low 2863311531, %v2642_v8  ;;  %v4163_v57 = vmul.u32.u64.high 2863311531, %v2642_v8, %v4162_v3  ;;  %v4175_v17 = vmul.f32 %v2049_v0, %v3406_v30 }
 0x320   : > { %v4165_v32 = vmul.u32.u64.low 2863311531, %v2643_v56  ;;  %v4166_v48 = vmul.u32.u64.high 2863311531, %v2643_v56, %v4165_v32  ;;  %v4168_v41 = vmul.u32.u64.low 2863311531, %v2644_v58  ;;  %v4169_v53 = vmul.u32.u64.high 2863311531, %v2644_v58, %v4168_v41 }
 0x321   : > { %v4171_v1 = vmul.u32.u64.low 2863311531, %v2645_v24  ;;  %v4172_v28 = vmul.u32.u64.high 2863311531, %v2645_v24, %v4171_v1  ;;  %v4177_v51 = vcvt.f32.s32 %v2669_v20  ;;  %v2646_v18 = vmin.u32 %v4134_v16, %v2147_v59 }
 0x322   : > { %v2647_v54 = vmin.u32 %v4136_v44, %v2158_v52  ;;  %v4182_v62 = vmul.f32 %v2050_v26, %v3409_v38  ;;  %v4185_v5 = vmul.f32 %v2051_v6, %v3412_v39  ;;  %v4188_v25 = vmul.f32 %v2052_v7, %v3415_v49 }
 0x323   : > { %v4190_v47 = vcvt.f32.s32 %v2671_v34  ;;  %v2108_v0 = vshrl.u32 %v4163_v57, 2  ;;  %v2119_v42 = vshrl.u32 %v4166_v48, 2  ;;  %v2130_v59 = vshrl.u32 %v4169_v53, 2 }
 0x324   : > { %4981 = vst [vmem:[#allocation27_spill] sm:$0xff] %v4185_v5  ;;  %4982 = vst [vmem:[#allocation11_spill] sm:$0xff] %v4188_v25  ;;  %v4194_v20 = vmul.u32.u64.low 2863311531, %v2646_v18  ;;  %v4195_v22 = vmul.u32.u64.high 2863311531, %v2646_v18, %v4194_v20  ;;  %v2141_v26 = vshrl.u32 %v4172_v28, 2  ;;  %v4203_v6 = vmul.f32 %v2053_v45, %v3418_v61 }
 0x325   : > { %v4199_v52 = vmul.u32.u64.low 2863311531, %v2647_v54  ;;  %v4200_v3 = vmul.u32.u64.high 2863311531, %v2647_v54, %v4199_v52  ;;  %v2109_v7 = vmul.u32 6, %v2108_v0  ;;  %v2169_v32 = vsub.s32 0, %v4177_v51 }
 0x326   : > { %4983 = vst [vmem:[#allocation29_spill] sm:$0xff] %v4203_v6  ;;  %v2120_v34 = vmul.u32 6, %v2119_v42  ;;  %v2078_v57 = vsub.f32 1.0, %v4068_v55  ;;  %v2131_v48 = vmul.u32 6, %v2130_v59  ;;  %v2180_v1 = vsub.s32 0, %v4190_v47 }
 0x327   : > { %v2142_v41 = vmul.u32 6, %v2141_v26  ;;  %v2079_v53 = vsub.f32 1.0, %v4070_v14  ;;  %v2110_v20 = vsub.s32 %v2642_v8, %v2109_v7  ;;  %v2152_v25 = vshrl.u32 %v4195_v22, 2 }
 0x328   : > { %v2121_v28 = vsub.s32 %v2643_v56, %v2120_v34  ;;  %v2080_v52 = vsub.f32 1.0, %v4072_v33  ;;  %v2132_v45 = vsub.s32 %v2644_v58, %v2131_v48  ;;  %v2163_v0 = vshrl.u32 %v4200_v3, 2 }
 0x329   : > { %v2143_v6 = vsub.s32 %v2645_v24, %v2142_v41  ;;  %v2081_v42 = vsub.f32 1.0, %v4074_v13  ;;  %v2082_v55 = vsub.f32 1.0, %v4076_v35  ;;  %v2153_v59 = vmul.u32 6, %v2152_v25 }
 0x32a   : > { %v2648_v26 = vmin.u32 %v4177_v51, %v2169_v32  ;;  %v2083_v5 = vsub.f32 1.0, %v4078_v9  ;;  %v2111_v14 = vsub.s32 0, %v2110_v20  ;;  %v2164_v8 = vmul.u32 6, %v2163_v0 }
 0x32b   : > { %v2649_v56 = vmin.u32 %v4190_v47, %v2180_v1  ;;  %v2084_v22 = vsub.f32 1.0, %v4080_v46  ;;  %v2122_v58 = vsub.s32 0, %v2121_v28  ;;  %v2154_v24 = vsub.s32 %v2646_v18, %v2153_v59 }
 0x32c   : > { %v4220_v3 = vmul.f32 %v2078_v57, %v3397_v60  ;;  %v2133_v13 = vsub.s32 0, %v2132_v45  ;;  %v2144_v7 = vsub.s32 0, %v2143_v6  ;;  %v2165_v25 = vsub.s32 %v2647_v54, %v2164_v8 }
 0x32d   : > { %vm2102_vm5 = vcmp.lt.s32.totalorder %v4124_v12, 0  ;;  %v2155_v34 = vsub.s32 0, %v2154_v24  ;;  %v4223_v32 = vmul.u32.u64.low 2863311531, %v2648_v26  ;;  %v4224_v48 = vmul.u32.u64.high 2863311531, %v2648_v26, %v4223_v32 }
 0x32e   : > { %v2112_v41 = vsel %vm2102_vm5, %v2111_v14, %v2110_v20  ;;  %vm2113_vm15 = vcmp.lt.s32.totalorder %v4126_v29, 0  ;;  %v4227_v1 = vmul.u32.u64.low 2863311531, %v2649_v56  ;;  %v4228_v0 = vmul.u32.u64.high 2863311531, %v2649_v56, %v4227_v1 }
 0x32f   : > { %v2123_v33 = vsel %vm2113_vm15, %v2122_v58, %v2121_v28  ;;  %vm2124_vm6 = vcmp.lt.s32.totalorder %v4128_v31, 0  ;;  %vm2135_vm0 = vcmp.lt.s32.totalorder %v4130_v4, 0  ;;  %v2166_v18 = vsub.s32 0, %v2165_v25 }
 0x330   : > { %v4233_v54 = vmul.f32 %v2079_v53, %v3400_v27  ;;  %v2134_v12 = vsel %vm2124_vm6, %v2133_v13, %v2132_v45  ;;  %v2145_v57 = vsel %vm2135_vm0, %v2144_v7, %v2143_v6  ;;  %vm2146_vm3 = vcmp.lt.s32.totalorder %v4134_v16, 0 }
 0x331   : > { %v2156_v59 = vsel %vm2146_vm3, %v2155_v34, %v2154_v24  ;;  %v2174_v20 = vshrl.u32 %v4224_v48, 2  ;;  %vm2190_vm2 = vcmp.ne.s32.totalorder %v2112_v41, 0  ;;  %vm2198_vm7 = vcmp.lt.s32.totalorder %v2112_v41, 0 }
 0x332   : > { %vm2157_vm4 = vcmp.lt.s32.totalorder %v4136_v44, 0  ;;  %v2185_v29 = vshrl.u32 %v4228_v0, 2  ;;  %vm2191_vm8 = vcmp.ne.s32.totalorder %v2123_v33, 0  ;;  %vm2199_vm9 = vcmp.lt.s32.totalorder %v2123_v33, 0  ;;  %vm4239_vm14 = vmand %vm2198_vm7, %vm2190_vm2 }
 0x333   : > { %v2167_v31 = vsel %vm2157_vm4, %v2166_v18, %v2165_v25  ;;  %v2175_v4 = vmul.u32 6, %v2174_v20  ;;  %vm2192_vm10 = vcmp.ne.s32.totalorder %v2134_v12, 0  ;;  %vm2200_vm11 = vcmp.lt.s32.totalorder %v2134_v12, 0  ;;  %vm4243_vm15 = vmand %vm2199_vm9, %vm2191_vm8 }
 0x334   : > { %v2186_v53 = vmul.u32 6, %v2185_v29  ;;  %vm2193_vm12 = vcmp.ne.s32.totalorder %v2145_v57, 0  ;;  %vm2194_vm13 = vcmp.ne.s32.totalorder %v2156_v59, 0  ;;  %vm2201_vm1 = vcmp.lt.s32.totalorder %v2145_v57, 0  ;;  %vm4252_vm3 = vmand %vm2200_vm11, %vm2192_vm10 }
 0x335   : > { %v2176_v6 = vsub.s32 %v2648_v26, %v2175_v4  ;;  %vm2202_vm5 = vcmp.lt.s32.totalorder %v2156_v59, 0  ;;  %v2214_v28 = vadd.s32 6, %v2112_v41  ;;  %v2215_v45 = vadd.s32 6, %v2123_v33  ;;  %vm4262_vm7 = vmand %vm2201_vm1, %vm2193_vm12 }
 0x336   : > { %v4248_v14 = vmul.f32 %v2080_v52, %v3403_v36  ;;  %v2187_v8 = vsub.s32 %v2649_v56, %v2186_v53  ;;  %vm2195_vm6 = vcmp.ne.s32.totalorder %v2167_v31, 0  ;;  %vm2203_vm0 = vcmp.lt.s32.totalorder %v2167_v31, 0  ;;  %vm4268_vm4 = vmand %vm2202_vm5, %vm2194_vm13 }
 0x337   : > { %v4257_v26 = vmul.f32 %v2081_v42, %v3406_v30  ;;  %vm2168_vm2 = vcmp.lt.s32.totalorder %v4177_v51, 0  ;;  %v2177_v24 = vsub.s32 0, %v2176_v6  ;;  %v2216_v56 = vadd.s32 6, %v2134_v12  ;;  %vm2211_vm9 = vmand %vm2203_vm0, %vm2195_vm6 }
 0x338   : > { %v2188_v13 = vsub.s32 0, %v2187_v8  ;;  %v2217_v25 = vadd.s32 6, %v2145_v57  ;;  %v2218_v42 = vadd.s32 6, %v2156_v59  ;;  %v2219_v34 = vadd.s32 6, %v2167_v31 }
 0x339   : > { %v2178_v32 = vsel %vm2168_vm2, %v2177_v24, %v2176_v6  ;;  %vm2179_vm8 = vcmp.lt.s32.totalorder %v4190_v47, 0  ;;  %v4276_v51 = vsel %vm4239_vm14, %v2214_v28, %v2112_v41  ;;  %v4280_v48 = vsel %vm4243_vm15, %v2215_v45, %v2123_v33 }
 0x33a   : > { %v2189_v1 = vsel %vm2179_vm8, %v2188_v13, %v2187_v8  ;;  %vm2196_vm10 = vcmp.ne.s32.totalorder %v2178_v32, 0  ;;  %vm2204_vm11 = vcmp.lt.s32.totalorder %v2178_v32, 0  ;;  %v2220_v0 = vadd.s32 6, %v2178_v32 }
 0x33b   : > { %vm2197_vm12 = vcmp.ne.s32.totalorder %v2189_v1, 0  ;;  %vm2205_vm13 = vcmp.lt.s32.totalorder %v2189_v1, 0  ;;  %vm2212_vm1 = vmand %vm2204_vm11, %vm2196_vm10  ;;  %v2221_v18 = vadd.s32 6, %v2189_v1  ;;  %v4284_v47 = vsel %vm4252_vm3, %v2216_v56, %v2134_v12 }
 0x33c   : > { %vm2213_vm5 = vmand %vm2205_vm13, %vm2197_vm12  ;;  %v4288_v41 = vsel %vm4262_vm7, %v2217_v25, %v2145_v57  ;;  %v4292_v33 = vsel %vm4268_vm4, %v2218_v42, %v2156_v59  ;;  %v4294_v20 = vsel %vm2211_vm9, %v2219_v34, %v2167_v31  ;;  %v4296_v29 = vsel %vm2212_vm1, %v2220_v0, %v2178_v32 }
 0x33d   : > { %v4301_v4 = vmul.f32 %v2082_v55, %v3409_v38  ;;  %v4306_v12 = vmul.f32 %v2083_v5, %v3412_v39  ;;  %v4311_v57 = vmul.f32 %v2084_v22, %v3415_v49  ;;  %v4313_v59 = vsel %vm2213_vm5, %v2221_v18, %v2189_v1 }
 0x33e   : > { %v4994_v31 = vsub.f32 1.0, %v4082_v50  ;;  %vm2254_vm4 = vcmp.eq.s32.totalorder %v4276_v51, 3  ;;  %vm2255_vm8 = vcmp.eq.s32.totalorder %v4280_v48, 3  ;;  %vm2256_vm9 = vcmp.eq.s32.totalorder %v4284_v47, 3 }
 0x33f   : > { %vm2262_vm13 = vcmp.eq.s32.totalorder %v4276_v51, 4  ;;  %vm2263_vm6 = vcmp.eq.s32.totalorder %v4280_v48, 4  ;;  %vm4862_vm15 = vcmp.eq.s32.totalorder %v4284_v47, 4  ;;  %vm2245_vm0 = vcmp.eq.s32.totalorder %v4313_v59, 1 }
 0x340   : > { %v4318_v53 = vmul.f32 %v4994_v31, %v3418_v61  ;;  %vm4861_vm10 = vcmp.eq.s32.totalorder %v4288_v41, 4  ;;  %vm4860_vm11 = vcmp.eq.s32.totalorder %v4292_v33, 4  ;;  %vm4858_vm12 = vcmp.eq.s32.totalorder %v4294_v20, 4 }
 0x341   : > { %vm4857_vm7 = vcmp.eq.s32.totalorder %v4296_v29, 4  ;;  %vm2233_vm5 = vcmp.eq.s32.totalorder %v4288_v41, 0  ;;  %vm2234_vm1 = vcmp.eq.s32.totalorder %v4292_v33, 0  ;;  %vm2236_vm2 = vcmp.eq.s32.totalorder %v4296_v29, 0 }
 0x342   : > { %vm4859_vm3 = vcmp.eq.s32.totalorder %v4313_v59, 4  ;;  %v2270_v9 = vsel %vm2262_vm13, %v4220_v3, %v3397_v60  ;;  %v2271_v35 = vsel %vm2263_vm6, %v4233_v54, %v3400_v27  ;;  %v2272_v46 = vsel %vm4862_vm15, %v4248_v14, %v3403_v36 }
 0x343   : > { %vm2237_vm14 = vcmp.eq.s32.totalorder %v4313_v59, 0  ;;  %v2273_v50 = vsel %vm4861_vm10, %v4257_v26, %v3406_v30  ;;  %v2274_v5 = vsel %vm4860_vm11, %v4301_v4, %v3409_v38  ;;  %v2275_v55 = vsel %vm4858_vm12, %v4306_v12, %v3412_v39 }
 0x344   : > { %v2276_v22 = vsel %vm4857_vm7, %v4311_v57, %v3415_v49  ;;  %v2277_v16 = vsel %vm4859_vm3, %v4318_v53, %v3418_v61  ;;  %v2278_v6 = vsel %vm2254_vm4, %v4085_v63, %v2270_v9  ;;  %v2279_v44 = vsel %vm2255_vm8, %v4088_v40, %v2271_v35 }
 0x345   : > { %v2280_v28 = vsel %vm2256_vm9, %v4091_v19, %v2272_v46  ;;  %vm4995_vm7 = vcmp.eq.s32.totalorder %v4288_v41, 3  ;;  %vm4996_vm12 = vcmp.eq.s32.totalorder %v4292_v33, 3  ;;  %vm4997_vm3 = vcmp.eq.s32.totalorder %v4294_v20, 3  ;;  %v5013_v46 = vld [vmem:[#allocation27_spill] sm:$0xff] }
 0x346   : > { %v2281_v45 = vsel %vm4995_vm7, %v4094_v43, %v2273_v50  ;;  %v2282_v8 = vsel %vm4996_vm12, %v4097_v21, %v2274_v5  ;;  %v2283_v58 = vsel %vm4997_vm3, %v4100_v23, %v2275_v55  ;;  %vm4998_vm11 = vcmp.eq.s32.totalorder %v4296_v29, 3  ;;  %v5015_v5 = vld [vmem:[#allocation11_spill] sm:$0xff] }
 0x347   : > { %v2284_v24 = vsel %vm4998_vm11, %v4103_v37, %v2276_v22  ;;  %vm4999_vm10 = vcmp.eq.s32.totalorder %v4313_v59, 3  ;;  %vm5000_vm15 = vcmp.eq.s32.totalorder %v4276_v51, 2  ;;  %vm5001_vm7 = vcmp.eq.s32.totalorder %v4280_v48, 2  ;;  %v5017_v22 = vld [vmem:[#allocation29_spill] sm:$0xff] }
 0x348   : > { %v2285_v52 = vsel %vm4999_vm10, %v4106_v11, %v2277_v16  ;;  %v2286_v56 = vsel %vm5000_vm15, %v4085_v63, %v2278_v6  ;;  %v2287_v13 = vsel %vm5001_vm7, %v4088_v40, %v2279_v44  ;;  %vm5002_vm12 = vcmp.eq.s32.totalorder %v4284_v47, 2 }
 0x349   : > { %v2288_v7 = vsel %vm5002_vm12, %v4091_v19, %v2280_v28  ;;  %vm5003_vm3 = vcmp.eq.s32.totalorder %v4288_v41, 2  ;;  %vm5004_vm11 = vcmp.eq.s32.totalorder %v4292_v33, 2  ;;  %vm5005_vm10 = vcmp.eq.s32.totalorder %v4294_v20, 2 }
 0x34a   : > { %v2289_v25 = vsel %vm5003_vm3, %v4094_v43, %v2281_v45  ;;  %v2290_v42 = vsel %vm5004_vm11, %v4097_v21, %v2282_v8  ;;  %v2291_v34 = vsel %vm5005_vm10, %v4100_v23, %v2283_v58  ;;  %vm5006_vm15 = vcmp.eq.s32.totalorder %v4296_v29, 2 }
 0x34b   : > { %v2292_v32 = vsel %vm5006_vm15, %v4103_v37, %v2284_v24  ;;  %vm5007_vm7 = vcmp.eq.s32.totalorder %v4313_v59, 2  ;;  %vm5008_vm12 = vcmp.eq.s32.totalorder %v4276_v51, 1  ;;  %vm5009_vm3 = vcmp.eq.s32.totalorder %v4280_v48, 1 }
 0x34c   : > { %v2293_v1 = vsel %vm5007_vm7, %v4106_v11, %v2285_v52  ;;  %v2294_v0 = vsel %vm5008_vm12, %v4140_v15, %v2286_v56  ;;  %v2295_v18 = vsel %vm5009_vm3, %v4145_v10, %v2287_v13  ;;  %vm5010_vm11 = vcmp.eq.s32.totalorder %v4284_v47, 1 }
 0x34d   : > { %v2296_v31 = vsel %vm5010_vm11, %v4148_v2, %v2288_v7  ;;  %vm5011_vm10 = vcmp.eq.s32.totalorder %v4288_v41, 1  ;;  %vm5012_vm15 = vcmp.eq.s32.totalorder %v4292_v33, 1  ;;  %vm5014_vm7 = vcmp.eq.s32.totalorder %v4294_v20, 1 }
 0x34e   : > { %v2297_v9 = vsel %vm5011_vm10, %v4175_v17, %v2289_v25  ;;  %v2298_v35 = vsel %vm5012_vm15, %v4182_v62, %v2290_v42  ;;  %v2299_v50 = vsel %vm5014_vm7, %v5013_v46, %v2291_v34  ;;  %vm5016_vm12 = vcmp.eq.s32.totalorder %v4296_v29, 1 }
 0x34f   : > { %v2300_v55 = vsel %vm5016_vm12, %v5015_v5, %v2292_v32  ;;  %v2301_v16 = vsel %vm2245_vm0, %v5017_v22, %v2293_v1  ;;  %vm5018_vm3 = vcmp.eq.s32.totalorder %v4276_v51, 0  ;;  %vm5019_vm11 = vcmp.eq.s32.totalorder %v4280_v48, 0 }
 0x350   : > { %v2302_v6 = vsel %vm5018_vm3, %v3397_v60, %v2294_v0  ;;  %v2303_v44 = vsel %vm5019_vm11, %v3400_v27, %v2295_v18  ;;  %vm5020_vm10 = vcmp.eq.s32.totalorder %v4284_v47, 0  ;;  %v2305_v45 = vsel %vm2233_vm5, %v3406_v30, %v2297_v9 }
 0x351   : > { %v2304_v28 = vsel %vm5020_vm10, %v3403_v36, %v2296_v31  ;;  %v2306_v8 = vsel %vm2234_vm1, %v3409_v38, %v2298_v35  ;;  %vm5021_vm15 = vcmp.eq.s32.totalorder %v4294_v20, 0  ;;  %v2308_v24 = vsel %vm2236_vm2, %v3415_v49, %v2300_v55  ;;  %2382 = vst [vmem:[%s4488_s17] sm:$0xff] %v2302_v6  ;;  %2383 = vst [vmem:[%s4488_s17 + $0x8] sm:$0xff] %v2303_v44 }
 0x352   : > { %v2307_v58 = vsel %vm5021_vm15, %v3412_v39, %v2299_v50  ;;  %2384 = vst [vmem:[%s4488_s17 + $0x10] sm:$0xff] %v2304_v28  ;;  %v2309_v52 = vsel %vm2237_vm14, %v3418_v61, %v2301_v16  ;;  %v2310_v56 = vsel %vm2254_vm4, %v4140_v15, %v4085_v63  ;;  %v2311_v13 = vsel %vm2255_vm8, %v4145_v10, %v4088_v40 }
 0x353   : > { %v2312_v7 = vsel %vm2256_vm9, %v4148_v2, %v4091_v19  ;;  %2385 = vst [vmem:[%s4488_s17 + $0x18] sm:$0xff] %v2305_v45  ;;  %2386 = vst [vmem:[%s4488_s17 + $0x20] sm:$0xff] %v2306_v8  ;;  %vm5022_vm7 = vcmp.eq.s32.totalorder %v4288_v41, 3  ;;  %vm5023_vm12 = vcmp.eq.s32.totalorder %v4292_v33, 3  ;;  %vm5024_vm3 = vcmp.eq.s32.totalorder %v4294_v20, 3 }
 0x354   : > { %2387 = vst [vmem:[%s4488_s17 + $0x28] sm:$0xff] %v2307_v58  ;;  %2388 = vst [vmem:[%s4488_s17 + $0x30] sm:$0xff] %v2308_v24  ;;  %v2313_v25 = vsel %vm5022_vm7, %v4175_v17, %v4094_v43  ;;  %v2314_v42 = vsel %vm5023_vm12, %v4182_v62, %v4097_v21  ;;  %v2315_v34 = vsel %vm5024_vm3, %v5013_v46, %v4100_v23  ;;  %vm5025_vm11 = vcmp.eq.s32.totalorder %v4296_v29, 3 }
 0x355   : > { %v2316_v32 = vsel %vm5025_vm11, %v5015_v5, %v4103_v37  ;;  %2389 = vst [vmem:[%s4488_s17 + $0x38] sm:$0xff] %v2309_v52  ;;  %vm5026_vm10 = vcmp.eq.s32.totalorder %v4313_v59, 3  ;;  %vm5027_vm15 = vcmp.eq.s32.totalorder %v4276_v51, 2  ;;  %vm5028_vm7 = vcmp.eq.s32.totalorder %v4280_v48, 2 }
 0x356   : > { %v2317_v1 = vsel %vm5026_vm10, %v5017_v22, %v4106_v11  ;;  %v2318_v0 = vsel %vm5027_vm15, %v3397_v60, %v2310_v56  ;;  %v2319_v18 = vsel %vm5028_vm7, %v3400_v27, %v2311_v13  ;;  %vm5029_vm12 = vcmp.eq.s32.totalorder %v4284_v47, 2 }
 0x357   : > { %v2320_v31 = vsel %vm5029_vm12, %v3403_v36, %v2312_v7  ;;  %vm5030_vm3 = vcmp.eq.s32.totalorder %v4288_v41, 2  ;;  %vm5031_vm11 = vcmp.eq.s32.totalorder %v4292_v33, 2  ;;  %vm5032_vm10 = vcmp.eq.s32.totalorder %v4294_v20, 2 }
 0x358   : > { %v2321_v9 = vsel %vm5030_vm3, %v3406_v30, %v2313_v25  ;;  %v2322_v35 = vsel %vm5031_vm11, %v3409_v38, %v2314_v42  ;;  %v2323_v50 = vsel %vm5032_vm10, %v3412_v39, %v2315_v34  ;;  %vm5033_vm15 = vcmp.eq.s32.totalorder %v4296_v29, 2 }
 0x359   : > { %v2324_v55 = vsel %vm5033_vm15, %v3415_v49, %v2316_v32  ;;  %vm5034_vm7 = vcmp.eq.s32.totalorder %v4313_v59, 2  ;;  %vm5035_vm12 = vcmp.eq.s32.totalorder %v4276_v51, 1  ;;  %vm5036_vm3 = vcmp.eq.s32.totalorder %v4280_v48, 1 }
 0x35a   : > { %v2325_v16 = vsel %vm5034_vm7, %v3418_v61, %v2317_v1  ;;  %v2326_v6 = vsel %vm5035_vm12, %v3397_v60, %v2318_v0  ;;  %v2327_v44 = vsel %vm5036_vm3, %v3400_v27, %v2319_v18  ;;  %vm5037_vm11 = vcmp.eq.s32.totalorder %v4284_v47, 1 }
 0x35b   : > { %v2328_v28 = vsel %vm5037_vm11, %v3403_v36, %v2320_v31  ;;  %vm5038_vm10 = vcmp.eq.s32.totalorder %v4288_v41, 1  ;;  %vm5039_vm15 = vcmp.eq.s32.totalorder %v4292_v33, 1  ;;  %vm5040_vm7 = vcmp.eq.s32.totalorder %v4294_v20, 1 }
 0x35c   : > { %v2329_v45 = vsel %vm5038_vm10, %v3406_v30, %v2321_v9  ;;  %v2330_v8 = vsel %vm5039_vm15, %v3409_v38, %v2322_v35  ;;  %v2331_v58 = vsel %vm5040_vm7, %v3412_v39, %v2323_v50  ;;  %vm5041_vm12 = vcmp.eq.s32.totalorder %v4296_v29, 1 }
 0x35d   : > { %v2332_v24 = vsel %vm5041_vm12, %v3415_v49, %v2324_v55  ;;  %v2333_v52 = vsel %vm2245_vm0, %v3418_v61, %v2325_v16  ;;  %vm5042_vm3 = vcmp.eq.s32.totalorder %v4276_v51, 0  ;;  %vm5043_vm11 = vcmp.eq.s32.totalorder %v4280_v48, 0 }
 0x35e   : > { %v2334_v56 = vsel %vm5042_vm3, %v4220_v3, %v2326_v6  ;;  %v2335_v13 = vsel %vm5043_vm11, %v4233_v54, %v2327_v44  ;;  %vm5044_vm10 = vcmp.eq.s32.totalorder %v4284_v47, 0  ;;  %v2337_v25 = vsel %vm2233_vm5, %v4257_v26, %v2329_v45 }
 0x35f   : > { %v2336_v7 = vsel %vm5044_vm10, %v4248_v14, %v2328_v28  ;;  %v2338_v42 = vsel %vm2234_vm1, %v4301_v4, %v2330_v8  ;;  %vm5045_vm15 = vcmp.eq.s32.totalorder %v4294_v20, 0  ;;  %v2340_v32 = vsel %vm2236_vm2, %v4311_v57, %v2332_v24  ;;  %2390 = vst [vmem:[%s4488_s17 + $0x40] sm:$0xff] %v2334_v56  ;;  %2391 = vst [vmem:[%s4488_s17 + $0x48] sm:$0xff] %v2335_v13 }
 0x360   : > { %v2339_v34 = vsel %vm5045_vm15, %v4306_v12, %v2331_v58  ;;  %2392 = vst [vmem:[%s4488_s17 + $0x50] sm:$0xff] %v2336_v7  ;;  %v2341_v1 = vsel %vm2237_vm14, %v4318_v53, %v2333_v52  ;;  %v2342_v0 = vsel %vm2262_vm13, %v3397_v60, %v4140_v15  ;;  %v2343_v18 = vsel %vm2263_vm6, %v3400_v27, %v4145_v10 }
 0x361   : > { %vm5046_vm7 = vcmp.eq.s32.totalorder %v4284_v47, 4  ;;  %2393 = vst [vmem:[%s4488_s17 + $0x58] sm:$0xff] %v2337_v25  ;;  %2394 = vst [vmem:[%s4488_s17 + $0x60] sm:$0xff] %v2338_v42  ;;  %vm5047_vm12 = vcmp.eq.s32.totalorder %v4288_v41, 4  ;;  %vm5048_vm13 = vcmp.eq.s32.totalorder %v4292_v33, 4  ;;  %vm5049_vm6 = vcmp.eq.s32.totalorder %v4294_v20, 4 }
 0x362   : > { %v2344_v31 = vsel %vm5046_vm7, %v3403_v36, %v4148_v2  ;;  %2395 = vst [vmem:[%s4488_s17 + $0x68] sm:$0xff] %v2339_v34  ;;  %2396 = vst [vmem:[%s4488_s17 + $0x70] sm:$0xff] %v2340_v32  ;;  %v2345_v9 = vsel %vm5047_vm12, %v3406_v30, %v4175_v17  ;;  %v2346_v15 = vsel %vm5048_vm13, %v3409_v38, %v4182_v62  ;;  %vm5050_vm3 = vcmp.eq.s32.totalorder %v4296_v29, 4 }
 0x363   : > { %v2347_v10 = vsel %vm5049_vm6, %v3412_v39, %v5013_v46  ;;  %v2348_v2 = vsel %vm5050_vm3, %v3415_v49, %v5015_v5  ;;  %2397 = vst [vmem:[%s4488_s17 + $0x78] sm:$0xff] %v2341_v1  ;;  %vm5051_vm11 = vcmp.eq.s32.totalorder %v4313_v59, 4  ;;  %v2350_v62 = vsel %vm2254_vm4, %v3397_v60, %v2342_v0 }
 0x364   : > { %v2349_v17 = vsel %vm5051_vm11, %v3418_v61, %v5017_v22  ;;  %v2351_v46 = vsel %vm2255_vm8, %v3400_v27, %v2343_v18  ;;  %v2352_v35 = vsel %vm2256_vm9, %v3403_v36, %v2344_v31  ;;  %vm5052_vm10 = vcmp.eq.s32.totalorder %v4288_v41, 3 }
 0x365   : > { %v2353_v5 = vsel %vm5052_vm10, %v3406_v30, %v2345_v9  ;;  %vm5053_vm15 = vcmp.eq.s32.totalorder %v4292_v33, 3  ;;  %vm5054_vm4 = vcmp.eq.s32.totalorder %v4294_v20, 3  ;;  %vm5055_vm7 = vcmp.eq.s32.totalorder %v4296_v29, 3 }
 0x366   : > { %v2354_v22 = vsel %vm5053_vm15, %v3409_v38, %v2346_v15  ;;  %v2355_v60 = vsel %vm5054_vm4, %v3412_v39, %v2347_v10  ;;  %v2356_v27 = vsel %vm5055_vm7, %v3415_v49, %v2348_v2  ;;  %vm5056_vm8 = vcmp.eq.s32.totalorder %v4313_v59, 3 }
 0x367   : > { %v2357_v36 = vsel %vm5056_vm8, %v3418_v61, %v2349_v17  ;;  %vm5057_vm9 = vcmp.eq.s32.totalorder %v4276_v51, 2  ;;  %vm5058_vm12 = vcmp.eq.s32.totalorder %v4280_v48, 2  ;;  %vm5059_vm13 = vcmp.eq.s32.totalorder %v4284_v47, 2 }
 0x368   : > { %v2358_v30 = vsel %vm5057_vm9, %v4220_v3, %v2350_v62  ;;  %v2359_v38 = vsel %vm5058_vm12, %v4233_v54, %v2351_v46  ;;  %v2360_v39 = vsel %vm5059_vm13, %v4248_v14, %v2352_v35  ;;  %vm5060_vm6 = vcmp.eq.s32.totalorder %v4288_v41, 2 }
 0x369   : > { %v2361_v49 = vsel %vm5060_vm6, %v4257_v26, %v2353_v5  ;;  %vm5061_vm3 = vcmp.eq.s32.totalorder %v4292_v33, 2  ;;  %vm5062_vm11 = vcmp.eq.s32.totalorder %v4294_v20, 2  ;;  %vm5063_vm10 = vcmp.eq.s32.totalorder %v4296_v29, 2 }
 0x36a   : > { %v2362_v61 = vsel %vm5061_vm3, %v4301_v4, %v2354_v22  ;;  %v2363_v3 = vsel %vm5062_vm11, %v4306_v12, %v2355_v60  ;;  %v2364_v54 = vsel %vm5063_vm10, %v4311_v57, %v2356_v27  ;;  %vm5064_vm15 = vcmp.eq.s32.totalorder %v4313_v59, 2 }
 0x36b   : > { %v2365_v14 = vsel %vm5064_vm15, %v4318_v53, %v2357_v36  ;;  %vm5065_vm4 = vcmp.eq.s32.totalorder %v4276_v51, 1  ;;  %vm5066_vm7 = vcmp.eq.s32.totalorder %v4280_v48, 1  ;;  %vm5067_vm8 = vcmp.eq.s32.totalorder %v4284_v47, 1 }
 0x36c   : > { %v2366_v26 = vsel %vm5065_vm4, %v4085_v63, %v2358_v30  ;;  %v2367_v4 = vsel %vm5066_vm7, %v4088_v40, %v2359_v38  ;;  %v2368_v12 = vsel %vm5067_vm8, %v4091_v19, %v2360_v39  ;;  %vm5068_vm9 = vcmp.eq.s32.totalorder %v4288_v41, 1 }
 0x36d   : > { %v2369_v57 = vsel %vm5068_vm9, %v4094_v43, %v2361_v49  ;;  %vm5069_vm12 = vcmp.eq.s32.totalorder %v4292_v33, 1  ;;  %vm5070_vm13 = vcmp.eq.s32.totalorder %v4294_v20, 1  ;;  %vm5071_vm6 = vcmp.eq.s32.totalorder %v4296_v29, 1 }
 0x36e   : > { %v2370_v53 = vsel %vm5069_vm12, %v4097_v21, %v2362_v61  ;;  %v2371_v50 = vsel %vm5070_vm13, %v4100_v23, %v2363_v3  ;;  %v2372_v55 = vsel %vm5071_vm6, %v4103_v37, %v2364_v54  ;;  %v2373_v16 = vsel %vm2245_vm0, %v4106_v11, %v2365_v14 }
 0x36f   : > { %vm5072_vm3 = vcmp.eq.s32.totalorder %v4276_v51, 0  ;;  %vm5073_vm11 = vcmp.eq.s32.totalorder %v4280_v48, 0  ;;  %vm5074_vm10 = vcmp.eq.s32.totalorder %v4284_v47, 0  ;;  %vm5075_vm0 = vcmp.eq.s32.totalorder %v4294_v20, 0 }
 0x370   : > { %v2374_v6 = vsel %vm5072_vm3, %v4085_v63, %v2366_v26  ;;  %v2375_v44 = vsel %vm5073_vm11, %v4088_v40, %v2367_v4  ;;  %v2376_v28 = vsel %vm5074_vm10, %v4091_v19, %v2368_v12  ;;  %v2377_v63 = vsel %vm2233_vm5, %v4094_v43, %v2369_v57 }
 0x371   : > { %v2378_v40 = vsel %vm2234_vm1, %v4097_v21, %v2370_v53  ;;  %v2379_v19 = vsel %vm5075_vm0, %v4100_v23, %v2371_v50  ;;  %v2380_v51 = vsel %vm2236_vm2, %v4103_v37, %v2372_v55  ;;  %2398 = vst [vmem:[%s4488_s17 + $0x80] sm:$0xff] %v2374_v6  ;;  %2399 = vst [vmem:[%s4488_s17 + $0x88] sm:$0xff] %v2375_v44 }
 0x372   : > { %2400 = vst [vmem:[%s4488_s17 + $0x90] sm:$0xff] %v2376_v28  ;;  %v2381_v43 = vsel %vm2237_vm14, %v4106_v11, %v2373_v16  ;;  %2401 = vst [vmem:[%s4488_s17 + $0x98] sm:$0xff] %v2377_v63 }
 0x373   : > { %2402 = vst [vmem:[%s4488_s17 + $0xa0] sm:$0xff] %v2378_v40  ;;  %2403 = vst [vmem:[%s4488_s17 + $0xa8] sm:$0xff] %v2379_v19 }
 0x374   : > { %2404 = vst [vmem:[%s4488_s17 + $0xb0] sm:$0xff] %v2380_v51  ;;  %2405 = vst [vmem:[%s4488_s17 + $0xb8] sm:$0xff] %v2381_v43 }
 0x375   : > { %2861 = shalt.err (!%p2858_p7)
}
 0x376   : > { %s2862_s24 = scalar_lea.hbm %s4731_s28, 3072  ;;  %s2866_s26 = scalar_lea.hbm %s4802_s2, 6144 }
 0x377   : > { %p2863_p9 = scmp.ne.s32.totalorder %s4731_s28, %s2862_s24  ;;  %p2867_p5 = scmp.lt.u32.totalorder %s4731_s28, %s4802_s2 }
 0x378   : > { %p2868_p11 = scmp.lt.u32.totalorder %s2866_s26, %s2862_s24  ;;  %p2870_p4 = scmp.lt.u32.totalorder %s2862_s24, %s4731_s28 }
 0x379   : > { %p2864_p2 = pnand %p2863_p9, %p3035_p12 }
 0x37a   : > { %p2869_p1 = por %p2868_p11, %p2867_p5 }
 0x37b   : > { %p2865_p0 = pneg %p2864_p2 }
 0x37c   : > { %p2871_p6 = por %p2870_p4, %p2869_p1 }
 0x37e   : > { %p2872_p8 = pnand %p2871_p6, %p2865_p0 }
 0x380   : > { %2875 = shalt.err (!%p2872_p8)
}
 0x381   : > { %s2927_s3 = smov 1024   ;;  %s2928_s15 = smov 64  }
 0x382   : > { %2696 = dma.vmem_to_hbm [thread:$0]  (%p3035_p12), %s4733_s19, 3072, %s4731_s28, %s2407_s4, %s2927_s3, %s2927_s3, %s2928_s15  }
 0x383 PF: > { %s2435_s17 = sand.u32 1, %s2906_s9   ;;  %p5076_p10 = scmp.ne.s32.totalorder %s4864_s16, 0 }
 0x384   : > { %p5077_p13 = scmp.ge.s32.totalorder %s2918_s12, 2  ;;  %s2436_s27 = scalar_lea.sflag [#allocation4], %s2435_s17 }
 0x386   : > { %p2707_p3 = pnand %p5077_p13, %p5076_p10 }
 0x388   : > { %2901 = dma.done.wait (!%p2707_p3), %s2436_s27, 3072  }
 0x389   : > { %2903 = vsyncadd (!%p2707_p3), %s2436_s27, 4294964224  ;;  %p16_p7 = scmp.ge.s32.totalorder %s3000_s21, 4   ;;  %s5078_s9 = smov %s2910_s10 }
 0x38a   : > { %s5079_s10 = smov %s2914_s11  ;;  %s5080_s11 = smov %s3031_s8 }
 0x38b   : > { %s5081_s12 = smov %s3000_s21  ;;  %18 = sbr.rel (!%p16_p7) target bundleno = 6 (0x6), region = 77 }
 0x392   :  { %2441 = vsyncpa [#allocation3], 1 }
 0x393   :  { %2443 = vsyncpa [#allocation3 + $0x1], 1 }
 0x394   :  { %2444 = vsyncpa [#allocation6], 1 }
 0x395   :  { %2445 = vsyncpa [#allocation4], 1 }
 0x396   :  { %2447 = vsyncpa [#allocation4 + $0x1], 1 }

</bundles_post_ra>
